<compile_context>
chip_gen: v6e
topology: v6e:2x2x1
jax: 0.10.0
libtpu: 0.0.40
codegen_flags: <defaults>
</compile_context>

<pallas_src>
import jax
import jax.numpy as jnp
import numpy as np
from jax.experimental import pallas as pl
from jax.experimental.pallas import tpu as pltpu

FEATURES_DIM = 150
ACTION_DIM = 2048
INPUT_DIM = FEATURES_DIM + ACTION_DIM          # 2198
HIDDEN_DIM = INPUT_DIM // 4                    # 549
SPATIAL = 7 * 7                                # 49

FEAT_PAD = 160                                 # 150 -> 20*8 (sublane-aligned contraction)
HID_PAD = 640                                  # 549 -> 5*128
OUT_PAD = 128                                  # 1   -> 128 (lane-dense output store)
BATCH_TILE = 8                                 # batch rows per grid step


def qnet_kernel(feat_ref, act_ref, w1f_ref, w1a_ref, b1_ref, w2_ref, b2_ref, out_ref):
    # AdaptiveAvgPool2d((1,1)) over the 7x7 grid == mean over the 49 spatial rows.
    # Per-tile sublane reduction in f32 (XLU/VPU — fully hidden under the actions DMA),
    # with the 1/49 scale applied BEFORE the bf16 cast so rounding happens at the
    # natural activation scale. Any garbage rows in a partial final batch tile stay
    # confined to their own (masked-on-write) output rows — no cross-row mixing.
    act = act_ref[...].astype(jnp.float32)                       # (bB, 49, 2048)
    pooled = jnp.sum(act, axis=1) * (1.0 / SPATIAL)              # (bB, 2048) f32

    # fc1 on concat([features, pooled]) split into two matmuls: tiny feature half in
    # fp32, 2048-wide pooled-action half as bf16 x bf16 with f32 MXU accumulation
    # (fp32 MXU is multi-pass emulation on v6e/v7x).
    h = (jnp.dot(feat_ref[...], w1f_ref[...], preferred_element_type=jnp.float32)
         + jnp.dot(pooled.astype(jnp.bfloat16), w1a_ref[...],
                   preferred_element_type=jnp.float32)
         + b1_ref[...])                                          # (bB, HID_PAD)
    h = jnp.maximum(h, 0.0)                                      # ReLU (f32 VPU)

    # fc2: lane-dense 128-wide output; the real scalar lives in column 0.
    out_ref[...] = (jnp.dot(h, w2_ref[...], preferred_element_type=jnp.float32)
                    + b2_ref[...])                               # (bB, OUT_PAD)


def prepare_params(params):
    """One-time weight prep: pad to lane/sublane-friendly shapes, bf16-cast the big matrix.

    Call once outside the per-step path and reuse for every qnet_forward call so no
    weight padding/copy traffic is paid per invocation.
    """
    w1, b1, w2, b2 = params                    # w1: (2198, 549), w2: (549, 1)
    w1 = w1.astype(jnp.float32)
    w1f = jnp.zeros((FEAT_PAD, HID_PAD), jnp.float32).at[
        :FEATURES_DIM, :HIDDEN_DIM].set(w1[:FEATURES_DIM])
    # Big action half in bf16 (f32 MXU accumulation in the kernel). No 1/49 fold: the
    # mean is taken in f32 inside the kernel before the bf16 cast.
    w1a = jnp.zeros((ACTION_DIM, HID_PAD), jnp.float32).at[
        :, :HIDDEN_DIM].set(w1[FEATURES_DIM:]).astype(jnp.bfloat16)
    b1p = jnp.zeros((1, HID_PAD), jnp.float32).at[0, :HIDDEN_DIM].set(b1)
    w2p = jnp.zeros((HID_PAD, OUT_PAD), jnp.float32).at[:HIDDEN_DIM, 0].set(w2[:, 0])
    b2p = jnp.zeros((1, OUT_PAD), jnp.float32).at[0, 0].set(b2[0])
    return w1f, w1a, b1p, w2p, b2p


@jax.jit
def qnet_forward(features, actions, prep):
    """features: (B, 150); actions: (B, 7*7*2048) in the producer's dtype (bf16 ideal,
    fp32 works); prep = prepare_params(params). Returns (B, 1), matching QNet.forward.

    Shapes (and hence B) are jit-static, so variable batch sizes retrace. For many tiny
    evaluations, batch them into one larger-B call — per-call dispatch dominates the
    ~1 us of useful DMA at B=2.
    """
    w1f, w1a, b1p, w2p, b2p = prep
    B = features.shape[0]
    bB = min(BATCH_TILE, B)                     # full-array block when B <= 8
    grid = (pl.cdiv(B, bB),)

    # Tiny per-call pad of the feature contraction dim to a multiple of 8.
    feat = jnp.zeros((B, FEAT_PAD), jnp.float32).at[:, :FEATURES_DIM].set(
        features.astype(jnp.float32))
    # Free row-major view (no copy, no dtype cast): one contiguous DMA per batch tile.
    act3d = actions.reshape(B, SPATIAL, ACTION_DIM)

    act_bytes = act3d.size * act3d.dtype.itemsize
    flops = (2 * B * (FEAT_PAD * HID_PAD + ACTION_DIM * HID_PAD + HID_PAD * OUT_PAD)
             + B * SPATIAL * ACTION_DIM)
    bytes_accessed = (feat.size * 4 + act_bytes + w1f.size * 4 + w1a.size * 2
                      + b1p.size * 4 + w2p.size * 4 + b2p.size * 4 + B * OUT_PAD * 4)

    out = pl.pallas_call(
        qnet_kernel,
        out_shape=jax.ShapeDtypeStruct((B, OUT_PAD), jnp.float32),
        grid=grid,
        in_specs=[
            pl.BlockSpec((bB, FEAT_PAD), lambda i: (i, 0)),
            pl.BlockSpec((bB, SPATIAL, ACTION_DIM), lambda i: (i, 0, 0)),
            # Weights/biases: constant index_map -> fetched once, VMEM-resident.
            pl.BlockSpec((FEAT_PAD, HID_PAD), lambda i: (0, 0)),
            pl.BlockSpec((ACTION_DIM, HID_PAD), lambda i: (0, 0)),
            pl.BlockSpec((1, HID_PAD), lambda i: (0, 0)),
            pl.BlockSpec((HID_PAD, OUT_PAD), lambda i: (0, 0)),
            pl.BlockSpec((1, OUT_PAD), lambda i: (0, 0)),
        ],
        out_specs=pl.BlockSpec((bB, OUT_PAD), lambda i: (i, 0)),
        compiler_params=pltpu.CompilerParams(
            dimension_semantics=("parallel",),      # v7x: shard batch tiles across 2 TCs
            vmem_limit_bytes=32 * 1024 * 1024,      # explicit (v5e scoped default 16 MiB)
        ),
        cost_estimate=pl.CostEstimate(flops=flops, transcendentals=0,
                                      bytes_accessed=bytes_accessed),
    )(feat, act3d, w1f, w1a, b1p, w2p, b2p)

    return out[:, :1]


def qnet_ref(features, actions, params):
    """Pure-JAX fp32 reference mirroring the PyTorch forward exactly."""
    w1, b1, w2, b2 = params
    B = features.shape[0]
    a = actions.reshape(B, 7, 7, ACTION_DIM)          # .view(-1,7,7,2048)
    a = jnp.transpose(a, (0, 3, 1, 2))                # .permute(0,3,1,2) -> NCHW
    pooled = jnp.mean(a, axis=(2, 3))                 # AdaptiveAvgPool2d((1,1)) + squeeze
    fa = jnp.concatenate([features, pooled], axis=1)  # (B, 2198)
    h = jnp.maximum(fa @ w1 + b1, 0.0)                # fc1 + ReLU
    return h @ w2 + b2                                # fc2 -> (B, 1)


if __name__ == "__main__":
    key = jax.random.PRNGKey(0)
    k_feat, k_act, k_w1, k_b1, k_w2, k_b2 = jax.random.split(key, 6)

    B = 2
    features = jax.random.normal(k_feat, (B, FEATURES_DIM), dtype=jnp.float32)
    # Producer dtype bf16 (recommended path: halves the dominant HBM read). fp32 inputs
    # also work — the kernel consumes whatever dtype arrives, no wrapper cast.
    actions = jax.random.normal(
        k_act, (B, SPATIAL * ACTION_DIM), dtype=jnp.float32).astype(jnp.bfloat16)

    # Deterministic init mimicking PyTorch nn.Linear U(-1/sqrt(fan_in), 1/sqrt(fan_in)).
    bound1 = 1.0 / np.sqrt(INPUT_DIM)
    bound2 = 1.0 / np.sqrt(HIDDEN_DIM)
    w1 = jax.random.uniform(k_w1, (INPUT_DIM, HIDDEN_DIM), jnp.float32, -bound1, bound1)
    b1 = jax.random.uniform(k_b1, (HIDDEN_DIM,), jnp.float32, -bound1, bound1)
    w2 = jax.random.uniform(k_w2, (HIDDEN_DIM, 1), jnp.float32, -bound2, bound2)
    b2 = jax.random.uniform(k_b2, (1,), jnp.float32, -bound2, bound2)
    params = (w1, b1, w2, b2)

    prep = prepare_params(params)          # one-time pad + bf16 cast, reused every call

    out = qnet_forward(features, actions, prep)
    out = jax.block_until_ready(out)

    ref = qnet_ref(features, actions.astype(jnp.float32), params)
    # bf16 action weights / pooled operand (with fp32 accumulation) -> ~1e-3 rel error.
    np.testing.assert_allclose(np.asarray(out), np.asarray(ref), rtol=1e-2, atol=1e-2)

    print("KERNEL_OK")
</pallas_src>

<mosaic_0001>
module attributes {stable_mosaic.version = 11 : i64} {
  func.func @qnet_kernel(%arg0: i32, %arg1: memref<2x160xf32, #tpu.memory_space<vmem>>, %arg2: memref<2x49x2048xbf16, #tpu.memory_space<vmem>>, %arg3: memref<160x640xf32, #tpu.memory_space<vmem>>, %arg4: memref<2048x640xbf16, #tpu.memory_space<vmem>>, %arg5: memref<1x640xf32, #tpu.memory_space<vmem>>, %arg6: memref<640x128xf32, #tpu.memory_space<vmem>>, %arg7: memref<1x128xf32, #tpu.memory_space<vmem>>, %arg8: memref<2x128xf32, #tpu.memory_space<vmem>>) attributes {dimension_semantics = [#tpu.dimension_semantics<parallel>], iteration_bounds = array<i64: 1>, scalar_prefetch = 0 : i64, scratch_operands = 0 : i64, tpu.core_type = #tpu.core_type<tc>, window_params = [{transform_indices = @transform_0, window_bounds = array<i64: 2, 160>}, {transform_indices = @transform_1, window_bounds = array<i64: 2, 49, 2048>}, {pipeline_mode = #tpu.pipeline_mode<synchronous>, transform_indices = @transform_2, window_bounds = array<i64: 160, 640>}, {pipeline_mode = #tpu.pipeline_mode<synchronous>, transform_indices = @transform_3, window_bounds = array<i64: 2048, 640>}, {pipeline_mode = #tpu.pipeline_mode<synchronous>, transform_indices = @transform_4, window_bounds = array<i64: 1, 640>}, {pipeline_mode = #tpu.pipeline_mode<synchronous>, transform_indices = @transform_5, window_bounds = array<i64: 640, 128>}, {pipeline_mode = #tpu.pipeline_mode<synchronous>, transform_indices = @transform_6, window_bounds = array<i64: 1, 128>}, {transform_indices = @transform_7, window_bounds = array<i64: 2, 128>}]} {
    %c0 = arith.constant 0 : index
    %c0_0 = arith.constant 0 : index
    %c0_1 = arith.constant 0 : index
    %0 = vector.load %arg2[%c0, %c0_0, %c0_1] : memref<2x49x2048xbf16, #tpu.memory_space<vmem>>, vector<2x49x2048xbf16>
    %1 = arith.extf %0 : vector<2x49x2048xbf16> to vector<2x49x2048xf32>
    %cst = arith.constant dense<0.000000e+00> : vector<2x2048xf32>
    %2 = vector.multi_reduction <add>, %1, %cst [1] : vector<2x49x2048xf32> to vector<2x2048xf32>
    %cst_2 = arith.constant 0.0204081628 : f32
    %3 = vector.broadcast %cst_2 : f32 to vector<2x2048xf32>
    %4 = arith.mulf %2, %3 : vector<2x2048xf32>
    %c0_3 = arith.constant 0 : index
    %c0_4 = arith.constant 0 : index
    %5 = vector.load %arg1[%c0_3, %c0_4] : memref<2x160xf32, #tpu.memory_space<vmem>>, vector<2x160xf32>
    %c0_5 = arith.constant 0 : index
    %c0_6 = arith.constant 0 : index
    %6 = vector.load %arg3[%c0_5, %c0_6] : memref<160x640xf32, #tpu.memory_space<vmem>>, vector<160x640xf32>
    %cst_7 = arith.constant dense<0.000000e+00> : vector<2x640xf32>
    %7 = tpu.matmul %5, %6, %cst_7 {dimension_numbers = #tpu.dot_dimension_numbers<[1], [0], [0], [1], [0, 0, 1, 1], [], []>} : vector<2x160xf32>, vector<160x640xf32>, vector<2x640xf32> -> vector<2x640xf32>
    %8 = arith.truncf %4 : vector<2x2048xf32> to vector<2x2048xbf16>
    %c0_8 = arith.constant 0 : index
    %c0_9 = arith.constant 0 : index
    %9 = vector.load %arg4[%c0_8, %c0_9] : memref<2048x640xbf16, #tpu.memory_space<vmem>>, vector<2048x640xbf16>
    %cst_10 = arith.constant dense<0.000000e+00> : vector<2x640xf32>
    %10 = tpu.matmul %8, %9, %cst_10 {dimension_numbers = #tpu.dot_dimension_numbers<[1], [0], [0], [1], [0, 0, 1, 1], [], []>} : vector<2x2048xbf16>, vector<2048x640xbf16>, vector<2x640xf32> -> vector<2x640xf32>
    %11 = arith.addf %7, %10 : vector<2x640xf32>
    %c0_11 = arith.constant 0 : index
    %c0_12 = arith.constant 0 : index
    %12 = vector.load %arg5[%c0_11, %c0_12] : memref<1x640xf32, #tpu.memory_space<vmem>>, vector<1x640xf32>
    %13 = vector.broadcast %12 : vector<1x640xf32> to vector<2x640xf32>
    %14 = arith.addf %11, %13 : vector<2x640xf32>
    %cst_13 = arith.constant 0.000000e+00 : f32
    %15 = vector.broadcast %cst_13 : f32 to vector<2x640xf32>
    %16 = arith.maximumf %14, %15 : vector<2x640xf32>
    %c0_14 = arith.constant 0 : index
    %c0_15 = arith.constant 0 : index
    %17 = vector.load %arg6[%c0_14, %c0_15] : memref<640x128xf32, #tpu.memory_space<vmem>>, vector<640x128xf32>
    %cst_16 = arith.constant dense<0.000000e+00> : vector<2x128xf32>
    %18 = tpu.matmul %16, %17, %cst_16 {dimension_numbers = #tpu.dot_dimension_numbers<[1], [0], [0], [1], [0, 0, 1, 1], [], []>} : vector<2x640xf32>, vector<640x128xf32>, vector<2x128xf32> -> vector<2x128xf32>
    %c0_17 = arith.constant 0 : index
    %c0_18 = arith.constant 0 : index
    %19 = vector.load %arg7[%c0_17, %c0_18] : memref<1x128xf32, #tpu.memory_space<vmem>>, vector<1x128xf32>
    %20 = vector.broadcast %19 : vector<1x128xf32> to vector<2x128xf32>
    %21 = arith.addf %18, %20 : vector<2x128xf32>
    %c0_19 = arith.constant 0 : index
    %c0_20 = arith.constant 0 : index
    %22 = vector.load %arg8[%c0_19, %c0_20] : memref<2x128xf32, #tpu.memory_space<vmem>>, vector<2x128xf32>
    tpu.vector_store %arg8[%c0_19, %c0_20], %21 {strides = array<i32>} : memref<2x128xf32, #tpu.memory_space<vmem>>, vector<2x128xf32>,
    return
  }
  func.func @transform_0(%arg0: i32) -> (i32, i32) {
    %c0_i32 = arith.constant 0 : i32
    %c0_i32_0 = arith.constant 0 : i32
    return %arg0, %c0_i32 : i32, i32
  }
  func.func @transform_1(%arg0: i32) -> (i32, i32, i32) {
    %c0_i32 = arith.constant 0 : i32
    %c0_i32_0 = arith.constant 0 : i32
    %c0_i32_1 = arith.constant 0 : i32
    return %arg0, %c0_i32, %c0_i32_0 : i32, i32, i32
  }
  func.func @transform_2(%arg0: i32) -> (i32, i32) {
    %c0_i32 = arith.constant 0 : i32
    %c0_i32_0 = arith.constant 0 : i32
    %c0_i32_1 = arith.constant 0 : i32
    return %c0_i32, %c0_i32_0 : i32, i32
  }
  func.func @transform_3(%arg0: i32) -> (i32, i32) {
    %c0_i32 = arith.constant 0 : i32
    %c0_i32_0 = arith.constant 0 : i32
    %c0_i32_1 = arith.constant 0 : i32
    return %c0_i32, %c0_i32_0 : i32, i32
  }
  func.func @transform_4(%arg0: i32) -> (i32, i32) {
    %c0_i32 = arith.constant 0 : i32
    %c0_i32_0 = arith.constant 0 : i32
    %c0_i32_1 = arith.constant 0 : i32
    return %c0_i32, %c0_i32_0 : i32, i32
  }
  func.func @transform_5(%arg0: i32) -> (i32, i32) {
    %c0_i32 = arith.constant 0 : i32
    %c0_i32_0 = arith.constant 0 : i32
    %c0_i32_1 = arith.constant 0 : i32
    return %c0_i32, %c0_i32_0 : i32, i32
  }
  func.func @transform_6(%arg0: i32) -> (i32, i32) {
    %c0_i32 = arith.constant 0 : i32
    %c0_i32_0 = arith.constant 0 : i32
    %c0_i32_1 = arith.constant 0 : i32
    return %c0_i32, %c0_i32_0 : i32, i32
  }
  func.func @transform_7(%arg0: i32) -> (i32, i32) {
    %c0_i32 = arith.constant 0 : i32
    %c0_i32_0 = arith.constant 0 : i32
    return %arg0, %c0_i32 : i32, i32
  }
}

</mosaic_0001>

<bundles_post_ra>
// kernel: qnet_forward.1
= control target key start
LH: loop header
LB: loop body
LE: loop exit
PB: predicated region body
PF: predicated region fallthrough
CT: control target
= control target key end

     0   :  { %12 = vsyncpa [#allocation3], 0  ;;  %s9832_s0 = inlined_call_operand.vmem [shape: f32[2,160], index: 0, kind: input, shape index: {}]   ;;  %s9833_s1 = inlined_call_operand.vmem [shape: bf16[2,49,2048], index: 1, kind: input, shape index: {}]   ;;  %s9834_s2 = inlined_call_operand.hbm [shape: f32[160,640], index: 2, kind: input, shape index: {}]   ;;  %s9835_s3 = inlined_call_operand.hbm [shape: bf16[2048,640], index: 3, kind: input, shape index: {}]   ;;  %s9836_s4 = inlined_call_operand.hbm [shape: f32[1,640], index: 4, kind: input, shape index: {}]   ;;  %s9837_s5 = inlined_call_operand.hbm [shape: f32[640,128], index: 5, kind: input, shape index: {}]   ;;  %s9838_s6 = inlined_call_operand.hbm [shape: f32[1,128], index: 6, kind: input, shape index: {}]   ;;  %s9839_s7 = inlined_call_operand.vmem [shape: f32[2,128], index: 7, kind: output, shape index: {}]  }
   0x1   :  { %13 = vsyncpa [#allocation5], 0 }
   0x2   :  { %14 = vsyncpa [#allocation8], 0  ;;  %s8719_s24 = smov [#allocation4]  }
   0x3   :  { %s36_s25 = sshll.u32 %s8719_s24, 4  ;;  %s37_s25 = int_to_ptr.vmem [resolvable:$true] %s36_s25 }
   0x4   :  { %s8621_s26 = scalar_lea.vmem %s37_s25, 81920  ;;  %p8626_p1 = scmp.lt.s32.totalorder %s37_s25, %s37_s25 }
   0x5   :  { %p8622_p0 = scmp.ne.s32.totalorder %s37_s25, %s8621_s26  ;;  %p8627_p2 = scmp.lt.s32.totalorder %s8621_s26, %s8621_s26 }
   0x7   :  { %p8628_p3 = por %p8627_p2, %p8626_p1 }
   0x9   :  { %p8629_p4 = pnand %p8628_p3, %p8622_p0 }
   0xb   :  { %8632 = shalt.err (!%p8629_p4)
}
   0xc   :  { %s8720_s27 = smov 320   ;;  %s8721_s28 = smov 20  }
   0xd   :  { %42 = dma.hbm_to_vmem [thread:$0]  %s9835_s3, 81920, %s37_s25, [#allocation5], %s8720_s27, %s8720_s27, %s8721_s28  }
   0xe   :  { %s8722_s8 = smov [#allocation7]  }
   0xf   :  { %s58_s9 = sshll.u32 %s8722_s8, 4  ;;  %s59_s9 = int_to_ptr.vmem [resolvable:$true] %s58_s9 }
  0x10   :  { %s8641_s10 = scalar_lea.vmem %s59_s9, 10240  ;;  %p8646_p6 = scmp.lt.s32.totalorder %s59_s9, %s59_s9 }
  0x11   :  { %p8642_p5 = scmp.ne.s32.totalorder %s59_s9, %s8641_s10  ;;  %p8647_p7 = scmp.lt.s32.totalorder %s8641_s10, %s8641_s10 }
  0x13   :  { %p8648_p8 = por %p8647_p7, %p8646_p6 }
  0x15   :  { %p8649_p9 = pnand %p8648_p8, %p8642_p5 }
  0x17   :  { %8652 = shalt.err (!%p8649_p9)
}
  0x18   :  { %s8723_s11 = smov 128   ;;  %s8724_s12 = smov 8  }
  0x19   :  { %64 = dma.hbm_to_vmem [thread:$0]  %s9837_s5, 10240, %s59_s9, [#allocation8], %s8723_s11, %s8723_s11, %s8724_s12  }
  0x1a   :  { %s8725_s15 = smov [#allocation2]  }
  0x1b   :  { %s24_s16 = sshll.u32 %s8725_s15, 4  ;;  %s25_s16 = int_to_ptr.vmem [resolvable:$true] %s24_s16 }
  0x1c   :  { %s8661_s3 = scalar_lea.vmem %s25_s16, 12800  ;;  %p8666_p11 = scmp.lt.s32.totalorder %s25_s16, %s25_s16 }
  0x1d   :  { %p8662_p10 = scmp.ne.s32.totalorder %s25_s16, %s8661_s3  ;;  %p8667_p12 = scmp.lt.s32.totalorder %s8661_s3, %s8661_s3 }
  0x1f   :  { %p8668_p13 = por %p8667_p12, %p8666_p11 }
  0x21   :  { %p8669_p0 = pnand %p8668_p13, %p8662_p10 }
  0x23   :  { %8672 = shalt.err (!%p8669_p0)
}
  0x24   :  { %s8726_s17 = smov 640   ;;  %s8727_s18 = smov 40  }
  0x25   :  { %30 = dma.hbm_to_vmem [thread:$0]  %s9834_s2, 12800, %s25_s16, [#allocation3], %s8726_s17, %s8726_s17, %s8727_s18  }
  0x26   :  { %s8728_s21 = smov [#allocation6]   ;;  %s8729_s5 = smov [#allocation9]  }
  0x27   :  { %s49_s22 = sshll.u32 %s8728_s21, 4  ;;  %s71_s23 = sshll.u32 %s8729_s5, 4  ;;  %s50_s22 = int_to_ptr.vmem [resolvable:$true] %s49_s22  ;;  %s72_s23 = int_to_ptr.vmem [resolvable:$true] %s71_s23 }
  0x28   :  { %s8681_s24 = scalar_lea.vmem %s50_s22, 80  ;;  %s8685_s25 = scalar_lea.vmem %s50_s22, 96 }
  0x29   :  { %p8682_p1 = scmp.ne.s32.totalorder %s50_s22, %s8681_s24  ;;  %p8686_p2 = scmp.lt.s32.totalorder %s50_s22, %s50_s22 }
  0x2a   :  { %p8687_p3 = scmp.lt.s32.totalorder %s8685_s25, %s8681_s24 }
  0x2c   :  { %p8688_p4 = por %p8687_p3, %p8686_p2 }
  0x2e   :  { %p8689_p5 = pnand %p8688_p4, %p8682_p1 }
  0x30   :  { %8692 = shalt.err (!%p8689_p5)
}
  0x31   :  { %52 = dma.hbm_to_vmem [thread:$0]  %s9836_s4, 80, %s50_s22, [#allocation5]  }
  0x32   :  { %s8701_s28 = scalar_lea.vmem %s72_s23, 16  ;;  %s8705_s2 = scalar_lea.vmem %s72_s23, 32 }
  0x33   :  { %p8702_p6 = scmp.ne.s32.totalorder %s72_s23, %s8701_s28  ;;  %p8706_p7 = scmp.lt.s32.totalorder %s72_s23, %s72_s23 }
  0x34   :  { %p8707_p8 = scmp.lt.s32.totalorder %s8705_s2, %s8701_s28 }
  0x36   :  { %p8708_p9 = por %p8707_p8, %p8706_p7 }
  0x38   :  { %p8709_p10 = pnand %p8708_p9, %p8702_p6 }
  0x3a   :  { %8712 = shalt.err (!%p8709_p10)
}
  0x3b   :  { %74 = dma.hbm_to_vmem [thread:$0]  %s9838_s6, 16, %s72_s23, [#allocation8]  }
  0x3c   :  { %8713 = dma.done.wait [#allocation3], 12800  }
  0x3d   :  { %8714 = vsyncadd [#allocation3], 4294954496 }
  0x3e   :  { %8715 = dma.done.wait [#allocation5], 82000  }
  0x3f   :  { %8716 = vsyncadd [#allocation5], 4294885296 }
  0x40   :  { %8717 = dma.done.wait [#allocation8], 10256  }
  0x41   :  { %8718 = vsyncadd [#allocation8], 4294957040  ;;  %v7717_v0 = vld [vmem:[#allocation4 + $0x11c] ss:$20 sps:$4 sm:$0xff]   ;;  %v7721_v2 = vld [vmem:[#allocation4 + $0x118] ss:$20 sps:$4 sm:$0xff]  }
  0x42   :  { %v7719_v1 = vld [vmem:[#allocation4 + $0x39c] ss:$20 sps:$4 sm:$0xff]   ;;  %5218 = vmatprep.subr.bf16.mxu0 %v7717_v0  ;;  %v7722_v3 = vld [vmem:[#allocation4 + $0x398] ss:$20 sps:$4 sm:$0xff]   ;;  %v7723_v4 = vld [vmem:[#allocation4 + $0xf4] ss:$20 sps:$4 sm:$0xff]  }
  0x43   :  { %5259 = vmatprep.subr.bf16.mxu1 %v7719_v1  ;;  %5219 = vmatpush1.bf16.msra.mxu0 %v7721_v2  ;;  %v7725_v5 = vld [vmem:[#allocation4 + $0x374] ss:$20 sps:$4 sm:$0xff]   ;;  %v7727_v6 = vld [vmem:[#allocation4 + $0xf0] ss:$20 sps:$4 sm:$0xff]   ;;  %v7729_v8 = vld [vmem:[#allocation4 + $0xcc] ss:$20 sps:$4 sm:$0xff]  }
  0x44   :  { %5260 = vmatpush1.bf16.msra.mxu1 %v7722_v3  ;;  %5220 = vmatprep.subr.bf16.mxu0 %v7723_v4  ;;  %v7728_v7 = vld [vmem:[#allocation4 + $0x370] ss:$20 sps:$4 sm:$0xff]   ;;  %v7731_v9 = vld [vmem:[#allocation4 + $0x34c] ss:$20 sps:$4 sm:$0xff]   ;;  %v7733_v10 = vld [vmem:[#allocation4 + $0xc8] ss:$20 sps:$4 sm:$0xff]  }
  0x45   :  { %5261 = vmatprep.subr.bf16.mxu1 %v7725_v5  ;;  %v7734_v11 = vld [vmem:[#allocation4 + $0x348] ss:$20 sps:$4 sm:$0xff]   ;;  %v7735_v12 = vld [vmem:[#allocation4 + $0xa4] ss:$20 sps:$4 sm:$0xff]   ;;  %v7739_v14 = vld [vmem:[#allocation4 + $0xa0] ss:$20 sps:$4 sm:$0xff]  }
  0x46   :  { %v7737_v13 = vld [vmem:[#allocation4 + $0x324] ss:$20 sps:$4 sm:$0xff]   ;;  %v7740_v15 = vld [vmem:[#allocation4 + $0x320] ss:$20 sps:$4 sm:$0xff]   ;;  %v7741_v16 = vld [vmem:[#allocation4 + $0x7c] ss:$20 sps:$4 sm:$0xff]  }
  0x47   :  { %5221 = vmatpush1.bf16.msra.mxu0 %v7727_v6  ;;  %v7743_v17 = vld [vmem:[#allocation4 + $0x2fc] ss:$20 sps:$4 sm:$0xff]   ;;  %v7745_v18 = vld [vmem:[#allocation4 + $0x78] ss:$20 sps:$4 sm:$0xff]   ;;  %v7747_v20 = vld [vmem:[#allocation4 + $0x54] ss:$20 sps:$4 sm:$0xff]  }
  0x48   :  { %5262 = vmatpush1.bf16.msra.mxu1 %v7728_v7  ;;  %5222 = vmatprep.subr.bf16.mxu0 %v7729_v8  ;;  %v7746_v19 = vld [vmem:[#allocation4 + $0x2f8] ss:$20 sps:$4 sm:$0xff]   ;;  %v7749_v21 = vld [vmem:[#allocation4 + $0x2d4] ss:$20 sps:$4 sm:$0xff]   ;;  %v7751_v22 = vld [vmem:[#allocation4 + $0x50] ss:$20 sps:$4 sm:$0xff]  }
  0x49   :  { %5263 = vmatprep.subr.bf16.mxu1 %v7731_v9  ;;  %v7752_v23 = vld [vmem:[#allocation4 + $0x2d0] ss:$20 sps:$4 sm:$0xff]   ;;  %v7753_v24 = vld [vmem:[#allocation4 + $0x2c] ss:$20 sps:$4 sm:$0xff]   ;;  %v7757_v26 = vld [vmem:[#allocation4 + $0x28] ss:$20 sps:$4 sm:$0xff]  }
  0x4a   :  { %v7755_v25 = vld [vmem:[#allocation4 + $0x2ac] ss:$20 sps:$4 sm:$0xff]   ;;  %v7758_v27 = vld [vmem:[#allocation4 + $0x2a8] ss:$20 sps:$4 sm:$0xff]   ;;  %v7759_v28 = vld [vmem:[#allocation4 + $0x4] ss:$20 sps:$4 sm:$0xff]  }
  0x4b   :  { %5223 = vmatpush1.bf16.msra.mxu0 %v7733_v10  ;;  %v7761_v29 = vld [vmem:[#allocation4 + $0x284] ss:$20 sps:$4 sm:$0xff]   ;;  %v7763_v30 = vld [vmem:[#allocation4] ss:$20 sps:$4 sm:$0xff]   ;;  %v7765_v32 = vld [vmem:[#allocation4 + $0x25c] ss:$20 sps:$4 sm:$0xff]  }
  0x4c   :  { %5264 = vmatpush1.bf16.msra.mxu1 %v7734_v11  ;;  %5224 = vmatprep.subr.bf16.mxu0 %v7735_v12  ;;  %v7764_v31 = vld [vmem:[#allocation4 + $0x280] ss:$20 sps:$4 sm:$0xff]   ;;  %v7767_v33 = vld [vmem:[#allocation4 + $0x4dc] ss:$20 sps:$4 sm:$0xff]   ;;  %v7769_v34 = vld [vmem:[#allocation4 + $0x258] ss:$20 sps:$4 sm:$0xff]  }
  0x4d   :  { %5265 = vmatprep.subr.bf16.mxu1 %v7737_v13  ;;  %v7770_v35 = vld [vmem:[#allocation4 + $0x4d8] ss:$20 sps:$4 sm:$0xff]   ;;  %v7771_v36 = vld [vmem:[#allocation4 + $0x234] ss:$20 sps:$4 sm:$0xff]   ;;  %v7775_v38 = vld [vmem:[#allocation4 + $0x230] ss:$20 sps:$4 sm:$0xff]  }
  0x4e   :  { %v7773_v37 = vld [vmem:[#allocation4 + $0x4b4] ss:$20 sps:$4 sm:$0xff]   ;;  %v7776_v39 = vld [vmem:[#allocation4 + $0x4b0] ss:$20 sps:$4 sm:$0xff]   ;;  %v7777_v40 = vld [vmem:[#allocation4 + $0x20c] ss:$20 sps:$4 sm:$0xff]  }
  0x4f   :  { %5225 = vmatpush1.bf16.msra.mxu0 %v7739_v14  ;;  %v7779_v41 = vld [vmem:[#allocation4 + $0x48c] ss:$20 sps:$4 sm:$0xff]   ;;  %v7781_v42 = vld [vmem:[#allocation4 + $0x208] ss:$20 sps:$4 sm:$0xff]   ;;  %v7783_v44 = vld [vmem:[#allocation4 + $0x1e4] ss:$20 sps:$4 sm:$0xff]  }
  0x50   :  { %5266 = vmatpush1.bf16.msra.mxu1 %v7740_v15  ;;  %5226 = vmatprep.subr.bf16.mxu0 %v7741_v16  ;;  %v7782_v43 = vld [vmem:[#allocation4 + $0x488] ss:$20 sps:$4 sm:$0xff]   ;;  %v7785_v45 = vld [vmem:[#allocation4 + $0x464] ss:$20 sps:$4 sm:$0xff]   ;;  %v7787_v46 = vld [vmem:[#allocation4 + $0x1e0] ss:$20 sps:$4 sm:$0xff]  }
  0x51   :  { %5267 = vmatprep.subr.bf16.mxu1 %v7743_v17  ;;  %v7788_v47 = vld [vmem:[#allocation4 + $0x460] ss:$20 sps:$4 sm:$0xff]   ;;  %v7789_v49 = vld [vmem:[#allocation4 + $0x1bc] ss:$20 sps:$4 sm:$0xff]   ;;  %vm432_vm0 = vcmask 1040384   ;;  %vm1841_vm1 = vcmask 1041409  }
  0x52   :  { %v8790_v48 = vld [vmem:[%s9833_s1] sm:$0xff]  ;;  %v7791_v50 = vld [vmem:[#allocation4 + $0x43c] ss:$20 sps:$4 sm:$0xff]   ;;  %v7793_v3 = vld [vmem:[#allocation4 + $0x1b8] ss:$20 sps:$4 sm:$0xff]   ;;  %vm6204_vm2 = vcmask 261120  }
  0x53   :  { %5227 = vmatpush1.bf16.msra.mxu0 %v7745_v18  ;;  %v8795_v51 = vld [vmem:[%s9833_s1 + $0x40] sm:$0xff]  ;;  %v204_v54 = vunpack.c.h.bf16 %v8790_v48  ;;  %v7794_v4 = vld [vmem:[#allocation4 + $0x438] ss:$20 sps:$4 sm:$0xff]   ;;  %v7795_v12 = vld [vmem:[#allocation4 + $0x194] ss:$20 sps:$4 sm:$0xff]   ;;  %vm8731_vm3 = vmmov 0  }
  0x54   :  { %5268 = vmatpush1.bf16.msra.mxu1 %v7746_v19  ;;  %5228 = vmatprep.subr.bf16.mxu0 %v7747_v20  ;;  %v8800_v52 = vld [vmem:[%s9833_s1 + $0x80] sm:$0xff]  ;;  %v220_v58 = vunpack.c.h.bf16 %v8795_v51  ;;  %v7797_v13 = vld [vmem:[#allocation4 + $0x414] ss:$20 sps:$4 sm:$0xff]  }
  0x55   :  { %5269 = vmatprep.subr.bf16.mxu1 %v7749_v21  ;;  %v8805_v53 = vld [vmem:[%s9833_s1 + $0xc0] sm:$0xff]  ;;  %v236_v59 = vunpack.c.h.bf16 %v8800_v52  ;;  %v8873_v18 = vld [vmem:[%s9833_s1 + $0x8] sm:$0xff] }
  0x56   :  { %v8811_v55 = vld [vmem:[%s9833_s1 + $0x100] sm:$0xff]  ;;  %v252_v63 = vunpack.c.h.bf16 %v8805_v53  ;;  %v441_v11 = vadd.f32 %v220_v58, %v204_v54  ;;  %v8878_v19 = vld [vmem:[%s9833_s1 + $0x48] sm:$0xff] }
  0x57   :  { %5229 = vmatpush1.bf16.msra.mxu0 %v7751_v22  ;;  %v8816_v56 = vld [vmem:[%s9833_s1 + $0x140] sm:$0xff]  ;;  %v268_v15 = vunpack.c.h.bf16 %v8811_v55 }
  0x58   :  { %5270 = vmatpush1.bf16.msra.mxu1 %v7752_v23  ;;  %5230 = vmatprep.subr.bf16.mxu0 %v7753_v24  ;;  %v8821_v57 = vld [vmem:[%s9833_s1 + $0x180] sm:$0x11]  ;;  %v284_v16 = vunpack.c.h.bf16 %v8816_v56  ;;  %v442_v23 = vadd.f32 %v441_v11, %v236_v59 }
  0x59   :  { %5271 = vmatprep.subr.bf16.mxu1 %v7755_v25  ;;  %v8828_v60 = vld [vmem:[%s9833_s1 + $0x1c0] sm:$0xff]  ;;  %v300_v0 = vunpack.c.h.bf16 %v8821_v57  ;;  %v8886_v25 = vld [vmem:[%s9833_s1 + $0x88] sm:$0xff] }
  0x5a   :  { %v8833_v61 = vld [vmem:[%s9833_s1 + $0x200] sm:$0xff]  ;;  %v316_v8 = vunpack.c.h.bf16 %v8828_v60 }
  0x5b   :  { %5231 = vmatpush1.bf16.msra.mxu0 %v7757_v26  ;;  %v8838_v62 = vld [vmem:[%s9833_s1 + $0x240] sm:$0xff]  ;;  %v332_v9 = vunpack.c.h.bf16 %v8833_v61  ;;  %v8891_v26 = vld [vmem:[%s9833_s1 + $0xc8] sm:$0xff] }
  0x5c   :  { %5272 = vmatpush1.bf16.msra.mxu1 %v7758_v27  ;;  %5232 = vmatprep.subr.bf16.mxu0 %v7759_v28  ;;  %v8847_v5 = vld [vmem:[%s9833_s1 + $0x280] sm:$0xff]  ;;  %v348_v10 = vunpack.c.h.bf16 %v8838_v62  ;;  %v8896_v27 = vld [vmem:[%s9833_s1 + $0x108] sm:$0xff] }
  0x5d   :  { %5273 = vmatprep.subr.bf16.mxu1 %v7761_v29  ;;  %v8852_v6 = vld [vmem:[%s9833_s1 + $0x2c0] sm:$0xff]  ;;  %v364_v17 = vunpack.c.h.bf16 %v8847_v5  ;;  %v649_v24 = vadd.f32 %v332_v9, %v316_v8  ;;  %v446_v29 = vsel %vm432_vm0, %v300_v0, 0.0  ;;  %v8952_v0 = vld [vmem:[%s9833_s1 + $0x308] sm:$0xff] }
  0x5e   :  { %v8857_v7 = vld [vmem:[%s9833_s1 + $0x300] sm:$0xff]  ;;  %v380_v21 = vunpack.c.h.bf16 %v8852_v6 }
  0x5f   :  { %5233 = vmatpush1.bf16.msra.mxu0 %v7763_v30  ;;  %v8865_v14 = vld [vmem:[%s9833_s1 + $0x340] sm:$0x11]  ;;  %v396_v28 = vunpack.c.h.bf16 %v8857_v7  ;;  %v8903_v30 = vld [vmem:[%s9833_s1 + $0x148] sm:$0xff] }
  0x60   :  { %5274 = vmatpush1.bf16.msra.mxu1 %v7764_v31  ;;  %5234 = vmatprep.subr.bf16.mxu0 %v7765_v32  ;;  %v412_v22 = vunpack.c.h.bf16 %v8865_v14  ;;  %v8908_v31 = vld [vmem:[%s9833_s1 + $0x188] sm:$0x11]  ;;  %v7807_v2 = vld [vmem:[#allocation4 + $0x144] ss:$20 sps:$4 sm:$0xff]  }
  0x61   :  { %5275 = vmatprep.subr.bf16.mxu1 %v7767_v33  ;;  %v8913_v32 = vld [vmem:[%s9833_s1 + $0x1c8] sm:$0xff]  ;;  %v206_v33 = vunpack.c.h.bf16 %v8873_v18 }
  0x62   :  { %v7803_v9 = vld [vmem:[#allocation4 + $0x3ec] ss:$20 sps:$4 sm:$0xff]  }
  0x63   :  { %5235 = vmatpush2.bf16.msra.mxu0 %v7769_v34  ;;  %v222_v34 = vunpack.c.h.bf16 %v8878_v19 }
  0x64   :  { %5276 = vmatpush2.bf16.msra.mxu1 %v7770_v35  ;;  %5236 = vmatprep.subr.bf16.mxu0 %v7771_v36  ;;  %v7799_v35 = vld [vmem:[#allocation4 + $0x190] ss:$20 sps:$4 sm:$0xff]  }
  0x65   :  { %5277 = vmatprep.subr.bf16.mxu1 %v7773_v37  ;;  %v7800_v36 = vld [vmem:[#allocation4 + $0x410] ss:$20 sps:$4 sm:$0xff]   ;;  %v443_v37 = vadd.f32 %v442_v23, %v252_v63  ;;  %v654_v63 = vsel %vm432_vm0, %v412_v22, 0.0 }
  0x67   :  { %5237 = vmatpush2.bf16.msra.mxu0 %v7775_v38  ;;  %v650_v38 = vadd.f32 %v649_v24, %v348_v10  ;;  %v444_v58 = vadd.f32 %v443_v37, %v268_v15  ;;  %v286_v10 = vunpack.c.h.bf16 %v8903_v30  ;;  %v7805_v24 = vld [vmem:[#allocation4 + $0x168] ss:$20 sps:$4 sm:$0xff]  }
  0x68   :  { %5278 = vmatpush2.bf16.msra.mxu1 %v7776_v39  ;;  %5238 = vmatprep.subr.bf16.mxu0 %v7777_v40  ;;  %v8920_v39 = vld [vmem:[%s9833_s1 + $0x208] sm:$0xff] }
  0x69   :  { %5279 = vmatprep.subr.bf16.mxu1 %v7779_v41  ;;  %v8925_v40 = vld [vmem:[%s9833_s1 + $0x248] sm:$0xff]  ;;  %v334_v54 = vunpack.c.h.bf16 %v8920_v39  ;;  %v651_v59 = vadd.f32 %v650_v38, %v364_v17  ;;  %v445_v15 = vadd.f32 %v444_v58, %v284_v16  ;;  %v398_v38 = vunpack.c.h.bf16 %v8952_v0 }
  0x6a   :  { %v8930_v41 = vld [vmem:[%s9833_s1 + $0x288] sm:$0xff]  ;;  %v350_v8 = vunpack.c.h.bf16 %v8925_v40 }
  0x6b   :  { %5239 = vmatpush2.bf16.msra.mxu0 %v7781_v42  ;;  %v238_v42 = vunpack.c.h.bf16 %v8886_v25  ;;  %v366_v11 = vunpack.c.h.bf16 %v8930_v41  ;;  %v652_v17 = vadd.f32 %v651_v59, %v380_v21  ;;  %v7806_v37 = vld [vmem:[#allocation4 + $0x3e8] ss:$20 sps:$4 sm:$0xff]   ;;  %v447_v1 = vadd.f32 %v446_v29, %v445_v15  ;;  %v7809_v21 = vld [vmem:[#allocation4 + $0x3c4] ss:$20 sps:$4 sm:$0xff]   ;;  %v7811_v29 = vld [vmem:[#allocation4 + $0x140] ss:$20 sps:$4 sm:$0xff]  }
  0x6c   :  { %5280 = vmatpush2.bf16.msra.mxu1 %v7782_v43  ;;  %5240 = vmatprep.subr.bf16.mxu0 %v7783_v44  ;;  %v254_v43 = vunpack.c.h.bf16 %v8891_v26  ;;  %v7801_v44 = vld [vmem:[#allocation4 + $0x16c] ss:$20 sps:$4 sm:$0xff]   ;;  %v299_v59 = vunpack.c.l.bf16 %v8821_v57  ;;  %v379_v57 = vunpack.c.l.bf16 %v8852_v6 }
  0x6d   :  { %5281 = vmatprep.subr.bf16.mxu1 %v7785_v45  ;;  %v8937_v45 = vld [vmem:[%s9833_s1 + $0x2c8] sm:$0xff] }
  0x6e   :  { %v382_v22 = vunpack.c.h.bf16 %v8937_v45  ;;  %v433_v15 = vsel %vm432_vm0, %v299_v59, 0.0 }
  0x6f   :  { %5241 = vmatpush2.bf16.msra.mxu0 %v7787_v46  ;;  %v8942_v46 = vld [vmem:[%s9833_s1 + $0x348] sm:$0x11] }
  0x70   :  { %5282 = vmatpush2.bf16.msra.mxu1 %v7788_v47  ;;  %5242 = vmatprep.subr.bf16.mxu0 %v7789_v49  ;;  %9841 = vst [vmem:[#allocation13_spill] sm:$0xff] %v8942_v46  ;;  %v270_v47 = vunpack.c.h.bf16 %v8896_v27  ;;  %v302_v49 = vunpack.c.h.bf16 %v8908_v31 }
  0x71   :  { %5283 = vmatprep.subr.bf16.mxu1 %v7791_v50  ;;  %v318_v50 = vunpack.c.h.bf16 %v8913_v32 }
  0x73   :  { %5243 = vmatpush2.bf16.msra.mxu0 %v7793_v3  ;;  %v414_v3 = vunpack.c.h.bf16 %v8942_v46  ;;  %v675_v23 = vadd.f32 %v334_v54, %v318_v50  ;;  %v653_v46 = vadd.f32 %v652_v17, %v396_v28  ;;  %v267_v50 = vunpack.c.l.bf16 %v8811_v55  ;;  %v7812_v28 = vld [vmem:[#allocation4 + $0x3c0] ss:$20 sps:$4 sm:$0xff]  }
  0x74   :  { %5284 = vmatpush2.bf16.msra.mxu1 %v7794_v4  ;;  %5244 = vmatprep.subr.bf16.mxu0 %v7795_v12  ;;  %v467_v4 = vadd.f32 %v222_v34, %v206_v33  ;;  %v472_v12 = vsel %vm432_vm0, %v302_v49, 0.0  ;;  %v331_v49 = vunpack.c.l.bf16 %v8833_v61  ;;  %v448_v54 = vrot.slane %v447_v1, 4 }
  0x75   :  { %5285 = vmatprep.subr.bf16.mxu1 %v7797_v13  ;;  %v251_v13 = vunpack.c.l.bf16 %v8805_v53  ;;  %v676_v33 = vadd.f32 %v675_v23, %v350_v8  ;;  %v680_v16 = vsel %vm432_vm0, %v414_v3, 0.0  ;;  %v655_v53 = vadd.f32 %v654_v63, %v653_v46 }
  0x76   :  { %v468_v20 = vadd.f32 %v467_v4, %v238_v42  ;;  %v315_v42 = vunpack.c.l.bf16 %v8828_v60  ;;  %v449_v55 = vadd.f32 %v448_v54, %v447_v1  ;;  %v9842_v61 = vunpack.c.l.bf16 %v8790_v48 }
  0x77   :  { %5245 = vmatpush2.bf16.msra.mxu0 %v7799_v35  ;;  %v677_v35 = vadd.f32 %v676_v33, %v366_v11  ;;  %v656_v60 = vrot.slane %v655_v53, 4  ;;  %v9843_v46 = vunpack.c.l.bf16 %v8795_v51  ;;  %v9844_v3 = vunpack.c.l.bf16 %v8800_v52 }
  0x78   :  { %5286 = vmatpush2.bf16.msra.mxu1 %v7800_v36  ;;  %5246 = vmatprep.subr.bf16.mxu0 %v7801_v44  ;;  %v469_v34 = vadd.f32 %v468_v20, %v254_v43  ;;  %v283_v36 = vunpack.c.l.bf16 %v8816_v56  ;;  %v347_v44 = vunpack.c.l.bf16 %v8838_v62  ;;  %v363_v20 = vunpack.c.l.bf16 %v8847_v5  ;;  %v7815_v56 = vld [vmem:[#allocation4 + $0x61c] ss:$20 sps:$4 sm:$0xff]  }
  0x79   :  { %5287 = vmatprep.subr.bf16.mxu1 %v7803_v9  ;;  %v678_v43 = vadd.f32 %v677_v35, %v382_v22  ;;  %v427_v63 = vadd.f32 %v9843_v46, %v9842_v61  ;;  %v411_v62 = vunpack.c.l.bf16 %v8865_v14  ;;  %v636_v8 = vadd.f32 %v331_v49, %v315_v42  ;;  %v7818_v5 = vld [vmem:[#allocation4 + $0x89c] ss:$20 sps:$4 sm:$0xff]  }
  0x7a   :  { %v470_v58 = vadd.f32 %v469_v34, %v270_v47  ;;  %v450_v9 = vrot.slane %v449_v55, 2  ;;  %v657_v11 = vadd.f32 %v656_v60, %v655_v53  ;;  %v395_v51 = vunpack.c.l.bf16 %v8857_v7 }
  0x7b   :  { %5247 = vmatpush2.bf16.msra.mxu0 %v7805_v24  ;;  %v679_v1 = vadd.f32 %v678_v43, %v398_v38  ;;  %v428_v4 = vadd.f32 %v427_v63, %v9844_v3  ;;  %v641_v24 = vsel %vm432_vm0, %v411_v62, 0.0  ;;  %v221_v34 = vunpack.c.l.bf16 %v8878_v19 }
  0x7c   :  { %5288 = vmatpush2.bf16.msra.mxu1 %v7806_v37  ;;  %5248 = vmatprep.subr.bf16.mxu0 %v7807_v2  ;;  %v471_v47 = vadd.f32 %v470_v58, %v286_v10  ;;  %v637_v2 = vadd.f32 %v636_v8, %v347_v44  ;;  %v451_v10 = vadd.f32 %v450_v9, %v449_v55  ;;  %v658_v6 = vrot.slane %v657_v11, 2 }
  0x7d   :  { %5289 = vmatprep.subr.bf16.mxu1 %v7809_v21  ;;  %v681_v17 = vadd.f32 %v680_v16, %v679_v1  ;;  %v429_v14 = vadd.f32 %v428_v4, %v251_v13  ;;  %v205_v37 = vunpack.c.l.bf16 %v8873_v18  ;;  %v237_v16 = vunpack.c.l.bf16 %v8886_v25 }
  0x7e   :  { %v473_v48 = vadd.f32 %v472_v12, %v471_v47  ;;  %v638_v23 = vadd.f32 %v637_v2, %v363_v20  ;;  %v452_v52 = vrot.slane %v451_v10, 1  ;;  %v659_v38 = vadd.f32 %v658_v6, %v657_v11 }
  0x7f   :  { %5249 = vmatpush2.bf16.msra.mxu0 %v7811_v29  ;;  %v682_v7 = vrot.slane %v681_v17, 4  ;;  %v430_v12 = vadd.f32 %v429_v14, %v267_v50  ;;  %v253_v18 = vunpack.c.l.bf16 %v8891_v26  ;;  %v269_v29 = vunpack.c.l.bf16 %v8896_v27 }
  0x80   :  { %5290 = vmatpush2.bf16.msra.mxu1 %v7812_v28  ;;  %v474_v22 = vrot.slane %v473_v48, 4  ;;  %5300 = vmatprep.subr.bf16.mxu0 %v7815_v56  ;;  %v639_v21 = vadd.f32 %v638_v23, %v379_v57  ;;  %v453_v13 = vadd.f32 %v452_v52, %v451_v10  ;;  %v660_v42 = vrot.slane %v659_v38, 1 }
  0x81   :  { %5341 = vmatprep.subr.bf16.mxu1 %v7818_v5  ;;  %v683_v49 = vadd.f32 %v682_v7, %v681_v17  ;;  %v431_v54 = vadd.f32 %v430_v12, %v283_v36  ;;  %v285_v19 = vunpack.c.l.bf16 %v8903_v30  ;;  %v301_v25 = vunpack.c.l.bf16 %v8908_v31 }
  0x82   :  { %v475_v33 = vadd.f32 %v474_v22, %v473_v48  ;;  %v640_v35 = vadd.f32 %v639_v21, %v395_v51  ;;  %v661_v28 = vadd.f32 %v660_v42, %v659_v38  ;;  %v845_v58 = vmul.f32 0.020408163, %v453_v13  ;;  %v9845_v22 = vld [vmem:[#allocation13_spill] sm:$0xff] }
  0x83   :  { %v684_v50 = vrot.slane %v683_v49, 2  ;;  %v434_v59 = vadd.f32 %v433_v15, %v431_v54  ;;  %v317_v26 = vunpack.c.l.bf16 %v8913_v32  ;;  %v333_v27 = vunpack.c.l.bf16 %v8920_v39 }
  0x84   :  { %v476_v53 = vrot.slane %v475_v33, 2  ;;  %v642_v20 = vadd.f32 %v641_v24, %v640_v35  ;;  %v861_v55 = vmul.f32 0.020408163, %v661_v28  ;;  %v978_v60 = vpack.c.bf16 %v845_v58, %v845_v58 }
  0x85   :  { %v685_v43 = vadd.f32 %v684_v50, %v683_v49  ;;  %v435_v36 = vrot.slane %v434_v59, 4  ;;  %v349_v30 = vunpack.c.l.bf16 %v8925_v40  ;;  %v365_v31 = vunpack.c.l.bf16 %v8930_v41 }
  0x86   :  { %v477_v44 = vadd.f32 %v476_v53, %v475_v33  ;;  %v643_v46 = vrot.slane %v642_v20, 4  ;;  %v994_v63 = vpack.c.bf16 %v861_v55, %v861_v55  ;;  %v1810_v56 = vunpack.c.l.b16 %v978_v60  ;;  %v7813_v60 = vld [vmem:[#allocation4 + $0x618] ss:$20 sps:$4 sm:$0xff]  }
  0x87   :  { %v686_v47 = vrot.slane %v685_v43, 1  ;;  %v436_v57 = vadd.f32 %v435_v36, %v434_v59  ;;  %v454_v1 = vadd.f32 %v221_v34, %v205_v37  ;;  %v381_v32 = vunpack.c.l.bf16 %v8937_v45 }
  0x88   :  { %v478_v61 = vrot.slane %v477_v44, 1  ;;  %v644_v8 = vadd.f32 %v643_v46, %v642_v20  ;;  %v1826_v5 = vunpack.c.l.b16 %v994_v63  ;;  %v662_v48 = vadd.f32 %v333_v27, %v317_v26  ;;  %v7819_v63 = vld [vmem:[#allocation4 + $0x5f0] ss:$20 sps:$4 sm:$0xff]  }
  0x89   :  { %v687_v9 = vadd.f32 %v686_v47, %v685_v43  ;;  %v437_v11 = vrot.slane %v436_v57, 2  ;;  %v455_v2 = vadd.f32 %v454_v1, %v237_v16  ;;  %v413_v23 = vunpack.c.l.bf16 %v9845_v22  ;;  %v7827_v47 = vld [vmem:[#allocation4 + $0x5cc] ss:$20 sps:$4 sm:$0xff]   ;;  %v7825_v1 = vld [vmem:[#allocation4 + $0x5c8] ss:$20 sps:$4 sm:$0xff]  }
  0x8a   :  { %v479_v62 = vadd.f32 %v478_v61, %v477_v44  ;;  %v645_v4 = vrot.slane %v644_v8, 2  ;;  %v1843_v39 = vsel %vm1841_vm1, %v1826_v5, %v1810_v56  ;;  %v663_v17 = vadd.f32 %v662_v48, %v349_v30  ;;  %v7821_v61 = vld [vmem:[#allocation4 + $0x5f4] ss:$20 sps:$4 sm:$0xff]  }
  0x8b   :  { %v863_v51 = vmul.f32 0.020408163, %v687_v9  ;;  %v438_v15 = vadd.f32 %v437_v11, %v436_v57  ;;  %v8994_v10 = vpack.c.b16 %v1843_v39, %v1843_v39  ;;  %v456_v24 = vadd.f32 %v455_v2, %v253_v18  ;;  %v9012_v57 = vld [vmem:[%s9833_s1 + $0x10] sm:$0xff] }
  0x8c   :  { %v847_v3 = vmul.f32 0.020408163, %v479_v62  ;;  %v646_v40 = vadd.f32 %v645_v4, %v644_v8  ;;  %v397_v52 = vunpack.c.l.bf16 %v8952_v0  ;;  %v664_v38 = vadd.f32 %v663_v17, %v365_v31  ;;  %v101_v8 = vld [vmem:[%s9833_s1 + $0x50] sm:$0xff] }
  0x8d   :  { %v996_v41 = vpack.c.bf16 %v863_v51, %v863_v51  ;;  %v439_v14 = vrot.slane %v438_v15, 1  ;;  %5250 = vmatprep.mubr.bf16.mxu0 %v8994_v10  ;;  %v457_v33 = vadd.f32 %v456_v24, %v269_v29  ;;  %v459_v34 = vsel %vm432_vm0, %v301_v25, 0.0  ;;  %v9020_v30 = vld [vmem:[%s9833_s1 + $0x90] sm:$0xff] }
  0x8e   :  { %v980_v6 = vpack.c.bf16 %v847_v3, %v847_v3  ;;  %v647_v45 = vrot.slane %v646_v40, 1  ;;  %v665_v16 = vadd.f32 %v664_v38, %v381_v32  ;;  %v667_v54 = vsel %vm432_vm0, %v413_v23, 0.0  ;;  %v9025_v5 = vld [vmem:[%s9833_s1 + $0xd0] sm:$0xff]  ;;  %v7833_v3 = vld [vmem:[#allocation4 + $0x5a4] ss:$20 sps:$4 sm:$0xff]  }
  0x8f   :  { %v1828_v7 = vunpack.c.l.b16 %v996_v41  ;;  %v440_v12 = vadd.f32 %v439_v14, %v438_v15  ;;  %v458_v49 = vadd.f32 %v457_v33, %v285_v19  ;;  %v9030_v9 = vld [vmem:[%s9833_s1 + $0x110] sm:$0xff]  ;;  %v207_v32 = vunpack.c.l.bf16 %v9012_v57 }
  0x90   :  { %v1812_v37 = vunpack.c.l.b16 %v980_v6  ;;  %v648_v21 = vadd.f32 %v647_v45, %v646_v40  ;;  %v666_v18 = vadd.f32 %v665_v16, %v397_v52  ;;  %v9035_v4 = vld [vmem:[%s9833_s1 + $0x150] sm:$0xff]  ;;  %v208_v48 = vunpack.c.h.bf16 %v9012_v57 }
  0x91   :  { %v844_v42 = vmul.f32 0.020408163, %v440_v12  ;;  %v460_v0 = vadd.f32 %v459_v34, %v458_v49  ;;  %v223_v39 = vunpack.c.l.bf16 %v101_v8  ;;  %v9042_v15 = vld [vmem:[%s9833_s1 + $0x190] sm:$0x11]  ;;  %v224_v40 = vunpack.c.h.bf16 %v101_v8 }
  0x92   :  { %v1845_v13 = vsel %vm1841_vm1, %v1828_v7, %v1812_v37  ;;  %v860_v35 = vmul.f32 0.020408163, %v648_v21  ;;  %v668_v29 = vadd.f32 %v667_v54, %v666_v18  ;;  %v149_v2 = vld [vmem:[%s9833_s1 + $0x1d0] sm:$0xff]  ;;  %v239_v17 = vunpack.c.l.bf16 %v9020_v30 }
  0x93   :  { %v9002_v53 = vpack.c.b16 %v1845_v13, %v1845_v13  ;;  %v977_v28 = vpack.c.bf16 %v844_v42, %v844_v42  ;;  %v461_v59 = vrot.slane %v460_v0, 4  ;;  %v157_v6 = vld [vmem:[%s9833_s1 + $0x210] sm:$0xff]  ;;  %v240_v41 = vunpack.c.h.bf16 %v9020_v30 }
  0x94   :  { %v993_v58 = vpack.c.bf16 %v860_v35, %v860_v35  ;;  %v669_v20 = vrot.slane %v668_v29, 4  ;;  %v255_v22 = vunpack.c.l.bf16 %v9025_v5  ;;  %v256_v23 = vunpack.c.h.bf16 %v9025_v5  ;;  %v165_v45 = vld [vmem:[%s9833_s1 + $0x250] sm:$0xff] }
  0x95   :  { %5291 = vmatprep.mubr.bf16.mxu1 %v9002_v53  ;;  %v1809_v50 = vunpack.c.l.b16 %v977_v28  ;;  %v462_v25 = vadd.f32 %v461_v59, %v460_v0  ;;  %v271_v24 = vunpack.c.l.bf16 %v9030_v9  ;;  %v9061_v52 = vld [vmem:[%s9833_s1 + $0x290] sm:$0xff]  ;;  %v272_v38 = vunpack.c.h.bf16 %v9030_v9 }
  0x96   :  { %v1825_v44 = vunpack.c.l.b16 %v993_v58  ;;  %v670_v19 = vadd.f32 %v669_v20, %v668_v29  ;;  %v287_v7 = vunpack.c.l.bf16 %v9035_v4  ;;  %v288_v12 = vunpack.c.h.bf16 %v9035_v4  ;;  %v7831_v21 = vld [vmem:[#allocation4 + $0x5a0] ss:$20 sps:$4 sm:$0xff]   ;;  %v7839_v35 = vld [vmem:[#allocation4 + $0x57c] ss:$20 sps:$4 sm:$0xff]   ;;  %v7816_v29 = vld [vmem:[#allocation4 + $0x898] ss:$20 sps:$4 sm:$0xff]  }
  0x97   :  { %v463_v36 = vrot.slane %v462_v25, 2  ;;  %v9069_v34 = vld [vmem:[%s9833_s1 + $0x2d0] sm:$0xff]  ;;  %v303_v13 = vunpack.c.l.bf16 %v9042_v15  ;;  %v320_v42 = vunpack.c.h.bf16 %v149_v2  ;;  %v336_v49 = vunpack.c.h.bf16 %v157_v6 }
  0x98   :  { %v1842_v55 = vsel %vm1841_vm1, %v1825_v44, %v1809_v50  ;;  %v671_v46 = vrot.slane %v670_v19, 2  ;;  %v197_v16 = vld [vmem:[%s9833_s1 + $0x350] sm:$0x11]  ;;  %v304_v18 = vunpack.c.h.bf16 %v9042_v15  ;;  %v319_v28 = vunpack.c.l.bf16 %v149_v2 }
  0x99   :  { %v9006_v43 = vpack.c.b16 %v1842_v55, %v1842_v55  ;;  %v464_v26 = vadd.f32 %v463_v36, %v462_v25  ;;  %v335_v0 = vunpack.c.l.bf16 %v157_v6  ;;  %v351_v50 = vunpack.c.l.bf16 %v165_v45  ;;  %v9080_v20 = vld [vmem:[%s9833_s1 + $0x310] sm:$0xff] }
  0x9a   :  { %v672_v27 = vadd.f32 %v671_v46, %v670_v19  ;;  %v352_v59 = vunpack.c.h.bf16 %v165_v45  ;;  %v367_v44 = vunpack.c.l.bf16 %v9061_v52  ;;  %v368_v25 = vunpack.c.h.bf16 %v9061_v52  ;;  %v7822_v30 = vld [vmem:[#allocation4 + $0x870] ss:$20 sps:$4 sm:$0xff]   ;;  %v7851_v45 = vld [vmem:[#allocation4 + $0x52c] ss:$20 sps:$4 sm:$0xff]  }
  0x9b   :  { %5251 = vmatmul.mubr.bf16.vlgmr.msra.gmra.mxu0 %v9006_v43  ;;  %v465_v56 = vrot.slane %v464_v26, 1  ;;  %v383_v55 = vunpack.c.l.bf16 %v9069_v34  ;;  %v415_v19 = vunpack.c.l.bf16 %v197_v16  ;;  %v416_v46 = vunpack.c.h.bf16 %v197_v16  ;;  %v7849_v16 = vld [vmem:[#allocation4 + $0x528] ss:$20 sps:$4 sm:$0xff]  }
  0x9c   :  { %5301 = vmatpush1.bf16.msra.mxu0 %v7813_v60  ;;  %v673_v62 = vrot.slane %v672_v27, 1  ;;  %v493_v60 = vadd.f32 %v224_v40, %v208_v48  ;;  %v384_v57 = vunpack.c.h.bf16 %v9069_v34  ;;  %v688_v8 = vadd.f32 %v335_v0, %v319_v28  ;;  %v9101_v40 = vld [vmem:[%s9833_s1 + $0x58] sm:$0xff] }
  0x9d   :  { %5302 = vmatprep.subr.bf16.mxu0 %v7821_v61  ;;  %v466_v31 = vadd.f32 %v465_v56, %v464_v26  ;;  %v7837_v61 = vld [vmem:[#allocation4 + $0x578] ss:$20 sps:$4 sm:$0xff]   ;;  %v701_v26 = vadd.f32 %v336_v49, %v320_v42  ;;  %v7824_v56 = vld [vmem:[#allocation4 + $0x874] ss:$20 sps:$4 sm:$0xff]   ;;  %v498_v15 = vsel %vm432_vm0, %v304_v18, 0.0  ;;  %v485_v2 = vsel %vm432_vm0, %v303_v13, 0.0 }
  0x9e   :  { %v674_v11 = vadd.f32 %v673_v62, %v672_v27  ;;  %v480_v27 = vadd.f32 %v223_v39, %v207_v32  ;;  %v494_v62 = vadd.f32 %v493_v60, %v240_v41  ;;  %v9093_v32 = vld [vmem:[%s9833_s1 + $0x18] sm:$0xff]  ;;  %v7830_v39 = vld [vmem:[#allocation4 + $0x84c] ss:$20 sps:$4 sm:$0xff]   ;;  %v689_v6 = vadd.f32 %v688_v8, %v351_v50 }
  0x9f   :  { %v846_v51 = vmul.f32 0.020408163, %v466_v31  ;;  %v7843_v31 = vld [vmem:[#allocation4 + $0x550] ss:$20 sps:$4 sm:$0xff]   ;;  %v706_v41 = vsel %vm432_vm0, %v416_v46, 0.0  ;;  %v209_v5 = vunpack.c.l.bf16 %v9093_v32  ;;  %v225_v49 = vunpack.c.l.bf16 %v9101_v40  ;;  %v9135_v0 = vld [vmem:[%s9833_s1 + $0x158] sm:$0xff] }
  0xa0   :  { %5303 = vmatpush1.bf16.msra.mxu0 %v7819_v63  ;;  %v862_v14 = vmul.f32 0.020408163, %v674_v11  ;;  %v399_v11 = vunpack.c.l.bf16 %v9080_v20  ;;  %v481_v48 = vadd.f32 %v480_v27, %v239_v17  ;;  %v7828_v34 = vld [vmem:[#allocation4 + $0x848] ss:$20 sps:$4 sm:$0xff]   ;;  %v7855_v60 = vld [vmem:[#allocation4 + $0x500] ss:$20 sps:$4 sm:$0xff]   ;;  %v290_v27 = vunpack.c.h.bf16 %v9135_v0 }
  0xa1   :  { %5304 = vmatprep.subr.bf16.mxu0 %v7827_v47  ;;  %v979_v37 = vpack.c.bf16 %v846_v51, %v846_v51  ;;  %v7845_v47 = vld [vmem:[#allocation4 + $0x554] ss:$20 sps:$4 sm:$0xff]   ;;  %v495_v51 = vadd.f32 %v494_v62, %v256_v23  ;;  %v693_v23 = vsel %vm432_vm0, %v415_v19, 0.0  ;;  %v9158_v46 = vld [vmem:[%s9833_s1 + $0x218] sm:$0xff] }
  0xa2   :  { %v995_v33 = vpack.c.bf16 %v862_v14, %v862_v14  ;;  %v482_v14 = vadd.f32 %v481_v48, %v255_v22  ;;  %v210_v22 = vunpack.c.h.bf16 %v9093_v32  ;;  %v7834_v19 = vld [vmem:[#allocation4 + $0x820] ss:$20 sps:$4 sm:$0xff]   ;;  %v9165_v62 = vld [vmem:[%s9833_s1 + $0x258] sm:$0xff] }
  0xa3   :  { %v1811_v54 = vunpack.c.l.b16 %v979_v37  ;;  %v9110_v37 = vld [vmem:[%s9833_s1 + $0x98] sm:$0xff]  ;;  %v496_v52 = vadd.f32 %v495_v51, %v272_v38 }
  0xa4   :  { %5305 = vmatpush1.bf16.msra.mxu0 %v7825_v1  ;;  %v1827_v58 = vunpack.c.l.b16 %v995_v33  ;;  %v400_v1 = vunpack.c.h.bf16 %v9080_v20  ;;  %v690_v33 = vadd.f32 %v689_v6, %v367_v44  ;;  %v483_v42 = vadd.f32 %v482_v14, %v271_v24  ;;  %v9126_v38 = vld [vmem:[%s9833_s1 + $0x118] sm:$0xff] }
  0xa5   :  { %5306 = vmatprep.subr.bf16.mxu0 %v7833_v3  ;;  %v702_v3 = vadd.f32 %v701_v26, %v352_v59  ;;  %v497_v18 = vadd.f32 %v496_v52, %v288_v12  ;;  %v241_v9 = vunpack.c.l.bf16 %v9110_v37  ;;  %v242_v24 = vunpack.c.h.bf16 %v9110_v37  ;;  %v9144_v12 = vld [vmem:[%s9833_s1 + $0x198] sm:$0x11] }
  0xa6   :  { %v1844_v36 = vsel %vm1841_vm1, %v1827_v58, %v1811_v54  ;;  %v226_v54 = vunpack.c.h.bf16 %v9101_v40  ;;  %v691_v28 = vadd.f32 %v690_v33, %v383_v55  ;;  %v7857_v44 = vld [vmem:[#allocation4 + $0x504] ss:$20 sps:$4 sm:$0xff]   ;;  %v273_v4 = vunpack.c.l.bf16 %v9126_v38 }
  0xa7   :  { %v9085_v63 = vpack.c.b16 %v1844_v36, %v1844_v36  ;;  %v703_v17 = vadd.f32 %v702_v3, %v368_v25  ;;  %v499_v20 = vadd.f32 %v498_v15, %v497_v18  ;;  %v9151_v55 = vld [vmem:[%s9833_s1 + $0x1d8] sm:$0xff]  ;;  %v289_v26 = vunpack.c.l.bf16 %v9135_v0 }
  0xa8   :  { %5307 = vmatpush1.bf16.msra.mxu0 %v7831_v21  ;;  %v9117_v21 = vld [vmem:[%s9833_s1 + $0xd8] sm:$0xff]  ;;  %v692_v25 = vadd.f32 %v691_v28, %v399_v11  ;;  %v305_v8 = vunpack.c.l.bf16 %v9144_v12  ;;  %v321_v3 = vunpack.c.l.bf16 %v9151_v55  ;;  %v322_v48 = vunpack.c.h.bf16 %v9151_v55 }
  0xa9   :  { %5308 = vmatprep.subr.bf16.mxu0 %v7839_v35  ;;  %5292 = vmatmul.mubr.bf16.vlgmr.msra.gmra.mxu1 %v9085_v63  ;;  %v704_v13 = vadd.f32 %v703_v17, %v384_v57  ;;  %v7836_v35 = vld [vmem:[#allocation4 + $0x824] ss:$20 sps:$4 sm:$0xff]   ;;  %v257_v50 = vunpack.c.l.bf16 %v9117_v21  ;;  %v258_v59 = vunpack.c.h.bf16 %v9117_v21  ;;  %v337_v6 = vunpack.c.l.bf16 %v9158_v46 }
  0xaa   :  { %5342 = vmatpush1.bf16.msra.mxu1 %v7816_v29  ;;  %v484_v29 = vadd.f32 %v483_v42, %v287_v7  ;;  %v274_v7 = vunpack.c.h.bf16 %v9126_v38  ;;  %v694_v57 = vadd.f32 %v693_v23, %v692_v25  ;;  %v338_v17 = vunpack.c.h.bf16 %v9158_v46  ;;  %v7861_v18 = vld [vmem:[#allocation4 + $0x758] ss:$20 sps:$4 sm:$0xff]   ;;  %v7869_v25 = vld [vmem:[#allocation4 + $0x734] ss:$20 sps:$4 sm:$0xff]  }
  0xab   :  { %5343 = vmatprep.subr.bf16.mxu1 %v7824_v56  ;;  %v705_v58 = vadd.f32 %v704_v13, %v400_v1  ;;  %v7842_v56 = vld [vmem:[#allocation4 + $0x7fc] ss:$20 sps:$4 sm:$0xff]   ;;  %v353_v52 = vunpack.c.l.bf16 %v9165_v62  ;;  %v354_v33 = vunpack.c.h.bf16 %v9165_v62  ;;  %v7881_v55 = vld [vmem:[#allocation4 + $0x6e4] ss:$20 sps:$4 sm:$0xff]   ;;  %v7879_v38 = vld [vmem:[#allocation4 + $0x6e0] ss:$20 sps:$4 sm:$0xff]  }
  0xac   :  { %5309 = vmatpush1.bf16.msra.mxu0 %v7837_v61  ;;  %v486_v61 = vadd.f32 %v485_v2, %v484_v29  ;;  %v9172_v1 = vld [vmem:[%s9833_s1 + $0x298] sm:$0xff]  ;;  %v695_v15 = vrot.slane %v694_v57, 4 }
  0xad   :  { %5310 = vmatprep.subr.bf16.mxu0 %v7845_v47  ;;  %v707_v36 = vadd.f32 %v706_v41, %v705_v58  ;;  %v500_v47 = vrot.slane %v499_v20, 4  ;;  %v9179_v2 = vld [vmem:[%s9833_s1 + $0x2d8] sm:$0xff]  ;;  %v369_v42 = vunpack.c.l.bf16 %v9172_v1 }
  0xae   :  { %5344 = vmatpush1.bf16.msra.mxu1 %v7822_v30  ;;  %v306_v30 = vunpack.c.h.bf16 %v9144_v12  ;;  %v487_v11 = vrot.slane %v486_v61, 4  ;;  %v7840_v41 = vld [vmem:[#allocation4 + $0x7f8] ss:$20 sps:$4 sm:$0xff]   ;;  %v385_v29 = vunpack.c.l.bf16 %v9179_v2  ;;  %v386_v46 = vunpack.c.h.bf16 %v9179_v2 }
  0xaf   :  { %5345 = vmatprep.subr.bf16.mxu1 %v7830_v39  ;;  %v7863_v39 = vld [vmem:[#allocation4 + $0x75c] ss:$20 sps:$4 sm:$0xff]   ;;  %v501_v51 = vadd.f32 %v500_v47, %v499_v20  ;;  %v7848_v20 = vld [vmem:[#allocation4 + $0x7d4] ss:$20 sps:$4 sm:$0xff]  }
  0xb0   :  { %5311 = vmatpush1.bf16.msra.mxu0 %v7843_v31  ;;  %v708_v31 = vrot.slane %v707_v36, 4  ;;  %v488_v23 = vadd.f32 %v487_v11, %v486_v61  ;;  %v9193_v13 = vld [vmem:[%s9833_s1 + $0x358] sm:$0x11]  ;;  %v524_v32 = vsel %vm432_vm0, %v306_v30, 0.0 }
  0xb1   :  { %5312 = vmatprep.subr.bf16.mxu0 %v7851_v45  ;;  %v9186_v45 = vld [vmem:[%s9833_s1 + $0x318] sm:$0xff] }
  0xb2   :  { %5346 = vmatpush1.bf16.msra.mxu1 %v7828_v34  ;;  %v709_v14 = vadd.f32 %v708_v31, %v707_v36  ;;  %v502_v34 = vrot.slane %v501_v51, 2  ;;  %v489_v58 = vrot.slane %v488_v23, 2  ;;  %v401_v47 = vunpack.c.l.bf16 %v9186_v45 }
  0xb3   :  { %5347 = vmatprep.subr.bf16.mxu1 %v7836_v35  ;;  %v370_v35 = vunpack.c.h.bf16 %v9172_v1 }
  0xb4   :  { %5313 = vmatpush1.bf16.msra.mxu0 %v7849_v16  ;;  %v696_v16 = vadd.f32 %v695_v15, %v694_v57  ;;  %v710_v28 = vrot.slane %v709_v14, 2  ;;  %v503_v36 = vadd.f32 %v502_v34, %v501_v51  ;;  %v418_v57 = vunpack.c.h.bf16 %v9193_v13 }
  0xb5   :  { %5314 = vmatprep.subr.bf16.mxu0 %v7857_v44  ;;  %v519_v44 = vadd.f32 %v226_v54, %v210_v22  ;;  %v490_v11 = vadd.f32 %v489_v58, %v488_v23  ;;  %v506_v54 = vadd.f32 %v225_v49, %v209_v5  ;;  %v402_v15 = vunpack.c.h.bf16 %v9186_v45  ;;  %v7852_v49 = vld [vmem:[#allocation4 + $0x7a8] ss:$20 sps:$4 sm:$0xff]  }
  0xb6   :  { %5348 = vmatpush1.bf16.msra.mxu1 %v7834_v19  ;;  %v697_v61 = vrot.slane %v696_v16, 2  ;;  %v727_v19 = vadd.f32 %v338_v17, %v322_v48  ;;  %v504_v31 = vrot.slane %v503_v36, 1  ;;  %v7867_v48 = vld [vmem:[#allocation4 + $0x730] ss:$20 sps:$4 sm:$0xff]   ;;  %v714_v34 = vadd.f32 %v337_v6, %v321_v3 }
  0xb7   :  { %5349 = vmatprep.subr.bf16.mxu1 %v7842_v56  ;;  %v520_v62 = vadd.f32 %v519_v44, %v242_v24  ;;  %v7846_v56 = vld [vmem:[#allocation4 + $0x7d0] ss:$20 sps:$4 sm:$0xff]   ;;  %v7854_v24 = vld [vmem:[#allocation4 + $0x7ac] ss:$20 sps:$4 sm:$0xff]   ;;  %v507_v5 = vadd.f32 %v506_v54, %v241_v9  ;;  %v417_v6 = vunpack.c.l.bf16 %v9193_v13 }
  0xb8   :  { %5315 = vmatpush1.bf16.msra.mxu0 %v7855_v60  ;;  %v711_v60 = vadd.f32 %v710_v28, %v709_v14  ;;  %v728_v22 = vadd.f32 %v727_v19, %v354_v33  ;;  %v698_v51 = vadd.f32 %v697_v61, %v696_v16  ;;  %v7875_v14 = vld [vmem:[#allocation4 + $0x70c] ss:$20 sps:$4 sm:$0xff]   ;;  %v505_v23 = vadd.f32 %v504_v31, %v503_v36  ;;  %v7873_v16 = vld [vmem:[#allocation4 + $0x708] ss:$20 sps:$4 sm:$0xff]   ;;  %v7860_v44 = vld [vmem:[#allocation4 + $0x784] ss:$20 sps:$4 sm:$0xff]  }
  0xb9   :  { %5316 = vmatprep.subr.bf16.mxu0 %v7863_v39  ;;  %v521_v17 = vadd.f32 %v520_v62, %v258_v59  ;;  %v732_v59 = vsel %vm432_vm0, %v418_v57, 0.0  ;;  %v491_v28 = vrot.slane %v490_v11, 1  ;;  %v508_v30 = vadd.f32 %v507_v5, %v257_v50  ;;  %v7885_v54 = vld [vmem:[#allocation4 + $0x6b8] ss:$20 sps:$4 sm:$0xff]   ;;  %v7870_v5 = vld [vmem:[#allocation4 + $0x9b0] ss:$20 sps:$4 sm:$0xff]  }
  0xba   :  { %5350 = vmatpush1.bf16.msra.mxu1 %v7840_v41  ;;  %v712_v39 = vrot.slane %v711_v60, 1  ;;  %v729_v40 = vadd.f32 %v728_v22, %v370_v35  ;;  %v699_v9 = vrot.slane %v698_v51, 1  ;;  %v511_v36 = vsel %vm432_vm0, %v305_v8, 0.0  ;;  %v7887_v8 = vld [vmem:[#allocation4 + $0x6bc] ss:$20 sps:$4 sm:$0xff]  }
  0xbb   :  { %5351 = vmatprep.subr.bf16.mxu1 %v7848_v20  ;;  %v522_v33 = vadd.f32 %v521_v17, %v274_v7  ;;  %v715_v7 = vadd.f32 %v714_v34, %v353_v52  ;;  %v509_v21 = vadd.f32 %v508_v30, %v273_v4  ;;  %v7858_v52 = vld [vmem:[#allocation4 + $0x780] ss:$20 sps:$4 sm:$0xff]   ;;  %v719_v31 = vsel %vm432_vm0, %v417_v6, 0.0 }
  0xbc   :  { %5317 = vmatpush2.bf16.msra.mxu0 %v7861_v18  ;;  %v713_v41 = vadd.f32 %v712_v39, %v711_v60  ;;  %v849_v18 = vmul.f32 0.020408163, %v505_v23  ;;  %v730_v58 = vadd.f32 %v729_v40, %v386_v46  ;;  %v492_v46 = vadd.f32 %v491_v28, %v490_v11  ;;  %v7866_v60 = vld [vmem:[#allocation4 + $0x9dc] ss:$20 sps:$4 sm:$0xff]   ;;  %v7864_v11 = vld [vmem:[#allocation4 + $0x9d8] ss:$20 sps:$4 sm:$0xff]  }
  0xbd   :  { %5318 = vmatprep.subr.bf16.mxu0 %v7869_v25  ;;  %v523_v35 = vadd.f32 %v522_v33, %v290_v27  ;;  %v716_v27 = vadd.f32 %v715_v7, %v369_v42  ;;  %v510_v13 = vadd.f32 %v509_v21, %v289_v26  ;;  %v700_v57 = vadd.f32 %v699_v9, %v698_v51  ;;  %v7872_v17 = vld [vmem:[#allocation4 + $0x9b4] ss:$20 sps:$4 sm:$0xff]  }
  0xbe   :  { %5352 = vmatpush1.bf16.msra.mxu1 %v7846_v56  ;;  %v865_v37 = vmul.f32 0.020408163, %v713_v41  ;;  %v982_v3 = vpack.c.bf16 %v849_v18, %v849_v18  ;;  %v731_v20 = vadd.f32 %v730_v58, %v402_v15  ;;  %v7899_v18 = vld [vmem:[#allocation4 + $0x66c] ss:$20 sps:$4 sm:$0xff]   ;;  %v7876_v9 = vld [vmem:[#allocation4 + $0x988] ss:$20 sps:$4 sm:$0xff]  }
  0xbf   :  { %5353 = vmatprep.subr.bf16.mxu1 %v7854_v24  ;;  %v525_v25 = vadd.f32 %v524_v32, %v523_v35  ;;  %v717_v12 = vadd.f32 %v716_v27, %v385_v29  ;;  %v512_v42 = vadd.f32 %v511_v36, %v510_v13  ;;  %v848_v29 = vmul.f32 0.020408163, %v492_v46  ;;  %v7893_v24 = vld [vmem:[#allocation4 + $0x694] ss:$20 sps:$4 sm:$0xff]  }
  0xc0   :  { %5319 = vmatpush2.bf16.msra.mxu0 %v7867_v48  ;;  %v998_v50 = vpack.c.bf16 %v865_v37, %v865_v37  ;;  %v1814_v61 = vunpack.c.l.b16 %v982_v3  ;;  %v733_v19 = vadd.f32 %v732_v59, %v731_v20  ;;  %v864_v39 = vmul.f32 0.020408163, %v700_v57  ;;  %v7903_v13 = vld [vmem:[#allocation4 + $0x640] ss:$20 sps:$4 sm:$0xff]   ;;  %v7890_v57 = vld [vmem:[#allocation4 + $0x93c] ss:$20 sps:$4 sm:$0xff]  }
  0xc1   :  { %5320 = vmatprep.subr.bf16.mxu0 %v7875_v14  ;;  %v526_v62 = vrot.slane %v525_v25, 4  ;;  %v718_v22 = vadd.f32 %v717_v12, %v401_v47  ;;  %v513_v2 = vrot.slane %v512_v42, 4  ;;  %v981_v41 = vpack.c.bf16 %v848_v29, %v848_v29  ;;  %v7911_v12 = vld [vmem:[#allocation4 + $0xb1c] ss:$20 sps:$4 sm:$0xff]  }
  0xc2   :  { %5354 = vmatpush1.bf16.msra.mxu1 %v7852_v49  ;;  %v1830_v4 = vunpack.c.l.b16 %v998_v50  ;;  %v734_v1 = vrot.slane %v733_v19, 4  ;;  %v7891_v49 = vld [vmem:[#allocation4 + $0x690] ss:$20 sps:$4 sm:$0xff]   ;;  %v997_v33 = vpack.c.bf16 %v864_v39, %v864_v39 }
  0xc3   :  { %5355 = vmatprep.subr.bf16.mxu1 %v7860_v44  ;;  %v527_v26 = vadd.f32 %v526_v62, %v525_v25  ;;  %v720_v15 = vadd.f32 %v719_v31, %v718_v22  ;;  %v514_v23 = vadd.f32 %v513_v2, %v512_v42  ;;  %v7884_v44 = vld [vmem:[#allocation4 + $0x964] ss:$20 sps:$4 sm:$0xff]   ;;  %v1813_v3 = vunpack.c.l.b16 %v981_v41 }
  0xc4   :  { %5321 = vmatpush2.bf16.msra.mxu0 %v7873_v16  ;;  %v1847_v0 = vsel %vm1841_vm1, %v1830_v4, %v1814_v61  ;;  %v735_v48 = vadd.f32 %v734_v1, %v733_v19  ;;  %v7878_v16 = vld [vmem:[#allocation4 + $0x98c] ss:$20 sps:$4 sm:$0xff]   ;;  %v1829_v6 = vunpack.c.l.b16 %v997_v33  ;;  %v7905_v50 = vld [vmem:[#allocation4 + $0x644] ss:$20 sps:$4 sm:$0xff]  }
  0xc5   :  { %5322 = vmatprep.subr.bf16.mxu0 %v7881_v55  ;;  %v9244_v56 = vpack.c.b16 %v1847_v0, %v1847_v0  ;;  %v528_v51 = vrot.slane %v527_v26, 2  ;;  %v721_v47 = vrot.slane %v720_v15, 4  ;;  %v515_v40 = vrot.slane %v514_v23, 2  ;;  %v7897_v55 = vld [vmem:[#allocation4 + $0x668] ss:$20 sps:$4 sm:$0xff]   ;;  %v9251_v42 = vld [vmem:[%s9833_s1 + $0x20] sm:$0xff] }
  0xc6   :  { %5356 = vmatpush1.bf16.msra.mxu1 %v7858_v52  ;;  %v736_v14 = vrot.slane %v735_v48, 2  ;;  %v7882_v19 = vld [vmem:[#allocation4 + $0x960] ss:$20 sps:$4 sm:$0xff]   ;;  %v7909_v2 = vld [vmem:[#allocation4 + $0xb18] ss:$20 sps:$4 sm:$0xff]  }
  0xc7   :  { %5357 = vmatprep.subr.bf16.mxu1 %v7866_v60  ;;  %5332 = vmatprep.mubr.bf16.mxu0 %v9244_v56  ;;  %v529_v45 = vadd.f32 %v528_v51, %v527_v26  ;;  %v722_v34 = vadd.f32 %v721_v47, %v720_v15  ;;  %v516_v58 = vadd.f32 %v515_v40, %v514_v23  ;;  %v9256_v31 = vld [vmem:[%s9833_s1 + $0x60] sm:$0xff]  ;;  %v7896_v0 = vld [vmem:[#allocation4 + $0x914] ss:$20 sps:$4 sm:$0xff]   ;;  %v212_v23 = vunpack.c.h.bf16 %v9251_v42 }
  0xc8   :  { %5323 = vmatpush2.bf16.msra.mxu0 %v7879_v38  ;;  %v737_v32 = vadd.f32 %v736_v14, %v735_v48  ;;  %v1846_v60 = vsel %vm1841_vm1, %v1829_v6, %v1813_v3  ;;  %v151_v39 = vld [vmem:[%s9833_s1 + $0x1e0] sm:$0xff]  ;;  %v7917_v15 = vld [vmem:[#allocation4 + $0xaf4] ss:$20 sps:$4 sm:$0xff]   ;;  %v211_v14 = vunpack.c.l.bf16 %v9251_v42 }
  0xc9   :  { %5324 = vmatprep.subr.bf16.mxu0 %v7887_v8  ;;  %v530_v59 = vrot.slane %v529_v45, 1  ;;  %v723_v37 = vrot.slane %v722_v34, 2  ;;  %v517_v7 = vrot.slane %v516_v58, 1  ;;  %v9258_v26 = vpack.c.b16 %v1846_v60, %v1846_v60  ;;  %v159_v51 = vld [vmem:[%s9833_s1 + $0x220] sm:$0xff] }
  0xca   :  { %5358 = vmatpush2.bf16.msra.mxu1 %v7864_v11  ;;  %v738_v28 = vrot.slane %v737_v32, 1  ;;  %v7888_v11 = vld [vmem:[#allocation4 + $0x938] ss:$20 sps:$4 sm:$0xff]   ;;  %v167_v40 = vld [vmem:[%s9833_s1 + $0x260] sm:$0xff] }
  0xcb   :  { %5359 = vmatprep.subr.bf16.mxu1 %v7872_v17  ;;  %v531_v30 = vadd.f32 %v530_v59, %v529_v45  ;;  %v724_v21 = vadd.f32 %v723_v37, %v722_v34  ;;  %v518_v36 = vadd.f32 %v517_v7, %v516_v58  ;;  %v9277_v17 = vld [vmem:[%s9833_s1 + $0xe0] sm:$0xff]  ;;  %v227_v45 = vunpack.c.l.bf16 %v9256_v31 }
  0xcc   :  { %5325 = vmatpush2.bf16.msra.mxu0 %v7885_v54  ;;  %v739_v35 = vadd.f32 %v738_v28, %v737_v32  ;;  %v9264_v54 = vld [vmem:[%s9833_s1 + $0xa0] sm:$0xff]  ;;  %v339_v28 = vunpack.c.l.bf16 %v159_v51  ;;  %v340_v58 = vunpack.c.h.bf16 %v159_v51  ;;  %v259_v7 = vunpack.c.l.bf16 %v9277_v17 }
  0xcd   :  { %5326 = vmatprep.subr.bf16.mxu0 %v7893_v24  ;;  %v851_v20 = vmul.f32 0.020408163, %v531_v30  ;;  %v725_v52 = vrot.slane %v724_v21, 1  ;;  %v850_v46 = vmul.f32 0.020408163, %v518_v36  ;;  %v9282_v24 = vld [vmem:[%s9833_s1 + $0x120] sm:$0xff]  ;;  %v244_v41 = vunpack.c.h.bf16 %v9264_v54 }
  0xce   :  { %5360 = vmatpush2.bf16.msra.mxu1 %v7870_v5  ;;  %v867_v25 = vmul.f32 0.020408163, %v739_v35  ;;  %v9291_v32 = vld [vmem:[%s9833_s1 + $0x160] sm:$0xff]  ;;  %v228_v5 = vunpack.c.h.bf16 %v9256_v31  ;;  %v276_v6 = vunpack.c.h.bf16 %v9282_v24 }
  0xcf   :  { %5361 = vmatprep.subr.bf16.mxu1 %v7878_v16  ;;  %v984_v27 = vpack.c.bf16 %v851_v20, %v851_v20  ;;  %v726_v4 = vadd.f32 %v725_v52, %v724_v21  ;;  %v983_v1 = vpack.c.bf16 %v850_v46, %v850_v46  ;;  %v7894_v33 = vld [vmem:[#allocation4 + $0x910] ss:$20 sps:$4 sm:$0xff]   ;;  %v323_v16 = vunpack.c.l.bf16 %v151_v39  ;;  %v7902_v30 = vld [vmem:[#allocation4 + $0x8ec] ss:$20 sps:$4 sm:$0xff]  }
  0xd0   :  { %5327 = vmatpush2.bf16.msra.mxu0 %v7891_v49  ;;  %v1000_v61 = vpack.c.bf16 %v867_v25, %v867_v25  ;;  %v243_v49 = vunpack.c.l.bf16 %v9264_v54  ;;  %v9303_v59 = vld [vmem:[%s9833_s1 + $0x1a0] sm:$0x11]  ;;  %v291_v20 = vunpack.c.l.bf16 %v9291_v32  ;;  %v355_v21 = vunpack.c.l.bf16 %v167_v40  ;;  %v7900_v25 = vld [vmem:[#allocation4 + $0x8e8] ss:$20 sps:$4 sm:$0xff]  }
  0xd1   :  { %5328 = vmatprep.subr.bf16.mxu0 %v7899_v18  ;;  %v1816_v38 = vunpack.c.l.b16 %v984_v27  ;;  %v866_v8 = vmul.f32 0.020408163, %v726_v4  ;;  %v1815_v47 = vunpack.c.l.b16 %v983_v1  ;;  %v175_v34 = vld [vmem:[%s9833_s1 + $0x2a0] sm:$0xff]  ;;  %v324_v18 = vunpack.c.h.bf16 %v151_v39 }
  0xd2   :  { %5362 = vmatpush2.bf16.msra.mxu1 %v7876_v9  ;;  %v1832_v62 = vunpack.c.l.b16 %v1000_v61  ;;  %v7915_v9 = vld [vmem:[#allocation4 + $0xaf0] ss:$20 sps:$4 sm:$0xff]   ;;  %v7923_v35 = vld [vmem:[#allocation4 + $0xacc] ss:$20 sps:$4 sm:$0xff]   ;;  %v292_v36 = vunpack.c.h.bf16 %v9291_v32  ;;  %v307_v27 = vunpack.c.l.bf16 %v9303_v59  ;;  %v371_v52 = vunpack.c.l.bf16 %v175_v34 }
  0xd3   :  { %5363 = vmatprep.subr.bf16.mxu1 %v7884_v44  ;;  %v999_v29 = vpack.c.bf16 %v866_v8, %v866_v8  ;;  %v260_v44 = vunpack.c.h.bf16 %v9277_v17  ;;  %v183_v3 = vld [vmem:[%s9833_s1 + $0x2e0] sm:$0xff]  ;;  %v545_v61 = vadd.f32 %v228_v5, %v212_v23  ;;  %v372_v60 = vunpack.c.h.bf16 %v175_v34  ;;  %v7914_v17 = vld [vmem:[#allocation4 + $0xd9c] ss:$20 sps:$4 sm:$0xff]   ;;  %v9363_v32 = vld [vmem:[%s9833_s1 + $0x1e8] sm:$0xff] }
  0xd4   :  { %5329 = vmatpush2.bf16.msra.mxu0 %v7897_v55  ;;  %v1849_v22 = vsel %vm1841_vm1, %v1832_v62, %v1816_v38  ;;  %v275_v55 = vunpack.c.l.bf16 %v9282_v24  ;;  %v7908_v46 = vld [vmem:[#allocation4 + $0x8c4] ss:$20 sps:$4 sm:$0xff]   ;;  %v753_v38 = vadd.f32 %v340_v58, %v324_v18  ;;  %v532_v4 = vadd.f32 %v227_v45, %v211_v14  ;;  %v7927_v24 = vld [vmem:[#allocation4 + $0xaa0] ss:$20 sps:$4 sm:$0xff]   ;;  %v7935_v14 = vld [vmem:[#allocation4 + $0xa7c] ss:$20 sps:$4 sm:$0xff]  }
  0xd5   :  { %5330 = vmatprep.subr.bf16.mxu0 %v7905_v50  ;;  %v9266_v48 = vpack.c.b16 %v1849_v22, %v1849_v22  ;;  %v1831_v37 = vunpack.c.l.b16 %v999_v29  ;;  %v356_v50 = vunpack.c.h.bf16 %v167_v40  ;;  %v308_v8 = vunpack.c.h.bf16 %v9303_v59  ;;  %v7929_v31 = vld [vmem:[#allocation4 + $0xaa4] ss:$20 sps:$4 sm:$0xff]   ;;  %v9337_v18 = vld [vmem:[%s9833_s1 + $0x68] sm:$0xff] }
  0xd6   :  { %5364 = vmatpush2.bf16.msra.mxu1 %v7882_v19  ;;  %v191_v19 = vld [vmem:[%s9833_s1 + $0x320] sm:$0xff]  ;;  %v387_v1 = vunpack.c.l.bf16 %v183_v3  ;;  %v546_v42 = vadd.f32 %v545_v61, %v244_v41  ;;  %v533_v22 = vadd.f32 %v532_v4, %v243_v49  ;;  %v9331_v49 = vld [vmem:[%s9833_s1 + $0x28] sm:$0xff]  ;;  %v230_v61 = vunpack.c.h.bf16 %v9337_v18 }
  0xd7   :  { %5365 = vmatprep.subr.bf16.mxu1 %v7890_v57  ;;  %5373 = vmatprep.mubr.bf16.mxu1 %v9266_v48  ;;  %v740_v57 = vadd.f32 %v339_v28, %v323_v16  ;;  %v1848_v62 = vsel %vm1841_vm1, %v1831_v37, %v1815_v47  ;;  %v403_v29 = vunpack.c.l.bf16 %v191_v19  ;;  %v404_v23 = vunpack.c.h.bf16 %v191_v19  ;;  %v7912_v28 = vld [vmem:[#allocation4 + $0xd98] ss:$20 sps:$4 sm:$0xff]   ;;  %v7918_v4 = vld [vmem:[#allocation4 + $0xd70] ss:$20 sps:$4 sm:$0xff]  }
  0xd8   :  { %5331 = vmatpush2.bf16.msra.mxu0 %v7903_v13  ;;  %v199_v13 = vld [vmem:[%s9833_s1 + $0x360] sm:$0x11]  ;;  %v534_v47 = vadd.f32 %v533_v22, %v259_v7  ;;  %v9326_v5 = vpack.c.b16 %v1848_v62, %v1848_v62  ;;  %v7933_v58 = vld [vmem:[#allocation4 + $0xa78] ss:$20 sps:$4 sm:$0xff]  }
  0xd9   :  { %5382 = vmatprep.subr.bf16.mxu0 %v7911_v12  ;;  %v7921_v12 = vld [vmem:[#allocation4 + $0xac8] ss:$20 sps:$4 sm:$0xff]   ;;  %v741_v54 = vadd.f32 %v740_v57, %v355_v21  ;;  %v419_v39 = vunpack.c.l.bf16 %v199_v13  ;;  %v420_v51 = vunpack.c.h.bf16 %v199_v13 }
  0xda   :  { %5366 = vmatpush2.bf16.msra.mxu1 %v7888_v11  ;;  %v388_v11 = vunpack.c.h.bf16 %v183_v3  ;;  %v535_v34 = vadd.f32 %v534_v47, %v275_v55  ;;  %v9345_v7 = vld [vmem:[%s9833_s1 + $0xa8] sm:$0xff] }
  0xdb   :  { %5333 = vmatmul.mubr.bf16.vlgmr.msra.gmra.mxu0 %v9258_v26  ;;  %5367 = vmatprep.subr.bf16.mxu1 %v7896_v0  ;;  %v754_v0 = vadd.f32 %v753_v38, %v356_v50  ;;  %v742_v40 = vadd.f32 %v741_v54, %v371_v52  ;;  %v758_v37 = vsel %vm432_vm0, %v420_v51, 0.0  ;;  %v7941_v55 = vld [vmem:[#allocation4 + $0xa54] ss:$20 sps:$4 sm:$0xff]   ;;  %v229_v52 = vunpack.c.l.bf16 %v9337_v18 }
  0xdc   :  { %5383 = vmatpush1.bf16.msra.mxu0 %v7909_v2  ;;  %v7906_v2 = vld [vmem:[#allocation4 + $0x8c0] ss:$20 sps:$4 sm:$0xff]   ;;  %v9352_v50 = vld [vmem:[%s9833_s1 + $0xe8] sm:$0xff]  ;;  %v245_v38 = vunpack.c.l.bf16 %v9345_v7 }
  0xdd   :  { %5384 = vmatprep.subr.bf16.mxu0 %v7917_v15  ;;  %v547_v15 = vadd.f32 %v546_v42, %v260_v44  ;;  %v755_v45 = vadd.f32 %v754_v0, %v372_v60  ;;  %v743_v16 = vadd.f32 %v742_v40, %v387_v1  ;;  %v7920_v44 = vld [vmem:[#allocation4 + $0xd74] ss:$20 sps:$4 sm:$0xff]   ;;  %v261_v1 = vunpack.c.l.bf16 %v9352_v50 }
  0xde   :  { %5368 = vmatpush2.bf16.msra.mxu1 %v7894_v33  ;;  %v550_v33 = vsel %vm432_vm0, %v308_v8, 0.0  ;;  %v9371_v60 = vld [vmem:[%s9833_s1 + $0x228] sm:$0xff]  ;;  %v246_v8 = vunpack.c.h.bf16 %v9345_v7  ;;  %v262_v42 = vunpack.c.h.bf16 %v9352_v50 }
  0xdf   :  { %5369 = vmatprep.subr.bf16.mxu1 %v7902_v30  ;;  %v548_v41 = vadd.f32 %v547_v15, %v276_v6  ;;  %v756_v59 = vadd.f32 %v755_v45, %v388_v11  ;;  %v536_v6 = vadd.f32 %v535_v34, %v291_v20  ;;  %v744_v21 = vadd.f32 %v743_v16, %v403_v29  ;;  %v9377_v62 = vld [vmem:[%s9833_s1 + $0x168] sm:$0xff]  ;;  %v7939_v29 = vld [vmem:[#allocation4 + $0xa50] ss:$20 sps:$4 sm:$0xff]  }
  0xe0   :  { %5385 = vmatpush1.bf16.msra.mxu0 %v7915_v9  ;;  %v537_v9 = vsel %vm432_vm0, %v307_v27, 0.0  ;;  %v214_v20 = vunpack.c.h.bf16 %v9331_v49  ;;  %v9391_v54 = vld [vmem:[%s9833_s1 + $0x268] sm:$0xff]  ;;  %v326_v15 = vunpack.c.h.bf16 %v9363_v32  ;;  %v294_v40 = vunpack.c.h.bf16 %v9377_v62 }
  0xe1   :  { %5386 = vmatprep.subr.bf16.mxu0 %v7923_v35  ;;  %v549_v30 = vadd.f32 %v548_v41, %v292_v36  ;;  %v745_v35 = vsel %vm432_vm0, %v419_v39, 0.0  ;;  %v757_v3 = vadd.f32 %v756_v59, %v404_v23  ;;  %v213_v36 = vunpack.c.l.bf16 %v9331_v49  ;;  %v9400_v47 = vld [vmem:[%s9833_s1 + $0x2a8] sm:$0xff]  ;;  %v7959_v49 = vld [vmem:[#allocation4 + $0xc5c] ss:$20 sps:$4 sm:$0xff]  }
  0xe2   :  { %5370 = vmatpush2.bf16.msra.mxu1 %v7900_v25  ;;  %v9357_v25 = vld [vmem:[%s9833_s1 + $0x128] sm:$0xff]  ;;  %v538_v19 = vadd.f32 %v537_v9, %v536_v6  ;;  %v746_v13 = vadd.f32 %v745_v35, %v744_v21  ;;  %v358_v16 = vunpack.c.h.bf16 %v9391_v54  ;;  %v325_v9 = vunpack.c.l.bf16 %v9363_v32 }
  0xe3   :  { %5371 = vmatprep.subr.bf16.mxu1 %v7908_v46  ;;  %v551_v27 = vadd.f32 %v550_v33, %v549_v30  ;;  %v759_v46 = vadd.f32 %v758_v37, %v757_v3  ;;  %v278_v51 = vunpack.c.h.bf16 %v9357_v25  ;;  %v7924_v41 = vld [vmem:[#allocation4 + $0xd48] ss:$20 sps:$4 sm:$0xff]   ;;  %v341_v35 = vunpack.c.l.bf16 %v9371_v60 }
  0xe4   :  { %5387 = vmatpush1.bf16.msra.mxu0 %v7921_v12  ;;  %v9382_v12 = vld [vmem:[%s9833_s1 + $0x1a8] sm:$0x11]  ;;  %v539_v0 = vrot.slane %v538_v19, 4  ;;  %v747_v22 = vrot.slane %v746_v13, 4  ;;  %v374_v6 = vunpack.c.h.bf16 %v9400_v47 }
  0xe5   :  { %5388 = vmatprep.subr.bf16.mxu0 %v7929_v31  ;;  %v552_v57 = vrot.slane %v551_v27, 4  ;;  %v7926_v31 = vld [vmem:[#allocation4 + $0xd4c] ss:$20 sps:$4 sm:$0xff]   ;;  %v760_v11 = vrot.slane %v759_v46, 4  ;;  %v309_v34 = vunpack.c.l.bf16 %v9382_v12  ;;  %v310_v37 = vunpack.c.h.bf16 %v9382_v12  ;;  %v7965_v7 = vld [vmem:[#allocation4 + $0xc34] ss:$20 sps:$4 sm:$0xff]  }
  0xe6   :  { %5372 = vmatpush2.bf16.msra.mxu1 %v7906_v2  ;;  %v277_v2 = vunpack.c.l.bf16 %v9357_v25  ;;  %v540_v23 = vadd.f32 %v539_v0, %v538_v19  ;;  %v748_v45 = vadd.f32 %v747_v22, %v746_v13  ;;  %v9406_v59 = vld [vmem:[%s9833_s1 + $0x2e8] sm:$0xff]  ;;  %v357_v0 = vunpack.c.l.bf16 %v9391_v54 }
  0xe7   :  { %5423 = vmatprep.subr.bf16.mxu1 %v7914_v17  ;;  %v553_v39 = vadd.f32 %v552_v57, %v551_v27  ;;  %v342_v17 = vunpack.c.h.bf16 %v9371_v60  ;;  %v9416_v3 = vld [vmem:[%s9833_s1 + $0x368] sm:$0x11]  ;;  %v390_v13 = vunpack.c.h.bf16 %v9406_v59  ;;  %v576_v54 = vsel %vm432_vm0, %v310_v37, 0.0 }
  0xe8   :  { %5389 = vmatpush1.bf16.msra.mxu0 %v7927_v24  ;;  %v7947_v24 = vld [vmem:[#allocation4 + $0xa2c] ss:$20 sps:$4 sm:$0xff]   ;;  %v541_v32 = vrot.slane %v540_v23, 2  ;;  %v422_v22 = vunpack.c.h.bf16 %v9416_v3  ;;  %v389_v37 = vunpack.c.l.bf16 %v9406_v59  ;;  %v293_v59 = vunpack.c.l.bf16 %v9377_v62 }
  0xe9   :  { %5390 = vmatprep.subr.bf16.mxu0 %v7935_v14  ;;  %5374 = vmatmul.mubr.bf16.vlgmr.msra.gmra.mxu1 %v9326_v5  ;;  %v761_v14 = vadd.f32 %v760_v11, %v759_v46  ;;  %v554_v33 = vrot.slane %v553_v39, 2  ;;  %v779_v27 = vadd.f32 %v342_v17, %v326_v15  ;;  %v749_v46 = vrot.slane %v748_v45, 2  ;;  %v9422_v19 = vld [vmem:[%s9833_s1 + $0x328] sm:$0xff]  ;;  %v7951_v15 = vld [vmem:[#allocation4 + $0xa00] ss:$20 sps:$4 sm:$0xff]  }
  0xea   :  { %5424 = vmatpush1.bf16.msra.mxu1 %v7912_v28  ;;  %v571_v28 = vadd.f32 %v230_v61, %v214_v20  ;;  %v7953_v20 = vld [vmem:[#allocation4 + $0xa04] ss:$20 sps:$4 sm:$0xff]   ;;  %v563_v50 = vsel %vm432_vm0, %v309_v34, 0.0 }
  0xeb   :  { %5425 = vmatprep.subr.bf16.mxu1 %v7920_v44  ;;  %v762_v30 = vrot.slane %v761_v14, 2  ;;  %v7945_v44 = vld [vmem:[#allocation4 + $0xa28] ss:$20 sps:$4 sm:$0xff]   ;;  %v780_v57 = vadd.f32 %v779_v27, %v358_v16  ;;  %v7956_v34 = vld [vmem:[#allocation4 + $0xc84] ss:$20 sps:$4 sm:$0xff]  }
  0xec   :  { %5391 = vmatpush1.bf16.msra.mxu0 %v7933_v58  ;;  %v7932_v58 = vld [vmem:[#allocation4 + $0xd24] ss:$20 sps:$4 sm:$0xff]   ;;  %v572_v21 = vadd.f32 %v571_v28, %v246_v8  ;;  %v558_v8 = vadd.f32 %v229_v52, %v213_v36  ;;  %v542_v36 = vadd.f32 %v541_v32, %v540_v23  ;;  %v750_v52 = vadd.f32 %v749_v46, %v748_v45 }
  0xed   :  { %5392 = vmatprep.subr.bf16.mxu0 %v7941_v55  ;;  %v555_v55 = vadd.f32 %v554_v33, %v553_v39  ;;  %v763_v61 = vadd.f32 %v762_v30, %v761_v14  ;;  %v7938_v39 = vld [vmem:[#allocation4 + $0xcfc] ss:$20 sps:$4 sm:$0xff]   ;;  %v781_v14 = vadd.f32 %v780_v57, %v374_v6  ;;  %v7936_v30 = vld [vmem:[#allocation4 + $0xcf8] ss:$20 sps:$4 sm:$0xff]  }
  0xee   :  { %5426 = vmatpush1.bf16.msra.mxu1 %v7918_v4  ;;  %v573_v4 = vadd.f32 %v572_v21, %v262_v42  ;;  %v406_v42 = vunpack.c.h.bf16 %v9422_v19  ;;  %v7957_v23 = vld [vmem:[#allocation4 + $0xc58] ss:$20 sps:$4 sm:$0xff]   ;;  %v543_v6 = vrot.slane %v542_v36, 1  ;;  %v751_v21 = vrot.slane %v750_v52, 1  ;;  %v7942_v46 = vld [vmem:[#allocation4 + $0xcd0] ss:$20 sps:$4 sm:$0xff]  }
  0xef   :  { %5427 = vmatprep.subr.bf16.mxu1 %v7926_v31  ;;  %v556_v60 = vrot.slane %v555_v55, 1  ;;  %v7930_v31 = vld [vmem:[#allocation4 + $0xd20] ss:$20 sps:$4 sm:$0xff]   ;;  %v764_v11 = vrot.slane %v763_v61, 1  ;;  %v782_v28 = vadd.f32 %v781_v14, %v390_v13  ;;  %v7963_v57 = vld [vmem:[#allocation4 + $0xc30] ss:$20 sps:$4 sm:$0xff]  }
  0xf0   :  { %5393 = vmatpush1.bf16.msra.mxu0 %v7939_v29  ;;  %v766_v29 = vadd.f32 %v341_v35, %v325_v9  ;;  %v373_v35 = vunpack.c.l.bf16 %v9400_v47  ;;  %v421_v47 = vunpack.c.l.bf16 %v9416_v3 }
  0xf1   :  { %5394 = vmatprep.subr.bf16.mxu0 %v7947_v24  ;;  %v557_v17 = vadd.f32 %v556_v60, %v555_v55  ;;  %v574_v24 = vadd.f32 %v573_v4, %v278_v51  ;;  %v765_v18 = vadd.f32 %v764_v11, %v763_v61  ;;  %v784_v51 = vsel %vm432_vm0, %v422_v22, 0.0  ;;  %v7971_v11 = vld [vmem:[#allocation4 + $0xc0c] ss:$20 sps:$4 sm:$0xff]  }
  0xf2   :  { %5428 = vmatpush1.bf16.msra.mxu1 %v7924_v41  ;;  %v559_v41 = vadd.f32 %v558_v8, %v245_v38  ;;  %v405_v60 = vunpack.c.l.bf16 %v9422_v19  ;;  %v544_v19 = vadd.f32 %v543_v6, %v542_v36  ;;  %v771_v22 = vsel %vm432_vm0, %v421_v47, 0.0  ;;  %v7968_v47 = vld [vmem:[#allocation4 + $0xeb4] ss:$20 sps:$4 sm:$0xff]  }
  0xf3   :  { %5429 = vmatprep.subr.bf16.mxu1 %v7932_v58  ;;  %v853_v33 = vmul.f32 0.020408163, %v557_v17  ;;  %v575_v16 = vadd.f32 %v574_v24, %v294_v40  ;;  %v869_v9 = vmul.f32 0.020408163, %v765_v18  ;;  %v767_v58 = vadd.f32 %v766_v29, %v357_v0 }
  0xf4   :  { %5395 = vmatpush1.bf16.msra.mxu0 %v7945_v44  ;;  %v7944_v44 = vld [vmem:[#allocation4 + $0xcd4] ss:$20 sps:$4 sm:$0xff]   ;;  %v783_v40 = vadd.f32 %v782_v28, %v406_v42  ;;  %v560_v32 = vadd.f32 %v559_v41, %v261_v1  ;;  %v7950_v1 = vld [vmem:[#allocation4 + $0xcac] ss:$20 sps:$4 sm:$0xff]   ;;  %v852_v18 = vmul.f32 0.020408163, %v544_v19 }
  0xf5   :  { %5396 = vmatprep.subr.bf16.mxu0 %v7953_v20  ;;  %v986_v45 = vpack.c.bf16 %v853_v33, %v853_v33  ;;  %v577_v55 = vadd.f32 %v576_v54, %v575_v16  ;;  %v1002_v38 = vpack.c.bf16 %v869_v9, %v869_v9  ;;  %v768_v4 = vadd.f32 %v767_v58, %v373_v35  ;;  %v7969_v42 = vld [vmem:[#allocation4 + $0xc08] ss:$20 sps:$4 sm:$0xff]   ;;  %v7975_v9 = vld [vmem:[#allocation4 + $0xbe0] ss:$20 sps:$4 sm:$0xff]  }
  0xf6   :  { %5430 = vmatpush1.bf16.msra.mxu1 %v7930_v31  ;;  %v785_v61 = vadd.f32 %v784_v51, %v783_v40  ;;  %v561_v3 = vadd.f32 %v560_v32, %v277_v2  ;;  %v7948_v2 = vld [vmem:[#allocation4 + $0xca8] ss:$20 sps:$4 sm:$0xff]  }
  0xf7   :  { %5431 = vmatprep.subr.bf16.mxu1 %v7938_v39  ;;  %v1818_v27 = vunpack.c.l.b16 %v986_v45  ;;  %v578_v20 = vrot.slane %v577_v55, 4  ;;  %v1834_v13 = vunpack.c.l.b16 %v1002_v38  ;;  %v769_v0 = vadd.f32 %v768_v4, %v389_v37  ;;  %v7962_v58 = vld [vmem:[#allocation4 + $0xedc] ss:$20 sps:$4 sm:$0xff]   ;;  %v7960_v38 = vld [vmem:[#allocation4 + $0xed8] ss:$20 sps:$4 sm:$0xff]  }
  0xf8   :  { %5397 = vmatpush1.bf16.msra.mxu0 %v7951_v15  ;;  %v786_v31 = vrot.slane %v785_v61, 4  ;;  %v752_v39 = vadd.f32 %v751_v21, %v750_v52  ;;  %v562_v17 = vadd.f32 %v561_v3, %v293_v59  ;;  %v985_v37 = vpack.c.bf16 %v852_v18, %v852_v18  ;;  %v7989_v32 = vld [vmem:[#allocation4 + $0xb94] ss:$20 sps:$4 sm:$0xff]   ;;  %v7966_v3 = vld [vmem:[#allocation4 + $0xeb0] ss:$20 sps:$4 sm:$0xff]  }
  0xf9   :  { %5398 = vmatprep.subr.bf16.mxu0 %v7959_v49  ;;  %v579_v8 = vadd.f32 %v578_v20, %v577_v55  ;;  %v1851_v62 = vsel %vm1841_vm1, %v1834_v13, %v1818_v27  ;;  %v770_v12 = vadd.f32 %v769_v0, %v405_v60  ;;  %v7977_v49 = vld [vmem:[#allocation4 + $0xbe4] ss:$20 sps:$4 sm:$0xff]   ;;  %v113_v18 = vld [vmem:[%s9833_s1 + $0xb0] sm:$0xff] }
  0xfa   :  { %5432 = vmatpush1.bf16.msra.mxu1 %v7936_v30  ;;  %v9450_v29 = vpack.c.b16 %v1851_v62, %v1851_v62  ;;  %v787_v25 = vadd.f32 %v786_v31, %v785_v61  ;;  %v564_v36 = vadd.f32 %v563_v50, %v562_v17  ;;  %v868_v52 = vmul.f32 0.020408163, %v752_v39  ;;  %v7954_v30 = vld [vmem:[#allocation4 + $0xc80] ss:$20 sps:$4 sm:$0xff]   ;;  %v7981_v27 = vld [vmem:[#allocation4 + $0xbb8] ss:$20 sps:$4 sm:$0xff]  }
  0xfb   :  { %5433 = vmatprep.subr.bf16.mxu1 %v7944_v44  ;;  %v580_v15 = vrot.slane %v579_v8, 2  ;;  %v772_v54 = vadd.f32 %v771_v22, %v770_v12  ;;  %v7983_v44 = vld [vmem:[#allocation4 + $0xbbc] ss:$20 sps:$4 sm:$0xff]   ;;  %v1817_v59 = vunpack.c.l.b16 %v985_v37  ;;  %v7995_v62 = vld [vmem:[#allocation4 + $0xb6c] ss:$20 sps:$4 sm:$0xff]  }
  0xfc   :  { %5399 = vmatpush2.bf16.msra.mxu0 %v7957_v23  ;;  %v788_v14 = vrot.slane %v787_v25, 2  ;;  %5414 = vmatprep.mubr.bf16.mxu0 %v9450_v29  ;;  %v565_v28 = vrot.slane %v564_v36, 4  ;;  %v1001_v55 = vpack.c.bf16 %v868_v52, %v868_v52  ;;  %v7987_v50 = vld [vmem:[#allocation4 + $0xb90] ss:$20 sps:$4 sm:$0xff]   ;;  %v7972_v22 = vld [vmem:[#allocation4 + $0xe88] ss:$20 sps:$4 sm:$0xff]  }
  0xfd   :  { %5400 = vmatprep.subr.bf16.mxu0 %v7965_v7  ;;  %v581_v24 = vadd.f32 %v580_v15, %v579_v8  ;;  %v773_v41 = vrot.slane %v772_v54, 4  ;;  %v7980_v17 = vld [vmem:[#allocation4 + $0xe64] ss:$20 sps:$4 sm:$0xff]   ;;  %v9477_v52 = vld [vmem:[%s9833_s1 + $0xf0] sm:$0xff] }
  0xfe   :  { %5434 = vmatpush1.bf16.msra.mxu1 %v7942_v46  ;;  %v789_v16 = vadd.f32 %v788_v14, %v787_v25  ;;  %v566_v23 = vadd.f32 %v565_v28, %v564_v36  ;;  %v1833_v60 = vunpack.c.l.b16 %v1001_v55  ;;  %v97_v25 = vld [vmem:[%s9833_s1 + $0x30] sm:$0xff]  ;;  %v7993_v14 = vld [vmem:[#allocation4 + $0xb68] ss:$20 sps:$4 sm:$0xff]   ;;  %v8001_v36 = vld [vmem:[#allocation4 + $0xb44] ss:$20 sps:$4 sm:$0xff]  }
  0xff   :  { %5435 = vmatprep.subr.bf16.mxu1 %v7950_v1  ;;  %v582_v33 = vrot.slane %v581_v24, 1  ;;  %v774_v45 = vadd.f32 %v773_v41, %v772_v54  ;;  %v7978_v41 = vld [vmem:[#allocation4 + $0xe60] ss:$20 sps:$4 sm:$0xff]  }
 0x100   :  { %5401 = vmatpush2.bf16.msra.mxu0 %v7963_v57  ;;  %v790_v51 = vrot.slane %v789_v16, 1  ;;  %v567_v6 = vrot.slane %v566_v23, 2  ;;  %v1850_v39 = vsel %vm1841_vm1, %v1833_v60, %v1817_v59  ;;  %v9491_v37 = vld [vmem:[%s9833_s1 + $0x1b0] sm:$0x11]  ;;  %v7984_v60 = vld [vmem:[#allocation4 + $0xe38] ss:$20 sps:$4 sm:$0xff]  }
 0x101   :  { %5402 = vmatprep.subr.bf16.mxu0 %v7971_v11  ;;  %v583_v35 = vadd.f32 %v582_v33, %v581_v24  ;;  %v775_v21 = vrot.slane %v774_v45, 2  ;;  %v7974_v11 = vld [vmem:[#allocation4 + $0xe8c] ss:$20 sps:$4 sm:$0xff]   ;;  %v161_v24 = vld [vmem:[%s9833_s1 + $0x230] sm:$0xff]  ;;  %v9472_v54 = vpack.c.b16 %v1850_v39, %v1850_v39 }
 0x102   :  { %5436 = vmatpush1.bf16.msra.mxu1 %v7948_v2  ;;  %v791_v40 = vadd.f32 %v790_v51, %v789_v16  ;;  %v568_v46 = vadd.f32 %v567_v6, %v566_v23  ;;  %v105_v2 = vld [vmem:[%s9833_s1 + $0x70] sm:$0xff]  ;;  %v216_v16 = vunpack.c.h.bf16 %v97_v25  ;;  %v8005_v39 = vld [vmem:[#allocation4 + $0x1018] ss:$20 sps:$4 sm:$0xff]  }
 0x103   :  { %5437 = vmatprep.subr.bf16.mxu1 %v7956_v34  ;;  %v855_v7 = vmul.f32 0.020408163, %v583_v35  ;;  %v776_v13 = vadd.f32 %v775_v21, %v774_v45  ;;  %v169_v33 = vld [vmem:[%s9833_s1 + $0x270] sm:$0xff]  ;;  %v232_v28 = vunpack.c.h.bf16 %v105_v2  ;;  %v231_v35 = vunpack.c.l.bf16 %v105_v2 }
 0x104   :  { %5403 = vmatpush2.bf16.msra.mxu0 %v7969_v42  ;;  %v871_v20 = vmul.f32 0.020408163, %v791_v40  ;;  %v569_v8 = vrot.slane %v568_v46, 1  ;;  %v153_v42 = vld [vmem:[%s9833_s1 + $0x1f0] sm:$0xff]  ;;  %v248_v40 = vunpack.c.h.bf16 %v113_v18 }
 0x105   :  { %5404 = vmatprep.subr.bf16.mxu0 %v7977_v49  ;;  %v988_v61 = vpack.c.bf16 %v855_v7, %v855_v7  ;;  %v777_v31 = vrot.slane %v776_v13, 1  ;;  %v328_v51 = vunpack.c.h.bf16 %v153_v42  ;;  %v7999_v23 = vld [vmem:[#allocation4 + $0xb40] ss:$20 sps:$4 sm:$0xff]   ;;  %v327_v7 = vunpack.c.l.bf16 %v153_v42  ;;  %v8007_v6 = vld [vmem:[#allocation4 + $0x101c] ss:$20 sps:$4 sm:$0xff]  }
 0x106   :  { %5438 = vmatpush1.bf16.msra.mxu1 %v7954_v30  ;;  %v1004_v4 = vpack.c.bf16 %v871_v20, %v871_v20  ;;  %v570_v19 = vadd.f32 %v569_v8, %v568_v46  ;;  %v9486_v30 = vld [vmem:[%s9833_s1 + $0x130] sm:$0xff]  ;;  %v360_v20 = vunpack.c.h.bf16 %v169_v33  ;;  %v597_v59 = vadd.f32 %v232_v28, %v216_v16  ;;  %v7998_v28 = vld [vmem:[#allocation4 + $0xdec] ss:$20 sps:$4 sm:$0xff]  }
 0x107   :  { %5439 = vmatprep.subr.bf16.mxu1 %v7962_v58  ;;  %v1820_v57 = vunpack.c.l.b16 %v988_v61  ;;  %v778_v0 = vadd.f32 %v777_v31, %v776_v13  ;;  %v344_v58 = vunpack.c.h.bf16 %v161_v24  ;;  %v9496_v55 = vld [vmem:[%s9833_s1 + $0x2b0] sm:$0xff]  ;;  %v280_v46 = vunpack.c.h.bf16 %v9486_v30 }
 0x108   :  { %5405 = vmatpush2.bf16.msra.mxu0 %v7975_v9  ;;  %v1836_v1 = vunpack.c.l.b16 %v1004_v4  ;;  %v854_v34 = vmul.f32 0.020408163, %v570_v19  ;;  %v215_v9 = vunpack.c.l.bf16 %v97_v25  ;;  %v9502_v61 = vld [vmem:[%s9833_s1 + $0x2f0] sm:$0xff]  ;;  %v359_v13 = vunpack.c.l.bf16 %v169_v33 }
 0x109   :  { %5406 = vmatprep.subr.bf16.mxu0 %v7983_v44  ;;  %v870_v49 = vmul.f32 0.020408163, %v778_v0  ;;  %v7986_v44 = vld [vmem:[#allocation4 + $0xe3c] ss:$20 sps:$4 sm:$0xff]   ;;  %v312_v8 = vunpack.c.h.bf16 %v9491_v37  ;;  %v376_v31 = vunpack.c.h.bf16 %v9496_v55  ;;  %v598_v19 = vadd.f32 %v597_v59, %v248_v40 }
 0x10a   :  { %5440 = vmatpush2.bf16.msra.mxu1 %v7960_v38  ;;  %v1853_v15 = vsel %vm1841_vm1, %v1836_v1, %v1820_v57  ;;  %v987_v45 = vpack.c.bf16 %v854_v34, %v854_v34  ;;  %v343_v38 = vunpack.c.l.bf16 %v161_v24  ;;  %v9509_v4 = vld [vmem:[%s9833_s1 + $0x170] sm:$0xff]  ;;  %v392_v25 = vunpack.c.h.bf16 %v9502_v61 }
 0x10b   :  { %5441 = vmatprep.subr.bf16.mxu1 %v7968_v47  ;;  %v9461_v12 = vpack.c.b16 %v1853_v15, %v1853_v15  ;;  %v1003_v21 = vpack.c.bf16 %v870_v49, %v870_v49  ;;  %v247_v47 = vunpack.c.l.bf16 %v113_v18  ;;  %v9514_v57 = vld [vmem:[%s9833_s1 + $0x370] sm:$0x11]  ;;  %v296_v42 = vunpack.c.h.bf16 %v9509_v4 }
 0x10c   :  { %5407 = vmatpush2.bf16.msra.mxu0 %v7981_v27  ;;  %v263_v27 = vunpack.c.l.bf16 %v9477_v52  ;;  %v1819_v1 = vunpack.c.l.b16 %v987_v45  ;;  %v792_v0 = vadd.f32 %v343_v38, %v327_v7  ;;  %v8013_v34 = vld [vmem:[#allocation4 + $0xff4] ss:$20 sps:$4 sm:$0xff]   ;;  %v424_v24 = vunpack.c.h.bf16 %v9514_v57  ;;  %v7990_v18 = vld [vmem:[#allocation4 + $0xe10] ss:$20 sps:$4 sm:$0xff]   ;;  %v9539_v7 = vld [vmem:[%s9833_s1 + $0x38] sm:$0xff] }
 0x10d   :  { %5408 = vmatprep.subr.bf16.mxu0 %v7989_v32  ;;  %5455 = vmatprep.mubr.bf16.mxu1 %v9461_v12  ;;  %v264_v32 = vunpack.c.h.bf16 %v9477_v52  ;;  %v1835_v15 = vunpack.c.l.b16 %v1003_v21  ;;  %v311_v52 = vunpack.c.l.bf16 %v9491_v37  ;;  %v7996_v38 = vld [vmem:[#allocation4 + $0xde8] ss:$20 sps:$4 sm:$0xff]   ;;  %v295_v21 = vunpack.c.l.bf16 %v9509_v4 }
 0x10e   :  { %5442 = vmatpush2.bf16.msra.mxu1 %v7966_v3  ;;  %v805_v3 = vadd.f32 %v344_v58, %v328_v51  ;;  %v793_v49 = vadd.f32 %v792_v0, %v359_v13  ;;  %v810_v40 = vsel %vm432_vm0, %v424_v24, 0.0  ;;  %v8025_v13 = vld [vmem:[#allocation4 + $0xfa4] ss:$20 sps:$4 sm:$0xff]   ;;  %v218_v0 = vunpack.c.h.bf16 %v9539_v7 }
 0x10f   :  { %5443 = vmatprep.subr.bf16.mxu1 %v7974_v11  ;;  %v9521_v11 = vld [vmem:[%s9833_s1 + $0x330] sm:$0xff]  ;;  %v589_v4 = vsel %vm432_vm0, %v311_v52, 0.0 }
 0x110   :  { %5409 = vmatpush2.bf16.msra.mxu0 %v7987_v50  ;;  %v584_v50 = vadd.f32 %v231_v35, %v215_v9  ;;  %v806_v2 = vadd.f32 %v805_v3, %v360_v20  ;;  %v408_v33 = vunpack.c.h.bf16 %v9521_v11  ;;  %v391_v9 = vunpack.c.l.bf16 %v9502_v61  ;;  %v9546_v20 = vld [vmem:[%s9833_s1 + $0x78] sm:$0xff] }
 0x111   :  { %5410 = vmatprep.subr.bf16.mxu0 %v7995_v62  ;;  %v375_v62 = vunpack.c.l.bf16 %v9496_v55  ;;  %v423_v35 = vunpack.c.l.bf16 %v9514_v57  ;;  %v9551_v61 = vld [vmem:[%s9833_s1 + $0xb8] sm:$0xff] }
 0x112   :  { %5444 = vmatpush2.bf16.msra.mxu1 %v7972_v22  ;;  %v7992_v22 = vld [vmem:[#allocation4 + $0xe14] ss:$20 sps:$4 sm:$0xff]   ;;  %v807_v16 = vadd.f32 %v806_v2, %v376_v31  ;;  %v9559_v57 = vld [vmem:[%s9833_s1 + $0xf8] sm:$0xff]  ;;  %v250_v24 = vunpack.c.h.bf16 %v9551_v61 }
 0x113   :  { %5445 = vmatprep.subr.bf16.mxu1 %v7980_v17  ;;  %v585_v17 = vadd.f32 %v584_v50, %v247_v47  ;;  %v794_v37 = vadd.f32 %v793_v49, %v375_v62  ;;  %v407_v47 = vunpack.c.l.bf16 %v9521_v11  ;;  %v797_v50 = vsel %vm432_vm0, %v423_v35, 0.0  ;;  %v9584_v2 = vld [vmem:[%s9833_s1 + $0x178] sm:$0xff]  ;;  %v8023_v49 = vld [vmem:[#allocation4 + $0xfa0] ss:$20 sps:$4 sm:$0xff]  }
 0x114   :  { %5411 = vmatpush2.bf16.msra.mxu0 %v7993_v14  ;;  %v599_v14 = vadd.f32 %v598_v19, %v264_v32  ;;  %v808_v45 = vadd.f32 %v807_v16, %v392_v25  ;;  %v8004_v32 = vld [vmem:[#allocation4 + $0xdc4] ss:$20 sps:$4 sm:$0xff]   ;;  %v217_v11 = vunpack.c.l.bf16 %v9539_v7 }
 0x115   :  { %5412 = vmatprep.subr.bf16.mxu0 %v8001_v36  ;;  %v279_v36 = vunpack.c.l.bf16 %v9486_v30  ;;  %v586_v58 = vadd.f32 %v585_v17, %v263_v27  ;;  %v8019_v30 = vld [vmem:[#allocation4 + $0xfcc] ss:$20 sps:$4 sm:$0xff]   ;;  %v795_v3 = vadd.f32 %v794_v37, %v391_v9  ;;  %v9576_v19 = vld [vmem:[%s9833_s1 + $0x138] sm:$0xff]  ;;  %v266_v9 = vunpack.c.h.bf16 %v9559_v57 }
 0x116   :  { %5446 = vmatpush2.bf16.msra.mxu1 %v7978_v41  ;;  %v8011_v41 = vld [vmem:[#allocation4 + $0xff0] ss:$20 sps:$4 sm:$0xff]   ;;  %v600_v51 = vadd.f32 %v599_v14, %v280_v46  ;;  %v809_v27 = vadd.f32 %v808_v45, %v408_v33  ;;  %v9589_v17 = vld [vmem:[%s9833_s1 + $0x1b8] sm:$0x11]  ;;  %v265_v14 = vunpack.c.l.bf16 %v9559_v57  ;;  %v282_v35 = vunpack.c.h.bf16 %v9576_v19  ;;  %v8026_v57 = vld [vmem:[#allocation4 + $0x1220] ss:$20 sps:$4 sm:$0xff]  }
 0x117   :  { %5447 = vmatprep.subr.bf16.mxu1 %v7986_v44  ;;  %v1852_v44 = vsel %vm1841_vm1, %v1835_v15, %v1819_v1  ;;  %v9570_v1 = vld [vmem:[%s9833_s1 + $0x238] sm:$0xff]  ;;  %v8002_v15 = vld [vmem:[#allocation4 + $0xdc0] ss:$20 sps:$4 sm:$0xff]  }
 0x118   :  { %5413 = vmatpush2.bf16.msra.mxu0 %v7999_v23  ;;  %v602_v23 = vsel %vm432_vm0, %v312_v8, 0.0  ;;  %v601_v55 = vadd.f32 %v600_v51, %v296_v42  ;;  %v9553_v46 = vpack.c.b16 %v1852_v44, %v1852_v44  ;;  %v9564_v8 = vld [vmem:[%s9833_s1 + $0x1f8] sm:$0xff]  ;;  %v811_v31 = vadd.f32 %v810_v40, %v809_v27 }
 0x119   :  { %5464 = vmatprep.subr.bf16.mxu0 %v8007_v6  ;;  %v8017_v6 = vld [vmem:[#allocation4 + $0xfc8] ss:$20 sps:$4 sm:$0xff]   ;;  %v249_v42 = vunpack.c.l.bf16 %v9551_v61  ;;  %v330_v52 = vunpack.c.h.bf16 %v9564_v8  ;;  %v346_v33 = vunpack.c.h.bf16 %v9570_v1  ;;  %v8008_v37 = vld [vmem:[#allocation4 + $0x1298] ss:$20 sps:$4 sm:$0xff]   ;;  %v329_v7 = vunpack.c.l.bf16 %v9564_v8 }
 0x11a   :  { %5448 = vmatpush2.bf16.msra.mxu1 %v7984_v60  ;;  %v603_v59 = vadd.f32 %v602_v23, %v601_v55  ;;  %v587_v60 = vadd.f32 %v586_v58, %v279_v36  ;;  %v812_v25 = vrot.slane %v811_v31, 4  ;;  %v8010_v51 = vld [vmem:[#allocation4 + $0x129c] ss:$20 sps:$4 sm:$0xff]   ;;  %v314_v23 = vunpack.c.h.bf16 %v9589_v17 }
 0x11b   :  { %5415 = vmatmul.mubr.bf16.vlgmr.msra.gmra.mxu0 %v9472_v54  ;;  %5449 = vmatprep.subr.bf16.mxu1 %v7992_v22  ;;  %v233_v22 = vunpack.c.l.bf16 %v9546_v20  ;;  %v8031_v58 = vld [vmem:[#allocation4 + $0xf7c] ss:$20 sps:$4 sm:$0xff]   ;;  %v831_v61 = vadd.f32 %v346_v33, %v330_v52 }
 0x11c   :  { %5465 = vmatpush1.bf16.msra.mxu0 %v8005_v39  ;;  %v604_v62 = vrot.slane %v603_v59, 4  ;;  %v234_v39 = vunpack.c.h.bf16 %v9546_v20  ;;  %v588_v36 = vadd.f32 %v587_v60, %v295_v21  ;;  %v813_v16 = vadd.f32 %v812_v25, %v811_v31  ;;  %v9614_v40 = vld [vmem:[%s9833_s1 + $0x2f8] sm:$0xff]  ;;  %v8016_v31 = vld [vmem:[#allocation4 + $0x1274] ss:$20 sps:$4 sm:$0xff]  }
 0x11d   :  { %5466 = vmatprep.subr.bf16.mxu0 %v8013_v34  ;;  %v9594_v34 = vld [vmem:[%s9833_s1 + $0x278] sm:$0xff] }
 0x11e   :  { %5450 = vmatpush2.bf16.msra.mxu1 %v7990_v18  ;;  %v605_v18 = vadd.f32 %v604_v62, %v603_v59  ;;  %v362_v45 = vunpack.c.h.bf16 %v9594_v34  ;;  %v814_v55 = vrot.slane %v813_v16, 2  ;;  %v9623_v27 = vld [vmem:[%s9833_s1 + $0x378] sm:$0x11]  ;;  %v394_v62 = vunpack.c.h.bf16 %v9614_v40 }
 0x11f   :  { %5451 = vmatprep.subr.bf16.mxu1 %v7998_v28  ;;  %v796_v28 = vadd.f32 %v795_v3, %v407_v47  ;;  %v9618_v47 = vadd.f32 %v589_v4, %v588_v36  ;;  %v9631_v60 = vld [vmem:[%s9833_s1 + $0x338] sm:$0xff]  ;;  %v361_v4 = vunpack.c.l.bf16 %v9594_v34  ;;  %v8037_v3 = vld [vmem:[#allocation4 + $0xf54] ss:$20 sps:$4 sm:$0xff]   ;;  %v426_v25 = vunpack.c.h.bf16 %v9623_v27  ;;  %v8022_v36 = vld [vmem:[#allocation4 + $0x124c] ss:$20 sps:$4 sm:$0xff]  }
 0x120   :  { %5467 = vmatpush1.bf16.msra.mxu0 %v8011_v41  ;;  %v9604_v41 = vld [vmem:[%s9833_s1 + $0x2b8] sm:$0xff]  ;;  %v606_v44 = vrot.slane %v605_v18, 2 }
 0x121   :  { %5468 = vmatprep.subr.bf16.mxu0 %v8019_v30  ;;  %v298_v30 = vunpack.c.h.bf16 %v9584_v2  ;;  %v378_v20 = vunpack.c.h.bf16 %v9604_v41  ;;  %v9626_v59 = vadd.f32 %v797_v50, %v796_v28  ;;  %v8043_v28 = vld [vmem:[#allocation4 + $0xf2c] ss:$20 sps:$4 sm:$0xff]  }
 0x122   :  { %5452 = vmatpush2.bf16.msra.mxu1 %v7996_v38  ;;  %v345_v38 = vunpack.c.l.bf16 %v9570_v1  ;;  %v607_v21 = vadd.f32 %v606_v44, %v605_v18  ;;  %v377_v44 = vunpack.c.l.bf16 %v9604_v41  ;;  %v8041_v41 = vld [vmem:[#allocation4 + $0xf28] ss:$20 sps:$4 sm:$0xff]  }
 0x123   :  { %5453 = vmatprep.subr.bf16.mxu1 %v8004_v32  ;;  %v8029_v32 = vld [vmem:[#allocation4 + $0xf78] ss:$20 sps:$4 sm:$0xff]  }
 0x124   :  { %5469 = vmatpush1.bf16.msra.mxu0 %v8017_v6  ;;  %v623_v6 = vadd.f32 %v234_v39, %v218_v0  ;;  %v608_v1 = vrot.slane %v607_v21, 1  ;;  %v832_v0 = vadd.f32 %v831_v61, %v362_v45  ;;  %v610_v39 = vadd.f32 %v233_v22, %v217_v11 }
 0x125   :  { %5470 = vmatprep.subr.bf16.mxu0 %v8025_v13  ;;  %v815_v13 = vadd.f32 %v814_v55, %v813_v16  ;;  %v818_v18 = vadd.f32 %v345_v38, %v329_v7  ;;  %v8035_v16 = vld [vmem:[#allocation4 + $0xf50] ss:$20 sps:$4 sm:$0xff]   ;;  %v591_v11 = vrot.slane %v9618_v47, 4  ;;  %v281_v22 = vunpack.c.l.bf16 %v9576_v19 }
 0x126   :  { %5454 = vmatpush2.bf16.msra.mxu1 %v8002_v15  ;;  %v624_v8 = vadd.f32 %v623_v6, %v250_v24  ;;  %v8014_v15 = vld [vmem:[#allocation4 + $0x1270] ss:$20 sps:$4 sm:$0xff]   ;;  %v609_v34 = vadd.f32 %v608_v1, %v607_v21  ;;  %v410_v24 = vunpack.c.h.bf16 %v9631_v60  ;;  %v833_v52 = vadd.f32 %v832_v0, %v378_v20  ;;  %v8020_v6 = vld [vmem:[#allocation4 + $0x1248] ss:$20 sps:$4 sm:$0xff]  }
 0x127   :  { %5505 = vmatprep.subr.bf16.mxu1 %v8010_v51  ;;  %v816_v50 = vrot.slane %v815_v13, 1  ;;  %v611_v33 = vadd.f32 %v610_v39, %v249_v42  ;;  %v628_v45 = vsel %vm432_vm0, %v314_v23, 0.0  ;;  %v819_v38 = vadd.f32 %v818_v18, %v361_v4 }
 0x128   :  { %5471 = vmatpush1.bf16.msra.mxu0 %v8023_v49  ;;  %v625_v49 = vadd.f32 %v624_v8, %v266_v9  ;;  %v857_v9 = vmul.f32 0.020408163, %v609_v34  ;;  %v834_v55 = vadd.f32 %v833_v52, %v394_v62  ;;  %v799_v20 = vrot.slane %v9626_v59, 4  ;;  %v8032_v52 = vld [vmem:[#allocation4 + $0x11f8] ss:$20 sps:$4 sm:$0xff]  }
 0x129   :  { %5472 = vmatprep.subr.bf16.mxu0 %v8031_v58  ;;  %5456 = vmatmul.mubr.bf16.vlgmr.msra.gmra.mxu1 %v9553_v46  ;;  %v817_v51 = vadd.f32 %v816_v50, %v815_v13  ;;  %v612_v19 = vadd.f32 %v611_v33, %v265_v14  ;;  %v393_v23 = vunpack.c.l.bf16 %v9614_v40  ;;  %v820_v62 = vadd.f32 %v819_v38, %v377_v44  ;;  %v8034_v14 = vld [vmem:[#allocation4 + $0x11fc] ss:$20 sps:$4 sm:$0xff]   ;;  %v8047_v40 = vld [vmem:[#allocation4 + $0xf00] ss:$20 sps:$4 sm:$0xff]  }
 0x12a   :  { %5506 = vmatpush1.bf16.msra.mxu1 %v8008_v37  ;;  %v626_v58 = vadd.f32 %v625_v49, %v282_v35  ;;  %v836_v37 = vsel %vm432_vm0, %v426_v25, 0.0  ;;  %v990_v21 = vpack.c.bf16 %v857_v9, %v857_v9  ;;  %v835_v61 = vadd.f32 %v834_v55, %v410_v24  ;;  %v8028_v35 = vld [vmem:[#allocation4 + $0x1224] ss:$20 sps:$4 sm:$0xff]  }
 0x12b   :  { %5507 = vmatprep.subr.bf16.mxu1 %v8016_v31  ;;  %v873_v7 = vmul.f32 0.020408163, %v817_v51  ;;  %v592_v0 = vadd.f32 %v591_v11, %v9618_v47  ;;  %v800_v39 = vadd.f32 %v799_v20, %v9626_v59  ;;  %v613_v50 = vadd.f32 %v612_v19, %v281_v22  ;;  %v8053_v11 = vld [vmem:[#allocation4 + $0x1158] ss:$20 sps:$4 sm:$0xff]  }
 0x12c   :  { %5473 = vmatpush1.bf16.msra.mxu0 %v8029_v32  ;;  %v627_v42 = vadd.f32 %v626_v58, %v298_v30  ;;  %v8049_v30 = vld [vmem:[#allocation4 + $0xf04] ss:$20 sps:$4 sm:$0xff]   ;;  %v1822_v4 = vunpack.c.l.b16 %v990_v21  ;;  %v837_v8 = vadd.f32 %v836_v37, %v835_v61  ;;  %v409_v49 = vunpack.c.l.bf16 %v9631_v60  ;;  %v8046_v19 = vld [vmem:[#allocation4 + $0x11ac] ss:$20 sps:$4 sm:$0xff]  }
 0x12d   :  { %5474 = vmatprep.subr.bf16.mxu0 %v8037_v3  ;;  %v1006_v32 = vpack.c.bf16 %v873_v7, %v873_v7  ;;  %v297_v3 = vunpack.c.l.bf16 %v9584_v2  ;;  %v8055_v2 = vld [vmem:[#allocation4 + $0x115c] ss:$20 sps:$4 sm:$0xff]   ;;  %v313_v47 = vunpack.c.l.bf16 %v9589_v17  ;;  %v425_v59 = vunpack.c.l.bf16 %v9623_v27  ;;  %v8061_v17 = vld [vmem:[#allocation4 + $0x1134] ss:$20 sps:$4 sm:$0xff]  }
 0x12e   :  { %5508 = vmatpush1.bf16.msra.mxu1 %v8014_v15  ;;  %v629_v13 = vadd.f32 %v628_v45, %v627_v42  ;;  %v838_v15 = vrot.slane %v837_v8, 4  ;;  %v801_v51 = vrot.slane %v800_v39, 2  ;;  %v8038_v7 = vld [vmem:[#allocation4 + $0x11d0] ss:$20 sps:$4 sm:$0xff]  }
 0x12f   :  { %5509 = vmatprep.subr.bf16.mxu1 %v8022_v36  ;;  %v1838_v31 = vunpack.c.l.b16 %v1006_v32  ;;  %v821_v36 = vadd.f32 %v820_v62, %v393_v23  ;;  %v614_v58 = vadd.f32 %v613_v50, %v297_v3  ;;  %v615_v27 = vsel %vm432_vm0, %v313_v47, 0.0  ;;  %v8044_v32 = vld [vmem:[#allocation4 + $0x11a8] ss:$20 sps:$4 sm:$0xff]   ;;  %v8050_v50 = vld [vmem:[#allocation4 + $0x1180] ss:$20 sps:$4 sm:$0xff]  }
 0x130   :  { %5475 = vmatpush1.bf16.msra.mxu0 %v8035_v16  ;;  %v630_v1 = vrot.slane %v629_v13, 4  ;;  %v839_v24 = vadd.f32 %v838_v15, %v837_v8  ;;  %v8040_v16 = vld [vmem:[#allocation4 + $0x11d4] ss:$20 sps:$4 sm:$0xff]   ;;  %v823_v45 = vsel %vm432_vm0, %v425_v59, 0.0  ;;  %v802_v37 = vadd.f32 %v801_v51, %v800_v39  ;;  %v8056_v59 = vld [vmem:[#allocation4 + $0x13d8] ss:$20 sps:$4 sm:$0xff]  }
 0x131   :  { %5476 = vmatprep.subr.bf16.mxu0 %v8043_v28  ;;  %v1855_v25 = vsel %vm1841_vm1, %v1838_v31, %v1822_v4  ;;  %v593_v28 = vrot.slane %v592_v0, 2  ;;  %v822_v9 = vadd.f32 %v821_v36, %v409_v49  ;;  %v616_v20 = vadd.f32 %v615_v27, %v614_v58  ;;  %v8065_v8 = vld [vmem:[#allocation4 + $0x1108] ss:$20 sps:$4 sm:$0xff]   ;;  %v8062_v58 = vld [vmem:[#allocation4 + $0x13b0] ss:$20 sps:$4 sm:$0xff]  }
 0x132   :  { %5510 = vmatpush1.bf16.msra.mxu1 %v8020_v6  ;;  %v631_v18 = vadd.f32 %v630_v1, %v629_v13  ;;  %v9652_v34 = vpack.c.b16 %v1855_v25, %v1855_v25  ;;  %v840_v60 = vrot.slane %v839_v24, 2  ;;  %v8059_v6 = vld [vmem:[#allocation4 + $0x1130] ss:$20 sps:$4 sm:$0xff]   ;;  %v803_v31 = vrot.slane %v802_v37, 1 }
 0x133   :  { %5511 = vmatprep.subr.bf16.mxu1 %v8028_v35  ;;  %v594_v42 = vadd.f32 %v593_v28, %v592_v0  ;;  %v824_v61 = vadd.f32 %v823_v45, %v822_v9  ;;  %v8067_v35 = vld [vmem:[#allocation4 + $0x110c] ss:$20 sps:$4 sm:$0xff]   ;;  %v8052_v13 = vld [vmem:[#allocation4 + $0x1184] ss:$20 sps:$4 sm:$0xff]   ;;  %v617_v1 = vrot.slane %v616_v20, 4 }
 0x134   :  { %5477 = vmatpush1.bf16.msra.mxu0 %v8041_v41  ;;  %v632_v33 = vrot.slane %v631_v18, 2  ;;  %5496 = vmatprep.mubr.bf16.mxu0 %v9652_v34  ;;  %v841_v44 = vadd.f32 %v840_v60, %v839_v24  ;;  %v804_v25 = vadd.f32 %v803_v31, %v802_v37  ;;  %v8058_v36 = vld [vmem:[#allocation4 + $0x13dc] ss:$20 sps:$4 sm:$0xff]   ;;  %v8064_v60 = vld [vmem:[#allocation4 + $0x13b4] ss:$20 sps:$4 sm:$0xff]  }
 0x135   :  { %5478 = vmatprep.subr.bf16.mxu0 %v8049_v30  ;;  %v595_v30 = vrot.slane %v594_v42, 1  ;;  %v825_v62 = vrot.slane %v824_v61, 4  ;;  %v618_v49 = vadd.f32 %v617_v1, %v616_v20  ;;  %v8083_v9 = vld [vmem:[#allocation4 + $0x1090] ss:$20 sps:$4 sm:$0xff]   ;;  %v8070_v45 = vld [vmem:[#allocation4 + $0x138c] ss:$20 sps:$4 sm:$0xff]  }
 0x136   :  { %5512 = vmatpush1.bf16.msra.mxu1 %v8026_v57  ;;  %v633_v22 = vadd.f32 %v632_v33, %v631_v18  ;;  %v842_v38 = vrot.slane %v841_v44, 1  ;;  %v8073_v57 = vld [vmem:[#allocation4 + $0x10e4] ss:$20 sps:$4 sm:$0xff]   ;;  %v8101_v31 = vld [vmem:[#allocation4 + $0x120] ss:$20 sps:$4 sm:$0xff]  }
 0x137   :  { %5513 = vmatprep.subr.bf16.mxu1 %v8034_v14  ;;  %v596_v39 = vadd.f32 %v595_v30, %v594_v42  ;;  %v826_v18 = vadd.f32 %v825_v62, %v824_v61  ;;  %v619_v28 = vrot.slane %v618_v49, 2  ;;  %v8089_v42 = vld [vmem:[#allocation4 + $0x1068] ss:$20 sps:$4 sm:$0xff]   ;;  %v8076_v20 = vld [vmem:[#allocation4 + $0x1364] ss:$20 sps:$4 sm:$0xff]  }
 0x138   :  { %5479 = vmatpush1.bf16.msra.mxu0 %v8047_v40  ;;  %v634_v55 = vrot.slane %v633_v22, 1  ;;  %v843_v41 = vadd.f32 %v842_v38, %v841_v44  ;;  %v8071_v40 = vld [vmem:[#allocation4 + $0x10e0] ss:$20 sps:$4 sm:$0xff]   ;;  %v8097_v61 = vld [vmem:[#allocation4 + $0x1044] ss:$20 sps:$4 sm:$0xff]  }
 0x139   :  { %5480 = vmatprep.subr.bf16.mxu0 %v8055_v2  ;;  %v8079_v2 = vld [vmem:[#allocation4 + $0x10bc] ss:$20 sps:$4 sm:$0xff]   ;;  %v856_v33 = vmul.f32 0.020408163, %v596_v39  ;;  %v827_v51 = vrot.slane %v826_v18, 2  ;;  %v620_v44 = vadd.f32 %v619_v28, %v618_v49 }
 0x13a   :  { %5514 = vmatpush1.bf16.msra.mxu1 %v8032_v52  ;;  %v635_v21 = vadd.f32 %v634_v55, %v633_v22  ;;  %v875_v4 = vmul.f32 0.020408163, %v843_v41  ;;  %v8077_v52 = vld [vmem:[#allocation4 + $0x10b8] ss:$20 sps:$4 sm:$0xff]   ;;  %v8088_v62 = vld [vmem:[#allocation4 + $0x1314] ss:$20 sps:$4 sm:$0xff]  }
 0x13b   :  { %5515 = vmatprep.subr.bf16.mxu1 %v8040_v16  ;;  %v872_v16 = vmul.f32 0.020408163, %v804_v25  ;;  %v989_v22 = vpack.c.bf16 %v856_v33, %v856_v33  ;;  %v828_v27 = vadd.f32 %v827_v51, %v826_v18  ;;  %v8091_v55 = vld [vmem:[#allocation4 + $0x106c] ss:$20 sps:$4 sm:$0xff]   ;;  %v8103_v30 = vld [vmem:[#allocation4 + $0x124] ss:$20 sps:$4 sm:$0xff]  }
 0x13c   :  { %5481 = vmatpush2.bf16.msra.mxu0 %v8053_v11  ;;  %v859_v23 = vmul.f32 0.020408163, %v635_v21  ;;  %v1008_v14 = vpack.c.bf16 %v875_v4, %v875_v4  ;;  %v8085_v11 = vld [vmem:[#allocation4 + $0x1094] ss:$20 sps:$4 sm:$0xff]   ;;  %v8080_v4 = vld [vmem:[#allocation4 + $0x1338] ss:$20 sps:$4 sm:$0xff]  }
 0x13d   :  { %5482 = vmatprep.subr.bf16.mxu0 %v8061_v17  ;;  %v1005_v17 = vpack.c.bf16 %v872_v16, %v872_v16  ;;  %v1821_v37 = vunpack.c.l.b16 %v989_v22  ;;  %v829_v21 = vrot.slane %v828_v27, 1  ;;  %v8115_v49 = vld [vmem:[#allocation4 + $0xd4] ss:$20 sps:$4 sm:$0xff]   ;;  %v8121_v16 = vld [vmem:[#allocation4 + $0xac] ss:$20 sps:$4 sm:$0xff]  }
 0x13e   :  { %5516 = vmatpush1.bf16.msra.mxu1 %v8038_v7  ;;  %v992_v3 = vpack.c.bf16 %v859_v23, %v859_v23  ;;  %v1840_v15 = vunpack.c.l.b16 %v1008_v14  ;;  %v8068_v7 = vld [vmem:[#allocation4 + $0x1388] ss:$20 sps:$4 sm:$0xff]   ;;  %v8098_v28 = vld [vmem:[#allocation4 + $0x12c0] ss:$20 sps:$4 sm:$0xff]   ;;  %v8127_v22 = vld [vmem:[#allocation4 + $0x84] ss:$20 sps:$4 sm:$0xff]  }
 0x13f   :  { %5517 = vmatprep.subr.bf16.mxu1 %v8046_v19  ;;  %v1837_v38 = vunpack.c.l.b16 %v1005_v17  ;;  %v8074_v19 = vld [vmem:[#allocation4 + $0x1360] ss:$20 sps:$4 sm:$0xff]   ;;  %v830_v23 = vadd.f32 %v829_v21, %v828_v27  ;;  %v8133_v27 = vld [vmem:[#allocation4 + $0x5c] ss:$20 sps:$4 sm:$0xff]  }
 0x140   :  { %5483 = vmatpush2.bf16.msra.mxu0 %v8059_v6  ;;  %v1824_v0 = vunpack.c.l.b16 %v992_v3  ;;  %v621_v6 = vrot.slane %v620_v44, 1  ;;  %v8125_v17 = vld [vmem:[#allocation4 + $0x80] ss:$20 sps:$4 sm:$0xff]  }
 0x141   :  { %5484 = vmatprep.subr.bf16.mxu0 %v8067_v35  ;;  %v8095_v35 = vld [vmem:[#allocation4 + $0x1040] ss:$20 sps:$4 sm:$0xff]   ;;  %v1854_v41 = vsel %vm1841_vm1, %v1837_v38, %v1821_v37  ;;  %v874_v1 = vmul.f32 0.020408163, %v830_v23  ;;  %v8122_v23 = vld [vmem:[#allocation4 + $0x328] ss:$20 sps:$4 sm:$0xff]  }
 0x142   :  { %5518 = vmatpush1.bf16.msra.mxu1 %v8044_v32  ;;  %v1857_v47 = vsel %vm1841_vm1, %v1840_v15, %v1824_v0  ;;  %v622_v32 = vadd.f32 %v621_v6, %v620_v44  ;;  %v8086_v0 = vld [vmem:[#allocation4 + $0x1310] ss:$20 sps:$4 sm:$0xff]   ;;  %v8118_v38 = vld [vmem:[#allocation4 + $0x354] ss:$20 sps:$4 sm:$0xff]  }
 0x143   :  { %5519 = vmatprep.subr.bf16.mxu1 %v8052_v13  ;;  %v9660_v24 = vpack.c.b16 %v1857_v47, %v1857_v47  ;;  %v8082_v13 = vld [vmem:[#allocation4 + $0x133c] ss:$20 sps:$4 sm:$0xff]   ;;  %v1007_v15 = vpack.c.bf16 %v874_v1, %v874_v1  ;;  %v8139_v6 = vld [vmem:[#allocation4 + $0x34] ss:$20 sps:$4 sm:$0xff]  }
 0x144   :  { %5485 = vmatpush2.bf16.msra.mxu0 %v8065_v8  ;;  %v9664_v8 = vpack.c.b16 %v1854_v41, %v1854_v41  ;;  %v858_v3 = vmul.f32 0.020408163, %v622_v32  ;;  %v8112_v44 = vld [vmem:[#allocation4 + $0x37c] ss:$20 sps:$4 sm:$0xff]   ;;  %v8145_v41 = vld [vmem:[#allocation4 + $0xc] ss:$20 sps:$4 sm:$0xff]  }
 0x145   :  { %5486 = vmatprep.subr.bf16.mxu0 %v8073_v57  ;;  %5537 = vmatprep.mubr.bf16.mxu1 %v9660_v24  ;;  %v8109_v57 = vld [vmem:[#allocation4 + $0xfc] ss:$20 sps:$4 sm:$0xff]   ;;  %v1839_v47 = vunpack.c.l.b16 %v1007_v15  ;;  %v8149_v1 = vld [vmem:[#allocation4 + $0x260] ss:$20 sps:$4 sm:$0xff]  }
 0x146   :  { %5520 = vmatpush1.bf16.msra.mxu1 %v8050_v50  ;;  %v991_v39 = vpack.c.bf16 %v858_v3, %v858_v3  ;;  %v8107_v50 = vld [vmem:[#allocation4 + $0xf8] ss:$20 sps:$4 sm:$0xff]   ;;  %v8136_v3 = vld [vmem:[#allocation4 + $0x2dc] ss:$20 sps:$4 sm:$0xff]  }
 0x147   :  { %5521 = vmatprep.subr.bf16.mxu1 %v8058_v36  ;;  %v8092_v36 = vld [vmem:[#allocation4 + $0x12e8] ss:$20 sps:$4 sm:$0xff]   ;;  %v8140_v15 = vld [vmem:[#allocation4 + $0x2b0] ss:$20 sps:$4 sm:$0xff]  }
 0x148   :  { %5487 = vmatpush2.bf16.msra.mxu0 %v8071_v40  ;;  %v8094_v40 = vld [vmem:[#allocation4 + $0x12ec] ss:$20 sps:$4 sm:$0xff]  }
 0x149   :  { %5488 = vmatprep.subr.bf16.mxu0 %v8079_v2  ;;  %v1823_v2 = vunpack.c.l.b16 %v991_v39  ;;  %v8163_v39 = vld [vmem:[#allocation4 + $0x214] ss:$20 sps:$4 sm:$0xff]  }
 0x14a   :  { %5522 = vmatpush2.bf16.msra.mxu1 %v8056_v59  ;;  %v8113_v59 = vld [vmem:[#allocation4 + $0xd0] ss:$20 sps:$4 sm:$0xff]  }
 0x14b   :  { %5523 = vmatprep.subr.bf16.mxu1 %v8064_v60  ;;  %v1856_v51 = vsel %vm1841_vm1, %v1839_v47, %v1823_v2  ;;  %v8119_v60 = vld [vmem:[#allocation4 + $0xa8] ss:$20 sps:$4 sm:$0xff]   ;;  %v8175_v2 = vld [vmem:[#allocation4 + $0x1c4] ss:$20 sps:$4 sm:$0xff]   ;;  %v8152_v47 = vld [vmem:[#allocation4 + $0x4e0] ss:$20 sps:$4 sm:$0xff]  }
 0x14c   :  { %5489 = vmatpush2.bf16.msra.mxu0 %v8077_v52  ;;  %v8100_v52 = vld [vmem:[#allocation4 + $0x12c4] ss:$20 sps:$4 sm:$0xff]  }
 0x14d   :  { %5490 = vmatprep.subr.bf16.mxu0 %v8085_v11  ;;  %v8106_v11 = vld [vmem:[#allocation4 + $0x3a4] ss:$20 sps:$4 sm:$0xff]  }
 0x14e   :  { %5524 = vmatpush2.bf16.msra.mxu1 %v8062_v58  ;;  %v9669_v58 = vpack.c.b16 %v1856_v51, %v1856_v51  ;;  %v8179_v51 = vld [vmem:[#allocation4 + $0x198] ss:$20 sps:$4 sm:$0xff]  }
 0x14f   :  { %5525 = vmatprep.subr.bf16.mxu1 %v8070_v45 }
 0x150   :  { %5491 = vmatpush2.bf16.msra.mxu0 %v8083_v9  ;;  %v8104_v9 = vld [vmem:[#allocation4 + $0x3a0] ss:$20 sps:$4 sm:$0xff]  }
 0x151   :  { %5492 = vmatprep.subr.bf16.mxu0 %v8091_v55 }
 0x152   :  { %5526 = vmatpush2.bf16.msra.mxu1 %v8068_v7  ;;  %v8110_v7 = vld [vmem:[#allocation4 + $0x378] ss:$20 sps:$4 sm:$0xff]  }
 0x153   :  { %5527 = vmatprep.subr.bf16.mxu1 %v8076_v20 }
 0x154   :  { %5493 = vmatpush2.bf16.msra.mxu0 %v8089_v42  ;;  %v8131_v42 = vld [vmem:[#allocation4 + $0x58] ss:$20 sps:$4 sm:$0xff]  }
 0x155   :  { %5494 = vmatprep.subr.bf16.mxu0 %v8097_v61  ;;  %v8116_v61 = vld [vmem:[#allocation4 + $0x350] ss:$20 sps:$4 sm:$0xff]  }
 0x156   :  { %5528 = vmatpush2.bf16.msra.mxu1 %v8074_v19  ;;  %v8137_v19 = vld [vmem:[#allocation4 + $0x30] ss:$20 sps:$4 sm:$0xff]  }
 0x157   :  { %5529 = vmatprep.subr.bf16.mxu1 %v8082_v13  ;;  %v8143_v13 = vld [vmem:[#allocation4 + $0x8] ss:$20 sps:$4 sm:$0xff]  }
 0x158   :  { %5495 = vmatpush2.bf16.msra.mxu0 %v8095_v35  ;;  %v8124_v35 = vld [vmem:[#allocation4 + $0x32c] ss:$20 sps:$4 sm:$0xff]  }
 0x159   :  { %5546 = vmatprep.subr.bf16.mxu0 %v8103_v30  ;;  %v8130_v30 = vld [vmem:[#allocation4 + $0x304] ss:$20 sps:$4 sm:$0xff]  }
 0x15a   :  { %5530 = vmatpush2.bf16.msra.mxu1 %v8080_v4  ;;  %v8151_v4 = vld [vmem:[#allocation4 + $0x264] ss:$20 sps:$4 sm:$0xff]  }
 0x15b   :  { %v5252_v14 = vpop.f32.mrf.mxu0  ;;  %5497 = vmatmul.mubr.bf16.vlgmr.msra.gmra.mxu0 %v9664_v8  ;;  %5531 = vmatprep.subr.bf16.mxu1 %v8088_v62  ;;  %v8157_v62 = vld [vmem:[#allocation4 + $0x23c] ss:$20 sps:$4 sm:$0xff]  }
 0x15c   :  { %5547 = vmatpush1.bf16.msra.mxu0 %v8101_v31  ;;  %5578 = vmatprep.mubr.bf16.mxu0 %v8994_v10  ;;  %v8128_v31 = vld [vmem:[#allocation4 + $0x300] ss:$20 sps:$4 sm:$0xff]  }
 0x15d   :  { %v5254_v25 = vpop.f32.mrf.mxu0  ;;  %5548 = vmatprep.subr.bf16.mxu0 %v8109_v57  ;;  %v8134_v57 = vld [vmem:[#allocation4 + $0x2d8] ss:$20 sps:$4 sm:$0xff]  }
 0x15e   :  { %5532 = vmatpush2.bf16.msra.mxu1 %v8086_v0  ;;  %v8155_v0 = vld [vmem:[#allocation4 + $0x238] ss:$20 sps:$4 sm:$0xff]  }
 0x15f   :  { %v5256_v18 = vpop.f32.mrf.mxu0  ;;  %5533 = vmatprep.subr.bf16.mxu1 %v8094_v40  ;;  %v8161_v40 = vld [vmem:[#allocation4 + $0x210] ss:$20 sps:$4 sm:$0xff]  }
 0x160   :  { %5549 = vmatpush1.bf16.msra.mxu0 %v8107_v50  ;;  %v8148_v50 = vld [vmem:[#allocation4 + $0x28c] ss:$20 sps:$4 sm:$0xff]   ;;  %v8154_v18 = vld [vmem:[#allocation4 + $0x4e4] ss:$20 sps:$4 sm:$0xff]  }
 0x161   :  { %v5257_v33 = vpop.f32.mrf.mxu0  ;;  %5550 = vmatprep.subr.bf16.mxu0 %v8115_v49  ;;  %v8146_v49 = vld [vmem:[#allocation4 + $0x288] ss:$20 sps:$4 sm:$0xff]  }
 0x162   :  { %5534 = vmatpush2.bf16.msra.mxu1 %v8092_v36  ;;  %v8167_v36 = vld [vmem:[#allocation4 + $0x1e8] ss:$20 sps:$4 sm:$0xff]  }
 0x163   :  { %5535 = vmatprep.subr.bf16.mxu1 %v8100_v52  ;;  %v8173_v52 = vld [vmem:[#allocation4 + $0x1c0] ss:$20 sps:$4 sm:$0xff]   ;;  %v8181_v33 = vld [vmem:[#allocation4 + $0x19c] ss:$20 sps:$4 sm:$0xff]  }
 0x164   :  { %5551 = vmatpush1.bf16.msra.mxu0 %v8113_v59  ;;  %v8160_v59 = vld [vmem:[#allocation4 + $0x4bc] ss:$20 sps:$4 sm:$0xff]  }
 0x165   :  { %5552 = vmatprep.subr.bf16.mxu0 %v8121_v16  ;;  %v8158_v16 = vld [vmem:[#allocation4 + $0x4b8] ss:$20 sps:$4 sm:$0xff]  }
 0x166   :  { %5536 = vmatpush2.bf16.msra.mxu1 %v8098_v28  ;;  %v8166_v28 = vld [vmem:[#allocation4 + $0x494] ss:$20 sps:$4 sm:$0xff]  }
 0x167   :  { %5587 = vmatprep.subr.bf16.mxu1 %v8106_v11  ;;  %v8164_v11 = vld [vmem:[#allocation4 + $0x490] ss:$20 sps:$4 sm:$0xff]  }
 0x168   :  { %5553 = vmatpush1.bf16.msra.mxu0 %v8119_v60  ;;  %v8187_v60 = vld [vmem:[#allocation4 + $0x174] ss:$20 sps:$4 sm:$0xff]  }
 0x169   :  { %5554 = vmatprep.subr.bf16.mxu0 %v8127_v22  ;;  %v5293_v45 = vpop.f32.mrf.mxu1  ;;  %5538 = vmatmul.mubr.bf16.vlgmr.msra.gmra.mxu1 %v9669_v58  ;;  %v8172_v22 = vld [vmem:[#allocation4 + $0x46c] ss:$20 sps:$4 sm:$0xff]  }
 0x16a   :  { %v9672_v55 = vadd.f32 %v5293_v45, %v5252_v14  ;;  %5588 = vmatpush1.bf16.msra.mxu1 %v8104_v9  ;;  %5619 = vmatprep.mubr.bf16.mxu1 %v9002_v53  ;;  %v8142_v14 = vld [vmem:[#allocation4 + $0x2b4] ss:$20 sps:$4 sm:$0xff]   ;;  %v8185_v9 = vld [vmem:[#allocation4 + $0x170] ss:$20 sps:$4 sm:$0xff]  }
 0x16b   :  { %v5295_v37 = vpop.f32.mrf.mxu1  ;;  %5589 = vmatprep.subr.bf16.mxu1 %v8112_v44  ;;  %v8170_v44 = vld [vmem:[#allocation4 + $0x468] ss:$20 sps:$4 sm:$0xff]  }
 0x16c   :  { %5555 = vmatpush1.bf16.msra.mxu0 %v8125_v17  ;;  %v9674_v21 = vadd.f32 %v5295_v37, %v5254_v25  ;;  %v8169_v25 = vld [vmem:[#allocation4 + $0x1ec] ss:$20 sps:$4 sm:$0xff]   ;;  %v8191_v45 = vld [vmem:[#allocation4 + $0x148] ss:$20 sps:$4 sm:$0xff]  }
 0x16d   :  { %5556 = vmatprep.subr.bf16.mxu0 %v8133_v27  ;;  %v5297_v20 = vpop.f32.mrf.mxu1  ;;  %v8193_v17 = vld [vmem:[#allocation4 + $0x14c] ss:$20 sps:$4 sm:$0xff]   ;;  %v8178_v27 = vld [vmem:[#allocation4 + $0x444] ss:$20 sps:$4 sm:$0xff]   ;;  %v8184_v37 = vld [vmem:[#allocation4 + $0x41c] ss:$20 sps:$4 sm:$0xff]  }
 0x16e   :  { %5590 = vmatpush1.bf16.msra.mxu1 %v8110_v7  ;;  %v8199_v7 = vld [vmem:[#allocation4 + $0x624] ss:$20 sps:$4 sm:$0xff]  }
 0x16f   :  { %5591 = vmatprep.subr.bf16.mxu1 %v8118_v38  ;;  %v5298_v32 = vpop.f32.mrf.mxu1  ;;  %v8197_v38 = vld [vmem:[#allocation4 + $0x620] ss:$20 sps:$4 sm:$0xff]  }
 0x170   :  { %5557 = vmatpush1.bf16.msra.mxu0 %v8131_v42  ;;  %v8176_v42 = vld [vmem:[#allocation4 + $0x440] ss:$20 sps:$4 sm:$0xff]  }
 0x171   :  { %5558 = vmatprep.subr.bf16.mxu0 %v8139_v6  ;;  %v8205_v6 = vld [vmem:[#allocation4 + $0x5fc] ss:$20 sps:$4 sm:$0xff]  }
 0x172   :  { %5592 = vmatpush1.bf16.msra.mxu1 %v8116_v61  ;;  %v8182_v61 = vld [vmem:[#allocation4 + $0x418] ss:$20 sps:$4 sm:$0xff]  }
 0x173   :  { %5593 = vmatprep.subr.bf16.mxu1 %v8124_v35 }
 0x174   :  { %5559 = vmatpush1.bf16.msra.mxu0 %v8137_v19  ;;  %v8190_v19 = vld [vmem:[#allocation4 + $0x3f4] ss:$20 sps:$4 sm:$0xff]  }
 0x175   :  { %5560 = vmatprep.subr.bf16.mxu0 %v8145_v41  ;;  %v8203_v41 = vld [vmem:[#allocation4 + $0x5f8] ss:$20 sps:$4 sm:$0xff]  }
 0x176   :  { %5594 = vmatpush1.bf16.msra.mxu1 %v8122_v23  ;;  %v8211_v23 = vld [vmem:[#allocation4 + $0x5d4] ss:$20 sps:$4 sm:$0xff]  }
 0x177   :  { %5595 = vmatprep.subr.bf16.mxu1 %v8130_v30 }
 0x178   :  { %5561 = vmatpush1.bf16.msra.mxu0 %v8143_v13 }
 0x179   :  { %5562 = vmatprep.subr.bf16.mxu0 %v8151_v4  ;;  %v8188_v4 = vld [vmem:[#allocation4 + $0x3f0] ss:$20 sps:$4 sm:$0xff]  }
 0x17a   :  { %5596 = vmatpush1.bf16.msra.mxu1 %v8128_v31  ;;  %v8196_v31 = vld [vmem:[#allocation4 + $0x3cc] ss:$20 sps:$4 sm:$0xff]  }
 0x17b   :  { %5597 = vmatprep.subr.bf16.mxu1 %v8136_v3  ;;  %v8209_v3 = vld [vmem:[#allocation4 + $0x5d0] ss:$20 sps:$4 sm:$0xff]  }
 0x17c   :  { %5563 = vmatpush2.bf16.msra.mxu0 %v8149_v1 }
 0x17d   :  { %5564 = vmatprep.subr.bf16.mxu0 %v8157_v62  ;;  %v8194_v62 = vld [vmem:[#allocation4 + $0x3c8] ss:$20 sps:$4 sm:$0xff]  }
 0x17e   :  { %5598 = vmatpush1.bf16.msra.mxu1 %v8134_v57  ;;  %v8202_v57 = vld [vmem:[#allocation4 + $0x8a4] ss:$20 sps:$4 sm:$0xff]  }
 0x17f   :  { %5599 = vmatprep.subr.bf16.mxu1 %v8142_v14  ;;  %v8215_v14 = vld [vmem:[#allocation4 + $0x5a8] ss:$20 sps:$4 sm:$0xff]  }
 0x180   :  { %5565 = vmatpush2.bf16.msra.mxu0 %v8155_v0  ;;  %v8200_v0 = vld [vmem:[#allocation4 + $0x8a0] ss:$20 sps:$4 sm:$0xff]  }
 0x181   :  { %5566 = vmatprep.subr.bf16.mxu0 %v8163_v39  ;;  %v8208_v39 = vld [vmem:[#allocation4 + $0x87c] ss:$20 sps:$4 sm:$0xff]  }
 0x182   :  { %5600 = vmatpush1.bf16.msra.mxu1 %v8140_v15  ;;  %v8221_v15 = vld [vmem:[#allocation4 + $0x580] ss:$20 sps:$4 sm:$0xff]  }
 0x183   :  { %5601 = vmatprep.subr.bf16.mxu1 %v8148_v50  ;;  %v8229_v50 = vld [vmem:[#allocation4 + $0x55c] ss:$20 sps:$4 sm:$0xff]  }
 0x184   :  { %5567 = vmatpush2.bf16.msra.mxu0 %v8161_v40  ;;  %v8206_v40 = vld [vmem:[#allocation4 + $0x878] ss:$20 sps:$4 sm:$0xff]  }
 0x185   :  { %5568 = vmatprep.subr.bf16.mxu0 %v8169_v25  ;;  %v8227_v25 = vld [vmem:[#allocation4 + $0x558] ss:$20 sps:$4 sm:$0xff]  }
 0x186   :  { %5602 = vmatpush1.bf16.msra.mxu1 %v8146_v49 }
 0x187   :  { %5603 = vmatprep.subr.bf16.mxu1 %v8154_v18 }
 0x188   :  { %5569 = vmatpush2.bf16.msra.mxu0 %v8167_v36 }
 0x189   :  { %5570 = vmatprep.subr.bf16.mxu0 %v8175_v2  ;;  %v8214_v2 = vld [vmem:[#allocation4 + $0x854] ss:$20 sps:$4 sm:$0xff]  }
 0x18a   :  { %5604 = vmatpush2.bf16.msra.mxu1 %v8152_v47  ;;  %v8235_v47 = vld [vmem:[#allocation4 + $0x534] ss:$20 sps:$4 sm:$0xff]  }
 0x18b   :  { %5605 = vmatprep.subr.bf16.mxu1 %v8160_v59 }
 0x18c   :  { %5571 = vmatpush2.bf16.msra.mxu0 %v8173_v52 }
 0x18d   :  { %5572 = vmatprep.subr.bf16.mxu0 %v8181_v33  ;;  %v8212_v33 = vld [vmem:[#allocation4 + $0x850] ss:$20 sps:$4 sm:$0xff]  }
 0x18e   :  { %5606 = vmatpush2.bf16.msra.mxu1 %v8158_v16  ;;  %v8220_v16 = vld [vmem:[#allocation4 + $0x82c] ss:$20 sps:$4 sm:$0xff]  }
 0x18f   :  { %5607 = vmatprep.subr.bf16.mxu1 %v8166_v28  ;;  %v8233_v28 = vld [vmem:[#allocation4 + $0x530] ss:$20 sps:$4 sm:$0xff]  }
 0x190   :  { %5573 = vmatpush2.bf16.msra.mxu0 %v8179_v51  ;;  %v8241_v51 = vld [vmem:[#allocation4 + $0x50c] ss:$20 sps:$4 sm:$0xff]  }
 0x191   :  { %5574 = vmatprep.subr.bf16.mxu0 %v8187_v60 }
 0x192   :  { %5608 = vmatpush2.bf16.msra.mxu1 %v8164_v11  ;;  %v8218_v11 = vld [vmem:[#allocation4 + $0x828] ss:$20 sps:$4 sm:$0xff]  }
 0x193   :  { %5609 = vmatprep.subr.bf16.mxu1 %v8172_v22  ;;  %v8226_v22 = vld [vmem:[#allocation4 + $0x804] ss:$20 sps:$4 sm:$0xff]  }
 0x194   :  { %5575 = vmatpush2.bf16.msra.mxu0 %v8185_v9  ;;  %v8239_v9 = vld [vmem:[#allocation4 + $0x508] ss:$20 sps:$4 sm:$0xff]  }
 0x195   :  { %5576 = vmatprep.subr.bf16.mxu0 %v8193_v17  ;;  %v8247_v17 = vld [vmem:[#allocation4 + $0x764] ss:$20 sps:$4 sm:$0xff]  }
 0x196   :  { %5610 = vmatpush2.bf16.msra.mxu1 %v8170_v44  ;;  %v8224_v44 = vld [vmem:[#allocation4 + $0x800] ss:$20 sps:$4 sm:$0xff]  }
 0x197   :  { %5611 = vmatprep.subr.bf16.mxu1 %v8178_v27  ;;  %v8232_v27 = vld [vmem:[#allocation4 + $0x7dc] ss:$20 sps:$4 sm:$0xff]  }
 0x198   :  { %5577 = vmatpush2.bf16.msra.mxu0 %v8191_v45  ;;  %v8245_v45 = vld [vmem:[#allocation4 + $0x760] ss:$20 sps:$4 sm:$0xff]  }
 0x199   :  { %5628 = vmatprep.subr.bf16.mxu0 %v8199_v7  ;;  %v8253_v7 = vld [vmem:[#allocation4 + $0x73c] ss:$20 sps:$4 sm:$0xff]  }
 0x19a   :  { %5612 = vmatpush2.bf16.msra.mxu1 %v8176_v42  ;;  %v8230_v42 = vld [vmem:[#allocation4 + $0x7d8] ss:$20 sps:$4 sm:$0xff]  }
 0x19b   :  { %v5334_v20 = vpop.f32.mrf.mxu0  ;;  %5579 = vmatmul.mubr.bf16.vlgmr.msra.gmra.mxu0 %v9006_v43  ;;  %5613 = vmatprep.subr.bf16.mxu1 %v8184_v37  ;;  %v8238_v37 = vld [vmem:[#allocation4 + $0x7b4] ss:$20 sps:$4 sm:$0xff]  }
 0x19c   :  { %v5335_v35 = vadd.f32 %v5334_v20, %v9672_v55  ;;  %5629 = vmatpush1.bf16.msra.mxu0 %v8197_v38  ;;  %5660 = vmatprep.mubr.bf16.mxu0 %v9244_v56  ;;  %v8217_v55 = vld [vmem:[#allocation4 + $0x5ac] ss:$20 sps:$4 sm:$0xff]   ;;  %v8236_v20 = vld [vmem:[#allocation4 + $0x7b0] ss:$20 sps:$4 sm:$0xff]  }
 0x19d   :  { %v5336_v32 = vpop.f32.mrf.mxu0  ;;  %5630 = vmatprep.subr.bf16.mxu0 %v8205_v6  ;;  %v8251_v38 = vld [vmem:[#allocation4 + $0x738] ss:$20 sps:$4 sm:$0xff]   ;;  %v8259_v6 = vld [vmem:[#allocation4 + $0x714] ss:$20 sps:$4 sm:$0xff]  }
 0x19e   :  { %v5337_v13 = vadd.f32 %v5336_v32, %v9674_v21  ;;  %5614 = vmatpush2.bf16.msra.mxu1 %v8182_v61  ;;  %v8223_v21 = vld [vmem:[#allocation4 + $0x584] ss:$20 sps:$4 sm:$0xff]   ;;  %v8244_v61 = vld [vmem:[#allocation4 + $0x78c] ss:$20 sps:$4 sm:$0xff]  }
 0x19f   :  { %v5338_v30 = vpop.f32.mrf.mxu0  ;;  %5615 = vmatprep.subr.bf16.mxu1 %v8190_v19  ;;  %v8257_v19 = vld [vmem:[#allocation4 + $0x710] ss:$20 sps:$4 sm:$0xff]  }
 0x1a0   :  { %5631 = vmatpush1.bf16.msra.mxu0 %v8203_v41  ;;  %v8242_v41 = vld [vmem:[#allocation4 + $0x788] ss:$20 sps:$4 sm:$0xff]   ;;  %v8250_v32 = vld [vmem:[#allocation4 + $0x9e4] ss:$20 sps:$4 sm:$0xff]   ;;  %v8248_v30 = vld [vmem:[#allocation4 + $0x9e0] ss:$20 sps:$4 sm:$0xff]  }
 0x1a1   :  { %v5339_v1 = vpop.f32.mrf.mxu0  ;;  %5632 = vmatprep.subr.bf16.mxu0 %v8211_v23  ;;  %v8263_v23 = vld [vmem:[#allocation4 + $0x6e8] ss:$20 sps:$4 sm:$0xff]  }
 0x1a2   :  { %5616 = vmatpush2.bf16.msra.mxu1 %v8188_v4  ;;  %v8256_v4 = vld [vmem:[#allocation4 + $0x9bc] ss:$20 sps:$4 sm:$0xff]   ;;  %v8254_v1 = vld [vmem:[#allocation4 + $0x9b8] ss:$20 sps:$4 sm:$0xff]  }
 0x1a3   :  { %5617 = vmatprep.subr.bf16.mxu1 %v8196_v31  ;;  %v8269_v31 = vld [vmem:[#allocation4 + $0x6c0] ss:$20 sps:$4 sm:$0xff]  }
 0x1a4   :  { %5633 = vmatpush1.bf16.msra.mxu0 %v8209_v3  ;;  %v8277_v3 = vld [vmem:[#allocation4 + $0x69c] ss:$20 sps:$4 sm:$0xff]  }
 0x1a5   :  { %5634 = vmatprep.subr.bf16.mxu0 %v8217_v55  ;;  %v8262_v55 = vld [vmem:[#allocation4 + $0x994] ss:$20 sps:$4 sm:$0xff]  }
 0x1a6   :  { %5618 = vmatpush2.bf16.msra.mxu1 %v8194_v62  ;;  %v8275_v62 = vld [vmem:[#allocation4 + $0x698] ss:$20 sps:$4 sm:$0xff]  }
 0x1a7   :  { %5669 = vmatprep.subr.bf16.mxu1 %v8202_v57  ;;  %v8283_v57 = vld [vmem:[#allocation4 + $0x674] ss:$20 sps:$4 sm:$0xff]  }
 0x1a8   :  { %5635 = vmatpush1.bf16.msra.mxu0 %v8215_v14  ;;  %v8260_v14 = vld [vmem:[#allocation4 + $0x990] ss:$20 sps:$4 sm:$0xff]  }
 0x1a9   :  { %5636 = vmatprep.subr.bf16.mxu0 %v8223_v21  ;;  %5620 = vmatmul.mubr.bf16.vlgmr.msra.gmra.mxu1 %v9085_v63  ;;  %v5375_v49 = vpop.f32.mrf.mxu1  ;;  %v8268_v21 = vld [vmem:[#allocation4 + $0x96c] ss:$20 sps:$4 sm:$0xff]  }
 0x1aa   :  { %5670 = vmatpush1.bf16.msra.mxu1 %v8200_v0  ;;  %v9682_v18 = vadd.f32 %v5375_v49, %v5335_v35  ;;  %5701 = vmatprep.mubr.bf16.mxu1 %v9266_v48  ;;  %v8265_v35 = vld [vmem:[#allocation4 + $0x6ec] ss:$20 sps:$4 sm:$0xff]   ;;  %v8281_v0 = vld [vmem:[#allocation4 + $0x670] ss:$20 sps:$4 sm:$0xff]  }
 0x1ab   :  { %v5377_v36 = vpop.f32.mrf.mxu1  ;;  %5671 = vmatprep.subr.bf16.mxu1 %v8208_v39  ;;  %v8289_v39 = vld [vmem:[#allocation4 + $0x64c] ss:$20 sps:$4 sm:$0xff]  }
 0x1ac   :  { %5637 = vmatpush1.bf16.msra.mxu0 %v8221_v15  ;;  %v9684_v59 = vadd.f32 %v5377_v36, %v5337_v13  ;;  %v8271_v13 = vld [vmem:[#allocation4 + $0x6c4] ss:$20 sps:$4 sm:$0xff]   ;;  %v8266_v15 = vld [vmem:[#allocation4 + $0x968] ss:$20 sps:$4 sm:$0xff]   ;;  %v8272_v49 = vld [vmem:[#allocation4 + $0x940] ss:$20 sps:$4 sm:$0xff]  }
 0x1ad   :  { %5638 = vmatprep.subr.bf16.mxu0 %v8229_v50  ;;  %v5379_v52 = vpop.f32.mrf.mxu1  ;;  %v8274_v50 = vld [vmem:[#allocation4 + $0x944] ss:$20 sps:$4 sm:$0xff]   ;;  %v8280_v36 = vld [vmem:[#allocation4 + $0x91c] ss:$20 sps:$4 sm:$0xff]  }
 0x1ae   :  { %5672 = vmatpush1.bf16.msra.mxu1 %v8206_v40  ;;  %v8287_v40 = vld [vmem:[#allocation4 + $0x648] ss:$20 sps:$4 sm:$0xff]  }
 0x1af   :  { %5673 = vmatprep.subr.bf16.mxu1 %v8214_v2  ;;  %v5380_v60 = vpop.f32.mrf.mxu1  ;;  %v8293_v2 = vld [vmem:[#allocation4 + $0xb20] ss:$20 sps:$4 sm:$0xff]  }
 0x1b0   :  { %5639 = vmatpush1.bf16.msra.mxu0 %v8227_v25  ;;  %v8295_v25 = vld [vmem:[#allocation4 + $0xb24] ss:$20 sps:$4 sm:$0xff]  }
 0x1b1   :  { %5640 = vmatprep.subr.bf16.mxu0 %v8235_v47  ;;  %v8301_v47 = vld [vmem:[#allocation4 + $0xafc] ss:$20 sps:$4 sm:$0xff]  }
 0x1b2   :  { %5674 = vmatpush1.bf16.msra.mxu1 %v8212_v33  ;;  %v8278_v33 = vld [vmem:[#allocation4 + $0x918] ss:$20 sps:$4 sm:$0xff]  }
 0x1b3   :  { %5675 = vmatprep.subr.bf16.mxu1 %v8220_v16  ;;  %v8286_v16 = vld [vmem:[#allocation4 + $0x8f4] ss:$20 sps:$4 sm:$0xff]  }
 0x1b4   :  { %5641 = vmatpush1.bf16.msra.mxu0 %v8233_v28 }
 0x1b5   :  { %5642 = vmatprep.subr.bf16.mxu0 %v8241_v51  ;;  %v8299_v51 = vld [vmem:[#allocation4 + $0xaf8] ss:$20 sps:$4 sm:$0xff]  }
 0x1b6   :  { %5676 = vmatpush1.bf16.msra.mxu1 %v8218_v11  ;;  %v8307_v11 = vld [vmem:[#allocation4 + $0xad4] ss:$20 sps:$4 sm:$0xff]  }
 0x1b7   :  { %5677 = vmatprep.subr.bf16.mxu1 %v8226_v22 }
 0x1b8   :  { %5643 = vmatpush1.bf16.msra.mxu0 %v8239_v9 }
 0x1b9   :  { %5644 = vmatprep.subr.bf16.mxu0 %v8247_v17  ;;  %v8284_v17 = vld [vmem:[#allocation4 + $0x8f0] ss:$20 sps:$4 sm:$0xff]  }
 0x1ba   :  { %5678 = vmatpush1.bf16.msra.mxu1 %v8224_v44  ;;  %v8292_v44 = vld [vmem:[#allocation4 + $0x8cc] ss:$20 sps:$4 sm:$0xff]  }
 0x1bb   :  { %5679 = vmatprep.subr.bf16.mxu1 %v8232_v27  ;;  %v8305_v27 = vld [vmem:[#allocation4 + $0xad0] ss:$20 sps:$4 sm:$0xff]  }
 0x1bc   :  { %5645 = vmatpush2.bf16.msra.mxu0 %v8245_v45 }
 0x1bd   :  { %5646 = vmatprep.subr.bf16.mxu0 %v8253_v7  ;;  %v8290_v7 = vld [vmem:[#allocation4 + $0x8c8] ss:$20 sps:$4 sm:$0xff]  }
 0x1be   :  { %5680 = vmatpush1.bf16.msra.mxu1 %v8230_v42  ;;  %v8298_v42 = vld [vmem:[#allocation4 + $0xda4] ss:$20 sps:$4 sm:$0xff]  }
 0x1bf   :  { %5681 = vmatprep.subr.bf16.mxu1 %v8238_v37  ;;  %v8311_v37 = vld [vmem:[#allocation4 + $0xaa8] ss:$20 sps:$4 sm:$0xff]  }
 0x1c0   :  { %5647 = vmatpush2.bf16.msra.mxu0 %v8251_v38  ;;  %v8296_v38 = vld [vmem:[#allocation4 + $0xda0] ss:$20 sps:$4 sm:$0xff]  }
 0x1c1   :  { %5648 = vmatprep.subr.bf16.mxu0 %v8259_v6  ;;  %v8317_v6 = vld [vmem:[#allocation4 + $0xa80] ss:$20 sps:$4 sm:$0xff]  }
 0x1c2   :  { %5682 = vmatpush1.bf16.msra.mxu1 %v8236_v20  ;;  %v8304_v20 = vld [vmem:[#allocation4 + $0xd7c] ss:$20 sps:$4 sm:$0xff]  }
 0x1c3   :  { %5683 = vmatprep.subr.bf16.mxu1 %v8244_v61  ;;  %v8325_v61 = vld [vmem:[#allocation4 + $0xa5c] ss:$20 sps:$4 sm:$0xff]  }
 0x1c4   :  { %5649 = vmatpush2.bf16.msra.mxu0 %v8257_v19  ;;  %v8302_v19 = vld [vmem:[#allocation4 + $0xd78] ss:$20 sps:$4 sm:$0xff]  }
 0x1c5   :  { %5650 = vmatprep.subr.bf16.mxu0 %v8265_v35  ;;  %v8323_v35 = vld [vmem:[#allocation4 + $0xa58] ss:$20 sps:$4 sm:$0xff]  }
 0x1c6   :  { %5684 = vmatpush1.bf16.msra.mxu1 %v8242_v41 }
 0x1c7   :  { %5685 = vmatprep.subr.bf16.mxu1 %v8250_v32 }
 0x1c8   :  { %5651 = vmatpush2.bf16.msra.mxu0 %v8263_v23 }
 0x1c9   :  { %5652 = vmatprep.subr.bf16.mxu0 %v8271_v13  ;;  %v8310_v13 = vld [vmem:[#allocation4 + $0xd54] ss:$20 sps:$4 sm:$0xff]  }
 0x1ca   :  { %5686 = vmatpush2.bf16.msra.mxu1 %v8248_v30  ;;  %v8331_v30 = vld [vmem:[#allocation4 + $0xa34] ss:$20 sps:$4 sm:$0xff]  }
 0x1cb   :  { %5687 = vmatprep.subr.bf16.mxu1 %v8256_v4 }
 0x1cc   :  { %5653 = vmatpush2.bf16.msra.mxu0 %v8269_v31 }
 0x1cd   :  { %5654 = vmatprep.subr.bf16.mxu0 %v8277_v3  ;;  %v8308_v3 = vld [vmem:[#allocation4 + $0xd50] ss:$20 sps:$4 sm:$0xff]  }
 0x1ce   :  { %5688 = vmatpush2.bf16.msra.mxu1 %v8254_v1  ;;  %v8329_v1 = vld [vmem:[#allocation4 + $0xa30] ss:$20 sps:$4 sm:$0xff]  }
 0x1cf   :  { %5689 = vmatprep.subr.bf16.mxu1 %v8262_v55  ;;  %v8316_v55 = vld [vmem:[#allocation4 + $0xd2c] ss:$20 sps:$4 sm:$0xff]  }
 0x1d0   :  { %5655 = vmatpush2.bf16.msra.mxu0 %v8275_v62  ;;  %v8337_v62 = vld [vmem:[#allocation4 + $0xa0c] ss:$20 sps:$4 sm:$0xff]  }
 0x1d1   :  { %5656 = vmatprep.subr.bf16.mxu0 %v8283_v57 }
 0x1d2   :  { %5690 = vmatpush2.bf16.msra.mxu1 %v8260_v14  ;;  %v8314_v14 = vld [vmem:[#allocation4 + $0xd28] ss:$20 sps:$4 sm:$0xff]  }
 0x1d3   :  { %5691 = vmatprep.subr.bf16.mxu1 %v8268_v21  ;;  %v8335_v21 = vld [vmem:[#allocation4 + $0xa08] ss:$20 sps:$4 sm:$0xff]  }
 0x1d4   :  { %5657 = vmatpush2.bf16.msra.mxu0 %v8281_v0  ;;  %v8322_v0 = vld [vmem:[#allocation4 + $0xd04] ss:$20 sps:$4 sm:$0xff]  }
 0x1d5   :  { %5658 = vmatprep.subr.bf16.mxu0 %v8289_v39  ;;  %v8343_v39 = vld [vmem:[#allocation4 + $0xc64] ss:$20 sps:$4 sm:$0xff]  }
 0x1d6   :  { %5692 = vmatpush2.bf16.msra.mxu1 %v8266_v15  ;;  %v8320_v15 = vld [vmem:[#allocation4 + $0xd00] ss:$20 sps:$4 sm:$0xff]  }
 0x1d7   :  { %5693 = vmatprep.subr.bf16.mxu1 %v8274_v50  ;;  %v8341_v50 = vld [vmem:[#allocation4 + $0xc60] ss:$20 sps:$4 sm:$0xff]  }
 0x1d8   :  { %5659 = vmatpush2.bf16.msra.mxu0 %v8287_v40  ;;  %v8328_v40 = vld [vmem:[#allocation4 + $0xcdc] ss:$20 sps:$4 sm:$0xff]  }
 0x1d9   :  { %5710 = vmatprep.subr.bf16.mxu0 %v8295_v25  ;;  %v8349_v25 = vld [vmem:[#allocation4 + $0xc3c] ss:$20 sps:$4 sm:$0xff]  }
 0x1da   :  { %5694 = vmatpush2.bf16.msra.mxu1 %v8272_v49  ;;  %v8326_v49 = vld [vmem:[#allocation4 + $0xcd8] ss:$20 sps:$4 sm:$0xff]  }
 0x1db   :  { %v5416_v52 = vpop.f32.mrf.mxu0  ;;  %5661 = vmatmul.mubr.bf16.vlgmr.msra.gmra.mxu0 %v9258_v26  ;;  %5695 = vmatprep.subr.bf16.mxu1 %v8280_v36  ;;  %v8347_v36 = vld [vmem:[#allocation4 + $0xc38] ss:$20 sps:$4 sm:$0xff]  }
 0x1dc   :  { %v5417_v28 = vadd.f32 %v5416_v52, %v9682_v18  ;;  %5711 = vmatpush1.bf16.msra.mxu0 %v8293_v2  ;;  %5742 = vmatprep.mubr.bf16.mxu0 %v9450_v29  ;;  %v8313_v18 = vld [vmem:[#allocation4 + $0xaac] ss:$20 sps:$4 sm:$0xff]   ;;  %v8334_v2 = vld [vmem:[#allocation4 + $0xcb4] ss:$20 sps:$4 sm:$0xff]   ;;  %v8332_v52 = vld [vmem:[#allocation4 + $0xcb0] ss:$20 sps:$4 sm:$0xff]  }
 0x1dd   :  { %v5418_v60 = vpop.f32.mrf.mxu0  ;;  %5712 = vmatprep.subr.bf16.mxu0 %v8301_v47  ;;  %v8355_v47 = vld [vmem:[#allocation4 + $0xc14] ss:$20 sps:$4 sm:$0xff]  }
 0x1de   :  { %v5419_v22 = vadd.f32 %v5418_v60, %v9684_v59  ;;  %5696 = vmatpush2.bf16.msra.mxu1 %v8278_v33  ;;  %v8319_v59 = vld [vmem:[#allocation4 + $0xa84] ss:$20 sps:$4 sm:$0xff]   ;;  %v8359_v60 = vld [vmem:[#allocation4 + $0xbe8] ss:$20 sps:$4 sm:$0xff]  }
 0x1df   :  { %v5420_v9 = vpop.f32.mrf.mxu0  ;;  %5697 = vmatprep.subr.bf16.mxu1 %v8286_v16  ;;  %v8353_v33 = vld [vmem:[#allocation4 + $0xc10] ss:$20 sps:$4 sm:$0xff]   ;;  %v8340_v16 = vld [vmem:[#allocation4 + $0xc8c] ss:$20 sps:$4 sm:$0xff]  }
 0x1e0   :  { %5713 = vmatpush1.bf16.msra.mxu0 %v8299_v51  ;;  %v8338_v51 = vld [vmem:[#allocation4 + $0xc88] ss:$20 sps:$4 sm:$0xff]   ;;  %v8344_v9 = vld [vmem:[#allocation4 + $0xee0] ss:$20 sps:$4 sm:$0xff]  }
 0x1e1   :  { %v5421_v45 = vpop.f32.mrf.mxu0  ;;  %5714 = vmatprep.subr.bf16.mxu0 %v8307_v11  ;;  %v8346_v11 = vld [vmem:[#allocation4 + $0xee4] ss:$20 sps:$4 sm:$0xff]  }
 0x1e2   :  { %5698 = vmatpush2.bf16.msra.mxu1 %v8284_v17  ;;  %v8365_v17 = vld [vmem:[#allocation4 + $0xbc0] ss:$20 sps:$4 sm:$0xff]   ;;  %v8350_v45 = vld [vmem:[#allocation4 + $0xeb8] ss:$20 sps:$4 sm:$0xff]  }
 0x1e3   :  { %5699 = vmatprep.subr.bf16.mxu1 %v8292_v44  ;;  %v8352_v44 = vld [vmem:[#allocation4 + $0xebc] ss:$20 sps:$4 sm:$0xff]  }
 0x1e4   :  { %5715 = vmatpush1.bf16.msra.mxu0 %v8305_v27  ;;  %v8373_v27 = vld [vmem:[#allocation4 + $0xb9c] ss:$20 sps:$4 sm:$0xff]  }
 0x1e5   :  { %5716 = vmatprep.subr.bf16.mxu0 %v8313_v18  ;;  %v8371_v18 = vld [vmem:[#allocation4 + $0xb98] ss:$20 sps:$4 sm:$0xff]  }
 0x1e6   :  { %5700 = vmatpush2.bf16.msra.mxu1 %v8290_v7  ;;  %v8358_v7 = vld [vmem:[#allocation4 + $0xe94] ss:$20 sps:$4 sm:$0xff]  }
 0x1e7   :  { %5751 = vmatprep.subr.bf16.mxu1 %v8298_v42  ;;  %v8379_v42 = vld [vmem:[#allocation4 + $0xb74] ss:$20 sps:$4 sm:$0xff]  }
 0x1e8   :  { %5717 = vmatpush1.bf16.msra.mxu0 %v8311_v37  ;;  %v8356_v37 = vld [vmem:[#allocation4 + $0xe90] ss:$20 sps:$4 sm:$0xff]  }
 0x1e9   :  { %5718 = vmatprep.subr.bf16.mxu0 %v8319_v59  ;;  %5702 = vmatmul.mubr.bf16.vlgmr.msra.gmra.mxu1 %v9326_v5  ;;  %v5457_v41 = vpop.f32.mrf.mxu1  ;;  %v8377_v59 = vld [vmem:[#allocation4 + $0xb70] ss:$20 sps:$4 sm:$0xff]  }
 0x1ea   :  { %5752 = vmatpush1.bf16.msra.mxu1 %v8296_v38  ;;  %v9692_v32 = vadd.f32 %v5457_v41, %v5417_v28  ;;  %5783 = vmatprep.mubr.bf16.mxu1 %v9461_v12  ;;  %v8361_v28 = vld [vmem:[#allocation4 + $0xbec] ss:$20 sps:$4 sm:$0xff]  }
 0x1eb   :  { %v5459_v23 = vpop.f32.mrf.mxu1  ;;  %5753 = vmatprep.subr.bf16.mxu1 %v8304_v20  ;;  %v8364_v38 = vld [vmem:[#allocation4 + $0xe6c] ss:$20 sps:$4 sm:$0xff]   ;;  %v8362_v20 = vld [vmem:[#allocation4 + $0xe68] ss:$20 sps:$4 sm:$0xff]  }
 0x1ec   :  { %5719 = vmatpush1.bf16.msra.mxu0 %v8317_v6  ;;  %v9694_v4 = vadd.f32 %v5459_v23, %v5419_v22  ;;  %v8367_v22 = vld [vmem:[#allocation4 + $0xbc4] ss:$20 sps:$4 sm:$0xff]   ;;  %v8385_v6 = vld [vmem:[#allocation4 + $0xb4c] ss:$20 sps:$4 sm:$0xff]  }
 0x1ed   :  { %5720 = vmatprep.subr.bf16.mxu0 %v8325_v61  ;;  %v5461_v31 = vpop.f32.mrf.mxu1  ;;  %v8383_v61 = vld [vmem:[#allocation4 + $0xb48] ss:$20 sps:$4 sm:$0xff]   ;;  %v8368_v41 = vld [vmem:[#allocation4 + $0xe40] ss:$20 sps:$4 sm:$0xff]  }
 0x1ee   :  { %5754 = vmatpush1.bf16.msra.mxu1 %v8302_v19  ;;  %v8370_v19 = vld [vmem:[#allocation4 + $0xe44] ss:$20 sps:$4 sm:$0xff]   ;;  %v8389_v23 = vld [vmem:[#allocation4 + $0x1020] ss:$20 sps:$4 sm:$0xff]  }
 0x1ef   :  { %5755 = vmatprep.subr.bf16.mxu1 %v8310_v13  ;;  %v5462_v57 = vpop.f32.mrf.mxu1  ;;  %v8376_v13 = vld [vmem:[#allocation4 + $0xe1c] ss:$20 sps:$4 sm:$0xff]  }
 0x1f0   :  { %5721 = vmatpush1.bf16.msra.mxu0 %v8323_v35  ;;  %v8391_v35 = vld [vmem:[#allocation4 + $0x1024] ss:$20 sps:$4 sm:$0xff]  }
 0x1f1   :  { %5722 = vmatprep.subr.bf16.mxu0 %v8331_v30  ;;  %v8397_v30 = vld [vmem:[#allocation4 + $0xffc] ss:$20 sps:$4 sm:$0xff]  }
 0x1f2   :  { %5756 = vmatpush1.bf16.msra.mxu1 %v8308_v3  ;;  %v8374_v3 = vld [vmem:[#allocation4 + $0xe18] ss:$20 sps:$4 sm:$0xff]  }
 0x1f3   :  { %5757 = vmatprep.subr.bf16.mxu1 %v8316_v55  ;;  %v8395_v55 = vld [vmem:[#allocation4 + $0xff8] ss:$20 sps:$4 sm:$0xff]  }
 0x1f4   :  { %5723 = vmatpush1.bf16.msra.mxu0 %v8329_v1 }
 0x1f5   :  { %5724 = vmatprep.subr.bf16.mxu0 %v8337_v62  ;;  %v8382_v62 = vld [vmem:[#allocation4 + $0xdf4] ss:$20 sps:$4 sm:$0xff]  }
 0x1f6   :  { %5758 = vmatpush1.bf16.msra.mxu1 %v8314_v14  ;;  %v8403_v14 = vld [vmem:[#allocation4 + $0xfd4] ss:$20 sps:$4 sm:$0xff]  }
 0x1f7   :  { %5759 = vmatprep.subr.bf16.mxu1 %v8322_v0 }
 0x1f8   :  { %5725 = vmatpush1.bf16.msra.mxu0 %v8335_v21 }
 0x1f9   :  { %5726 = vmatprep.subr.bf16.mxu0 %v8343_v39  ;;  %v8380_v39 = vld [vmem:[#allocation4 + $0xdf0] ss:$20 sps:$4 sm:$0xff]  }
 0x1fa   :  { %5760 = vmatpush1.bf16.msra.mxu1 %v8320_v15  ;;  %v8401_v15 = vld [vmem:[#allocation4 + $0xfd0] ss:$20 sps:$4 sm:$0xff]  }
 0x1fb   :  { %5761 = vmatprep.subr.bf16.mxu1 %v8328_v40 }
 0x1fc   :  { %5727 = vmatpush2.bf16.msra.mxu0 %v8341_v50  ;;  %v8388_v50 = vld [vmem:[#allocation4 + $0xdcc] ss:$20 sps:$4 sm:$0xff]  }
 0x1fd   :  { %5728 = vmatprep.subr.bf16.mxu0 %v8349_v25  ;;  %v8386_v25 = vld [vmem:[#allocation4 + $0xdc8] ss:$20 sps:$4 sm:$0xff]  }
 0x1fe   :  { %5762 = vmatpush1.bf16.msra.mxu1 %v8326_v49  ;;  %v8407_v49 = vld [vmem:[#allocation4 + $0xfa8] ss:$20 sps:$4 sm:$0xff]  }
 0x1ff   :  { %5763 = vmatprep.subr.bf16.mxu1 %v8334_v2  ;;  %v8392_v2 = vld [vmem:[#allocation4 + $0x12a0] ss:$20 sps:$4 sm:$0xff]  }
 0x200   :  { %5729 = vmatpush2.bf16.msra.mxu0 %v8347_v36  ;;  %v8394_v36 = vld [vmem:[#allocation4 + $0x12a4] ss:$20 sps:$4 sm:$0xff]  }
 0x201   :  { %5730 = vmatprep.subr.bf16.mxu0 %v8355_v47  ;;  %v8400_v47 = vld [vmem:[#allocation4 + $0x127c] ss:$20 sps:$4 sm:$0xff]  }
 0x202   :  { %5764 = vmatpush1.bf16.msra.mxu1 %v8332_v52  ;;  %v8413_v52 = vld [vmem:[#allocation4 + $0xf80] ss:$20 sps:$4 sm:$0xff]  }
 0x203   :  { %5765 = vmatprep.subr.bf16.mxu1 %v8340_v16  ;;  %v8398_v16 = vld [vmem:[#allocation4 + $0x1278] ss:$20 sps:$4 sm:$0xff]  }
 0x204   :  { %5731 = vmatpush2.bf16.msra.mxu0 %v8353_v33  ;;  %v8421_v33 = vld [vmem:[#allocation4 + $0xf5c] ss:$20 sps:$4 sm:$0xff]  }
 0x205   :  { %5732 = vmatprep.subr.bf16.mxu0 %v8361_v28 }
 0x206   :  { %5766 = vmatpush1.bf16.msra.mxu1 %v8338_v51 }
 0x207   :  { %5767 = vmatprep.subr.bf16.mxu1 %v8346_v11 }
 0x208   :  { %5733 = vmatpush2.bf16.msra.mxu0 %v8359_v60  ;;  %v8419_v60 = vld [vmem:[#allocation4 + $0xf58] ss:$20 sps:$4 sm:$0xff]  }
 0x209   :  { %5734 = vmatprep.subr.bf16.mxu0 %v8367_v22  ;;  %v8406_v22 = vld [vmem:[#allocation4 + $0x1254] ss:$20 sps:$4 sm:$0xff]  }
 0x20a   :  { %5768 = vmatpush2.bf16.msra.mxu1 %v8344_v9  ;;  %v8427_v9 = vld [vmem:[#allocation4 + $0xf34] ss:$20 sps:$4 sm:$0xff]  }
 0x20b   :  { %5769 = vmatprep.subr.bf16.mxu1 %v8352_v44 }
 0x20c   :  { %5735 = vmatpush2.bf16.msra.mxu0 %v8365_v17 }
 0x20d   :  { %5736 = vmatprep.subr.bf16.mxu0 %v8373_v27  ;;  %v8404_v27 = vld [vmem:[#allocation4 + $0x1250] ss:$20 sps:$4 sm:$0xff]  }
 0x20e   :  { %5770 = vmatpush2.bf16.msra.mxu1 %v8350_v45  ;;  %v8425_v45 = vld [vmem:[#allocation4 + $0xf30] ss:$20 sps:$4 sm:$0xff]  }
 0x20f   :  { %5771 = vmatprep.subr.bf16.mxu1 %v8358_v7  ;;  %v8433_v7 = vld [vmem:[#allocation4 + $0xf0c] ss:$20 sps:$4 sm:$0xff]  }
 0x210   :  { %5737 = vmatpush2.bf16.msra.mxu0 %v8371_v18  ;;  %v8412_v18 = vld [vmem:[#allocation4 + $0x122c] ss:$20 sps:$4 sm:$0xff]  }
 0x211   :  { %5738 = vmatprep.subr.bf16.mxu0 %v8379_v42 }
 0x212   :  { %5772 = vmatpush2.bf16.msra.mxu1 %v8356_v37  ;;  %v8410_v37 = vld [vmem:[#allocation4 + $0x1228] ss:$20 sps:$4 sm:$0xff]  }
 0x213   :  { %5773 = vmatprep.subr.bf16.mxu1 %v8364_v38  ;;  %v8418_v38 = vld [vmem:[#allocation4 + $0x1204] ss:$20 sps:$4 sm:$0xff]  }
 0x214   :  { %5739 = vmatpush2.bf16.msra.mxu0 %v8377_v59  ;;  %v8431_v59 = vld [vmem:[#allocation4 + $0xf08] ss:$20 sps:$4 sm:$0xff]  }
 0x215   :  { %5740 = vmatprep.subr.bf16.mxu0 %v8385_v6  ;;  %v8439_v6 = vld [vmem:[#allocation4 + $0x1164] ss:$20 sps:$4 sm:$0xff]  }
 0x216   :  { %5774 = vmatpush2.bf16.msra.mxu1 %v8362_v20  ;;  %v8416_v20 = vld [vmem:[#allocation4 + $0x1200] ss:$20 sps:$4 sm:$0xff]  }
 0x217   :  { %5775 = vmatprep.subr.bf16.mxu1 %v8370_v19  ;;  %v8424_v19 = vld [vmem:[#allocation4 + $0x11dc] ss:$20 sps:$4 sm:$0xff]  }
 0x218   :  { %5741 = vmatpush2.bf16.msra.mxu0 %v8383_v61  ;;  %v8437_v61 = vld [vmem:[#allocation4 + $0x1160] ss:$20 sps:$4 sm:$0xff]  }
 0x219   :  { %5792 = vmatprep.subr.bf16.mxu0 %v8391_v35  ;;  %v8445_v35 = vld [vmem:[#allocation4 + $0x113c] ss:$20 sps:$4 sm:$0xff]  }
 0x21a   :  { %5776 = vmatpush2.bf16.msra.mxu1 %v8368_v41  ;;  %v8422_v41 = vld [vmem:[#allocation4 + $0x11d8] ss:$20 sps:$4 sm:$0xff]  }
 0x21b   :  { %v5498_v31 = vpop.f32.mrf.mxu0  ;;  %5743 = vmatmul.mubr.bf16.vlgmr.msra.gmra.mxu0 %v9472_v54  ;;  %5777 = vmatprep.subr.bf16.mxu1 %v8376_v13  ;;  %v8430_v13 = vld [vmem:[#allocation4 + $0x11b4] ss:$20 sps:$4 sm:$0xff]  }
 0x21c   :  { %v5499_v1 = vadd.f32 %v5498_v31, %v9692_v32  ;;  %5793 = vmatpush1.bf16.msra.mxu0 %v8389_v23  ;;  %5824 = vmatprep.mubr.bf16.mxu0 %v9652_v34  ;;  %v8409_v32 = vld [vmem:[#allocation4 + $0xfac] ss:$20 sps:$4 sm:$0xff]   ;;  %v8428_v31 = vld [vmem:[#allocation4 + $0x11b0] ss:$20 sps:$4 sm:$0xff]  }
 0x21d   :  { %v5500_v57 = vpop.f32.mrf.mxu0  ;;  %5794 = vmatprep.subr.bf16.mxu0 %v8397_v30  ;;  %v8443_v23 = vld [vmem:[#allocation4 + $0x1138] ss:$20 sps:$4 sm:$0xff]   ;;  %v8451_v30 = vld [vmem:[#allocation4 + $0x1114] ss:$20 sps:$4 sm:$0xff]  }
 0x21e   :  { %v5501_v21 = vadd.f32 %v5500_v57, %v9694_v4  ;;  %5778 = vmatpush2.bf16.msra.mxu1 %v8374_v3  ;;  %v8415_v4 = vld [vmem:[#allocation4 + $0xf84] ss:$20 sps:$4 sm:$0xff]   ;;  %v8455_v57 = vld [vmem:[#allocation4 + $0x10e8] ss:$20 sps:$4 sm:$0xff]  }
 0x21f   :  { %v5502_v0 = vpop.f32.mrf.mxu0  ;;  %5779 = vmatprep.subr.bf16.mxu1 %v8382_v62  ;;  %v8449_v3 = vld [vmem:[#allocation4 + $0x1110] ss:$20 sps:$4 sm:$0xff]   ;;  %v8434_v62 = vld [vmem:[#allocation4 + $0x1188] ss:$20 sps:$4 sm:$0xff]  }
 0x220   :  { %5795 = vmatpush1.bf16.msra.mxu0 %v8395_v55  ;;  %v8457_v55 = vld [vmem:[#allocation4 + $0x10ec] ss:$20 sps:$4 sm:$0xff]  }
 0x221   :  { %v5503_v40 = vpop.f32.mrf.mxu0  ;;  %5796 = vmatprep.subr.bf16.mxu0 %v8403_v14  ;;  %v8442_v14 = vld [vmem:[#allocation4 + $0x13e4] ss:$20 sps:$4 sm:$0xff]   ;;  %v8440_v0 = vld [vmem:[#allocation4 + $0x13e0] ss:$20 sps:$4 sm:$0xff]  }
 0x222   :  { %5780 = vmatpush2.bf16.msra.mxu1 %v8380_v39  ;;  %v8461_v39 = vld [vmem:[#allocation4 + $0x10c0] ss:$20 sps:$4 sm:$0xff]   ;;  %v8446_v40 = vld [vmem:[#allocation4 + $0x13b8] ss:$20 sps:$4 sm:$0xff]  }
 0x223   :  { %5781 = vmatprep.subr.bf16.mxu1 %v8388_v50  ;;  %v8469_v50 = vld [vmem:[#allocation4 + $0x109c] ss:$20 sps:$4 sm:$0xff]  }
 0x224   :  { %5797 = vmatpush1.bf16.msra.mxu0 %v8401_v15  ;;  %v8448_v15 = vld [vmem:[#allocation4 + $0x13bc] ss:$20 sps:$4 sm:$0xff]  }
 0x225   :  { %5798 = vmatprep.subr.bf16.mxu0 %v8409_v32  ;;  %v8467_v32 = vld [vmem:[#allocation4 + $0x1098] ss:$20 sps:$4 sm:$0xff]  }
 0x226   :  { %5782 = vmatpush2.bf16.msra.mxu1 %v8386_v25  ;;  %v8454_v25 = vld [vmem:[#allocation4 + $0x1394] ss:$20 sps:$4 sm:$0xff]  }
 0x227   :  { %5833 = vmatprep.subr.bf16.mxu1 %v8394_v36  ;;  %v8452_v36 = vld [vmem:[#allocation4 + $0x1390] ss:$20 sps:$4 sm:$0xff]  }
 0x228   :  { %5799 = vmatpush1.bf16.msra.mxu0 %v8407_v49  ;;  %v8475_v49 = vld [vmem:[#allocation4 + $0x1074] ss:$20 sps:$4 sm:$0xff]  }
 0x229   :  { %5800 = vmatprep.subr.bf16.mxu0 %v8415_v4  ;;  %5784 = vmatmul.mubr.bf16.vlgmr.msra.gmra.mxu1 %v9553_v46  ;;  %v5539_v28 = vpop.f32.mrf.mxu1  ;;  %v8473_v4 = vld [vmem:[#allocation4 + $0x1070] ss:$20 sps:$4 sm:$0xff]  }
 0x22a   :  { %5834 = vmatpush1.bf16.msra.mxu1 %v8392_v2  ;;  %v9702_v51 = vadd.f32 %v5539_v28, %v5499_v1  ;;  %5865 = vmatprep.mubr.bf16.mxu1 %v9660_v24  ;;  %v8436_v1 = vld [vmem:[#allocation4 + $0x118c] ss:$20 sps:$4 sm:$0xff]   ;;  %v8485_v28 = vld [vmem:[#allocation4 + $0x268] ss:$20 sps:$4 sm:$0xff]  }
 0x22b   :  { %v5541_v11 = vpop.f32.mrf.mxu1  ;;  %5835 = vmatprep.subr.bf16.mxu1 %v8400_v47  ;;  %v8460_v2 = vld [vmem:[#allocation4 + $0x136c] ss:$20 sps:$4 sm:$0xff]  }
 0x22c   :  { %5801 = vmatpush1.bf16.msra.mxu0 %v8413_v52  ;;  %v9704_v17 = vadd.f32 %v5541_v11, %v5501_v21  ;;  %v8463_v21 = vld [vmem:[#allocation4 + $0x10c4] ss:$20 sps:$4 sm:$0xff]   ;;  %v8481_v47 = vld [vmem:[#allocation4 + $0x104c] ss:$20 sps:$4 sm:$0xff]   ;;  %v8458_v52 = vld [vmem:[#allocation4 + $0x1368] ss:$20 sps:$4 sm:$0xff]  }
 0x22d   :  { %5802 = vmatprep.subr.bf16.mxu0 %v8421_v33  ;;  %v5543_v44 = vpop.f32.mrf.mxu1  ;;  %v8479_v33 = vld [vmem:[#allocation4 + $0x1048] ss:$20 sps:$4 sm:$0xff]  }
 0x22e   :  { %5836 = vmatpush1.bf16.msra.mxu1 %v8398_v16  ;;  %v8466_v16 = vld [vmem:[#allocation4 + $0x1344] ss:$20 sps:$4 sm:$0xff]   ;;  %v8487_v11 = vld [vmem:[#allocation4 + $0x128] ss:$20 sps:$4 sm:$0xff]  }
 0x22f   :  { %5837 = vmatprep.subr.bf16.mxu1 %v8406_v22  ;;  %v5544_v42 = vpop.f32.mrf.mxu1  ;;  %v8472_v22 = vld [vmem:[#allocation4 + $0x131c] ss:$20 sps:$4 sm:$0xff]  }
 0x230   :  { %5803 = vmatpush1.bf16.msra.mxu0 %v8419_v60  ;;  %v8464_v60 = vld [vmem:[#allocation4 + $0x1340] ss:$20 sps:$4 sm:$0xff]   ;;  %v8493_v42 = vld [vmem:[#allocation4 + $0x218] ss:$20 sps:$4 sm:$0xff]  }
 0x231   :  { %5804 = vmatprep.subr.bf16.mxu0 %v8427_v9  ;;  %v8489_v9 = vld [vmem:[#allocation4 + $0x240] ss:$20 sps:$4 sm:$0xff]  }
 0x232   :  { %5838 = vmatpush1.bf16.msra.mxu1 %v8404_v27  ;;  %v8470_v27 = vld [vmem:[#allocation4 + $0x1318] ss:$20 sps:$4 sm:$0xff]  }
 0x233   :  { %5839 = vmatprep.subr.bf16.mxu1 %v8412_v18  ;;  %v8478_v18 = vld [vmem:[#allocation4 + $0x12f4] ss:$20 sps:$4 sm:$0xff]  }
 0x234   :  { %5805 = vmatpush1.bf16.msra.mxu0 %v8425_v45  ;;  %v8491_v45 = vld [vmem:[#allocation4 + $0x100] ss:$20 sps:$4 sm:$0xff]  }
 0x235   :  { %5806 = vmatprep.subr.bf16.mxu0 %v8433_v7 }
 0x236   :  { %5840 = vmatpush1.bf16.msra.mxu1 %v8410_v37 }
 0x237   :  { %5841 = vmatprep.subr.bf16.mxu1 %v8418_v38  ;;  %v8495_v38 = vld [vmem:[#allocation4 + $0xd8] ss:$20 sps:$4 sm:$0xff]  }
 0x238   :  { %5807 = vmatpush1.bf16.msra.mxu0 %v8431_v59  ;;  %v8476_v59 = vld [vmem:[#allocation4 + $0x12f0] ss:$20 sps:$4 sm:$0xff]  }
 0x239   :  { %5808 = vmatprep.subr.bf16.mxu0 %v8439_v6  ;;  %v8484_v6 = vld [vmem:[#allocation4 + $0x12cc] ss:$20 sps:$4 sm:$0xff]  }
 0x23a   :  { %5842 = vmatpush1.bf16.msra.mxu1 %v8416_v20 }
 0x23b   :  { %5843 = vmatprep.subr.bf16.mxu1 %v8424_v19  ;;  %v8482_v19 = vld [vmem:[#allocation4 + $0x12c8] ss:$20 sps:$4 sm:$0xff]  }
 0x23c   :  { %5809 = vmatpush2.bf16.msra.mxu0 %v8437_v61  ;;  %v8497_v61 = vld [vmem:[#allocation4 + $0x1f0] ss:$20 sps:$4 sm:$0xff]  }
 0x23d   :  { %5810 = vmatprep.subr.bf16.mxu0 %v8445_v35  ;;  %v8499_v35 = vld [vmem:[#allocation4 + $0xb0] ss:$20 sps:$4 sm:$0xff]  }
 0x23e   :  { %5844 = vmatpush1.bf16.msra.mxu1 %v8422_v41  ;;  %v8486_v41 = vld [vmem:[#allocation4 + $0x4e8] ss:$20 sps:$4 sm:$0xff]  }
 0x23f   :  { %5845 = vmatprep.subr.bf16.mxu1 %v8430_v13  ;;  %v8503_v13 = vld [vmem:[#allocation4 + $0x88] ss:$20 sps:$4 sm:$0xff]  }
 0x240   :  { %5811 = vmatpush2.bf16.msra.mxu0 %v8443_v23  ;;  %v8501_v23 = vld [vmem:[#allocation4 + $0x1c8] ss:$20 sps:$4 sm:$0xff]  }
 0x241   :  { %5812 = vmatprep.subr.bf16.mxu0 %v8451_v30  ;;  %v8490_v30 = vld [vmem:[#allocation4 + $0x4c0] ss:$20 sps:$4 sm:$0xff]  }
 0x242   :  { %5846 = vmatpush1.bf16.msra.mxu1 %v8428_v31  ;;  %v8505_v31 = vld [vmem:[#allocation4 + $0x1a0] ss:$20 sps:$4 sm:$0xff]  }
 0x243   :  { %5847 = vmatprep.subr.bf16.mxu1 %v8436_v1 }
 0x244   :  { %5813 = vmatpush2.bf16.msra.mxu0 %v8449_v3 }
 0x245   :  { %5814 = vmatprep.subr.bf16.mxu0 %v8457_v55  ;;  %v8492_v55 = vld [vmem:[#allocation4 + $0x380] ss:$20 sps:$4 sm:$0xff]  }
 0x246   :  { %5848 = vmatpush1.bf16.msra.mxu1 %v8434_v62  ;;  %v8507_v62 = vld [vmem:[#allocation4 + $0x60] ss:$20 sps:$4 sm:$0xff]  }
 0x247   :  { %5849 = vmatprep.subr.bf16.mxu1 %v8442_v14  ;;  %v8494_v14 = vld [vmem:[#allocation4 + $0x498] ss:$20 sps:$4 sm:$0xff]  }
 0x248   :  { %5815 = vmatpush2.bf16.msra.mxu0 %v8455_v57 }
 0x249   :  { %5816 = vmatprep.subr.bf16.mxu0 %v8463_v21  ;;  %v8509_v21 = vld [vmem:[#allocation4 + $0x178] ss:$20 sps:$4 sm:$0xff]  }
 0x24a   :  { %5850 = vmatpush2.bf16.msra.mxu1 %v8440_v0 }
 0x24b   :  { %5851 = vmatprep.subr.bf16.mxu1 %v8448_v15  ;;  %v8496_v15 = vld [vmem:[#allocation4 + $0x358] ss:$20 sps:$4 sm:$0xff]  }
 0x24c   :  { %5817 = vmatpush2.bf16.msra.mxu0 %v8461_v39 }
 0x24d   :  { %5818 = vmatprep.subr.bf16.mxu0 %v8469_v50  ;;  %v8511_v50 = vld [vmem:[#allocation4 + $0x38] ss:$20 sps:$4 sm:$0xff]  }
 0x24e   :  { %5852 = vmatpush2.bf16.msra.mxu1 %v8446_v40  ;;  %v8498_v40 = vld [vmem:[#allocation4 + $0x470] ss:$20 sps:$4 sm:$0xff]  }
 0x24f   :  { %5853 = vmatprep.subr.bf16.mxu1 %v8454_v25 }
 0x250   :  { %5819 = vmatpush2.bf16.msra.mxu0 %v8467_v32  ;;  %v8513_v32 = vld [vmem:[#allocation4 + $0x150] ss:$20 sps:$4 sm:$0xff]  }
 0x251   :  { %5820 = vmatprep.subr.bf16.mxu0 %v8475_v49  ;;  %v8500_v49 = vld [vmem:[#allocation4 + $0x330] ss:$20 sps:$4 sm:$0xff]  }
 0x252   :  { %5854 = vmatpush2.bf16.msra.mxu1 %v8452_v36  ;;  %v8515_v36 = vld [vmem:[#allocation4 + $0x10] ss:$20 sps:$4 sm:$0xff]  }
 0x253   :  { %5855 = vmatprep.subr.bf16.mxu1 %v8460_v2  ;;  %v8517_v2 = vld [vmem:[#allocation4 + $0x768] ss:$20 sps:$4 sm:$0xff]  }
 0x254   :  { %5821 = vmatpush2.bf16.msra.mxu0 %v8473_v4  ;;  %v8502_v4 = vld [vmem:[#allocation4 + $0x448] ss:$20 sps:$4 sm:$0xff]  }
 0x255   :  { %5822 = vmatprep.subr.bf16.mxu0 %v8481_v47  ;;  %v8519_v47 = vld [vmem:[#allocation4 + $0x628] ss:$20 sps:$4 sm:$0xff]  }
 0x256   :  { %5856 = vmatpush2.bf16.msra.mxu1 %v8458_v52  ;;  %v8506_v52 = vld [vmem:[#allocation4 + $0x420] ss:$20 sps:$4 sm:$0xff]  }
 0x257   :  { %5857 = vmatprep.subr.bf16.mxu1 %v8466_v16  ;;  %v8508_v16 = vld [vmem:[#allocation4 + $0x2e0] ss:$20 sps:$4 sm:$0xff]  }
 0x258   :  { %5823 = vmatpush2.bf16.msra.mxu0 %v8479_v33  ;;  %v8521_v33 = vld [vmem:[#allocation4 + $0x740] ss:$20 sps:$4 sm:$0xff]  }
 0x259   :  { %7406 = vmatprep.subr.bf16.mxu0 %v8485_v28  ;;  %v8523_v28 = vld [vmem:[#allocation4 + $0x600] ss:$20 sps:$4 sm:$0xff]  }
 0x25a   :  { %5858 = vmatpush2.bf16.msra.mxu1 %v8464_v60  ;;  %v8510_v60 = vld [vmem:[#allocation4 + $0x3f8] ss:$20 sps:$4 sm:$0xff]  }
 0x25b   :  { %v5580_v44 = vpop.f32.mrf.mxu0  ;;  %5825 = vmatmul.mubr.bf16.vlgmr.msra.gmra.mxu0 %v9664_v8  ;;  %5859 = vmatprep.subr.bf16.mxu1 %v8472_v22  ;;  %v8512_v22 = vld [vmem:[#allocation4 + $0x2b8] ss:$20 sps:$4 sm:$0xff]  }
 0x25c   :  { %7407 = vmatpush3.bf16.msra.mxu0 %v8487_v11  ;;  %5906 = vmatprep.mubr.bf16.mxu0 %v8994_v10  ;;  %v8488_v10 = vld [vmem:[#allocation4 + $0x3a8] ss:$20 sps:$4 sm:$0xff]   ;;  %v8525_v11 = vld [vmem:[#allocation4 + $0x718] ss:$20 sps:$4 sm:$0xff]  }
 0x25d   :  { %v5582_v7 = vpop.f32.mrf.mxu0  ;;  %7408 = vmatprep.subr.bf16.mxu0 %v8489_v9  ;;  %v8527_v9 = vld [vmem:[#allocation4 + $0x5d8] ss:$20 sps:$4 sm:$0xff]  }
 0x25e   :  { %5860 = vmatpush2.bf16.msra.mxu1 %v8470_v27  ;;  %v8529_v27 = vld [vmem:[#allocation4 + $0x6f0] ss:$20 sps:$4 sm:$0xff]  }
 0x25f   :  { %v5584_v37 = vpop.f32.mrf.mxu0  ;;  %5861 = vmatprep.subr.bf16.mxu1 %v8478_v18  ;;  %v8518_v18 = vld [vmem:[#allocation4 + $0x9e8] ss:$20 sps:$4 sm:$0xff]  }
 0x260   :  { %7409 = vmatpush3.bf16.msra.mxu0 %v8491_v45  ;;  %v8531_v45 = vld [vmem:[#allocation4 + $0x5b0] ss:$20 sps:$4 sm:$0xff]   ;;  %v8522_v37 = vld [vmem:[#allocation4 + $0x9c0] ss:$20 sps:$4 sm:$0xff]  }
 0x261   :  { %v5585_v20 = vpop.f32.mrf.mxu0  ;;  %7410 = vmatprep.subr.bf16.mxu0 %v8493_v42  ;;  %v8520_v42 = vld [vmem:[#allocation4 + $0x8a8] ss:$20 sps:$4 sm:$0xff]  }
 0x262   :  { %5862 = vmatpush2.bf16.msra.mxu1 %v8476_v59  ;;  %v8537_v59 = vld [vmem:[#allocation4 + $0x6a0] ss:$20 sps:$4 sm:$0xff]   ;;  %v8526_v20 = vld [vmem:[#allocation4 + $0x998] ss:$20 sps:$4 sm:$0xff]  }
 0x263   :  { %5863 = vmatprep.subr.bf16.mxu1 %v8484_v6  ;;  %v8539_v6 = vld [vmem:[#allocation4 + $0x560] ss:$20 sps:$4 sm:$0xff]  }
 0x264   :  { %7411 = vmatpush3.bf16.msra.mxu0 %v8495_v38  ;;  %v8524_v38 = vld [vmem:[#allocation4 + $0x880] ss:$20 sps:$4 sm:$0xff]  }
 0x265   :  { %7412 = vmatprep.subr.bf16.mxu0 %v8497_v61  ;;  %v8541_v61 = vld [vmem:[#allocation4 + $0x678] ss:$20 sps:$4 sm:$0xff]  }
 0x266   :  { %5864 = vmatpush2.bf16.msra.mxu1 %v8482_v19  ;;  %v8528_v19 = vld [vmem:[#allocation4 + $0x858] ss:$20 sps:$4 sm:$0xff]  }
 0x267   :  { %7428 = vmatprep.subr.bf16.mxu1 %v8486_v41  ;;  %v8530_v41 = vld [vmem:[#allocation4 + $0x970] ss:$20 sps:$4 sm:$0xff]  }
 0x268   :  { %7413 = vmatpush3.bf16.msra.mxu0 %v8499_v35  ;;  %v8543_v35 = vld [vmem:[#allocation4 + $0x538] ss:$20 sps:$4 sm:$0xff]  }
 0x269   :  { %7414 = vmatprep.subr.bf16.mxu0 %v8501_v23  ;;  %v5621_v3 = vpop.f32.mrf.mxu1  ;;  %5866 = vmatmul.mubr.bf16.vlgmr.msra.gmra.mxu1 %v9669_v58  ;;  %v8545_v23 = vld [vmem:[#allocation4 + $0x650] ss:$20 sps:$4 sm:$0xff]  }
 0x26a   :  { %v9710_v1 = vadd.f32 %v5621_v3, %v5580_v44  ;;  %7429 = vmatpush3.bf16.msra.mxu1 %v8488_v10  ;;  %5946 = vmatprep.mubr.bf16.mxu1 %v9002_v53  ;;  %v8504_v53 = vld [vmem:[#allocation4 + $0x308] ss:$20 sps:$4 sm:$0xff]   ;;  %v8514_v44 = vld [vmem:[#allocation4 + $0x3d0] ss:$20 sps:$4 sm:$0xff]   ;;  %v8538_v3 = vld [vmem:[#allocation4 + $0x920] ss:$20 sps:$4 sm:$0xff]  }
 0x26b   :  { %v5623_v57 = vpop.f32.mrf.mxu1  ;;  %7430 = vmatprep.subr.bf16.mxu1 %v8490_v30  ;;  %v8547_v10 = vld [vmem:[#allocation4 + $0x510] ss:$20 sps:$4 sm:$0xff]   ;;  %v8549_v30 = vld [vmem:[#allocation4 + $0xc68] ss:$20 sps:$4 sm:$0xff]  }
 0x26c   :  { %7415 = vmatpush3.bf16.msra.mxu0 %v8503_v13  ;;  %v9712_v0 = vadd.f32 %v5623_v57, %v5582_v7  ;;  %v8533_v7 = vld [vmem:[#allocation4 + $0x6c8] ss:$20 sps:$4 sm:$0xff]   ;;  %v8540_v57 = vld [vmem:[#allocation4 + $0x7e0] ss:$20 sps:$4 sm:$0xff]  }
 0x26d   :  { %7416 = vmatprep.subr.bf16.mxu0 %v8505_v31  ;;  %v5625_v39 = vpop.f32.mrf.mxu1  ;;  %v8534_v13 = vld [vmem:[#allocation4 + $0x948] ss:$20 sps:$4 sm:$0xff]  }
 0x26e   :  { %7431 = vmatpush3.bf16.msra.mxu1 %v8492_v55  ;;  %v8536_v31 = vld [vmem:[#allocation4 + $0x808] ss:$20 sps:$4 sm:$0xff]   ;;  %v8553_v55 = vld [vmem:[#allocation4 + $0xc40] ss:$20 sps:$4 sm:$0xff]   ;;  %v8542_v39 = vld [vmem:[#allocation4 + $0x8f8] ss:$20 sps:$4 sm:$0xff]  }
 0x26f   :  { %7432 = vmatprep.subr.bf16.mxu1 %v8494_v14  ;;  %v5626_v25 = vpop.f32.mrf.mxu1 }
 0x270   :  { %7417 = vmatpush3.bf16.msra.mxu0 %v8507_v62  ;;  %v8544_v25 = vld [vmem:[#allocation4 + $0x7b8] ss:$20 sps:$4 sm:$0xff]  }
 0x271   :  { %7418 = vmatprep.subr.bf16.mxu0 %v8509_v21  ;;  %v8555_v21 = vld [vmem:[#allocation4 + $0xb00] ss:$20 sps:$4 sm:$0xff]  }
 0x272   :  { %7433 = vmatpush3.bf16.msra.mxu1 %v8496_v15 }
 0x273   :  { %7434 = vmatprep.subr.bf16.mxu1 %v8498_v40 }
 0x274   :  { %7419 = vmatpush3.bf16.msra.mxu0 %v8511_v50  ;;  %v8557_v50 = vld [vmem:[#allocation4 + $0xc18] ss:$20 sps:$4 sm:$0xff]  }
 0x275   :  { %7420 = vmatprep.subr.bf16.mxu0 %v8513_v32 }
 0x276   :  { %7435 = vmatpush3.bf16.msra.mxu1 %v8500_v49  ;;  %v8546_v49 = vld [vmem:[#allocation4 + $0x8d0] ss:$20 sps:$4 sm:$0xff]  }
 0x277   :  { %7436 = vmatprep.subr.bf16.mxu1 %v8502_v4  ;;  %v8548_v4 = vld [vmem:[#allocation4 + $0x790] ss:$20 sps:$4 sm:$0xff]  }
 0x278   :  { %7421 = vmatpush3.bf16.msra.mxu0 %v8515_v36 }
 0x279   :  { %7450 = vmatprep.subr.bf16.mxu0 %v8517_v2  ;;  %v8563_v2 = vld [vmem:[#allocation4 + $0xab0] ss:$20 sps:$4 sm:$0xff]  }
 0x27a   :  { %7437 = vmatpush3.bf16.msra.mxu1 %v8504_v53  ;;  %v8550_v53 = vld [vmem:[#allocation4 + $0xee8] ss:$20 sps:$4 sm:$0xff]  }
 0x27b   :  { %5907 = vmatmul.mubr.bf16.vlgmr.msra.gmra.mxu0 %v9006_v43  ;;  %7438 = vmatprep.subr.bf16.mxu1 %v8506_v52  ;;  %v8516_v43 = vld [vmem:[#allocation4 + $0x290] ss:$20 sps:$4 sm:$0xff]   ;;  %v8554_v52 = vld [vmem:[#allocation4 + $0xec0] ss:$20 sps:$4 sm:$0xff]  }
 0x27c   :  { %7451 = vmatpush3.bf16.msra.mxu0 %v8519_v47  ;;  %5986 = vmatprep.mubr.bf16.mxu0 %v9244_v56  ;;  %v8535_v56 = vld [vmem:[#allocation4 + $0x588] ss:$20 sps:$4 sm:$0xff]  }
 0x27d   :  { %7452 = vmatprep.subr.bf16.mxu0 %v8521_v33  ;;  %v8567_v47 = vld [vmem:[#allocation4 + $0xa88] ss:$20 sps:$4 sm:$0xff]   ;;  %v8569_v33 = vld [vmem:[#allocation4 + $0xba0] ss:$20 sps:$4 sm:$0xff]  }
 0x27e   :  { %7439 = vmatpush3.bf16.msra.mxu1 %v8508_v16 }
 0x27f   :  { %7440 = vmatprep.subr.bf16.mxu1 %v8510_v60  ;;  %v8556_v60 = vld [vmem:[#allocation4 + $0xd80] ss:$20 sps:$4 sm:$0xff]  }
 0x280   :  { %7453 = vmatpush3.bf16.msra.mxu0 %v8523_v28 }
 0x281   :  { %7454 = vmatprep.subr.bf16.mxu0 %v8525_v11  ;;  %v8571_v11 = vld [vmem:[#allocation4 + $0xa60] ss:$20 sps:$4 sm:$0xff]  }
 0x282   :  { %7441 = vmatpush3.bf16.msra.mxu1 %v8512_v22 }
 0x283   :  { %7442 = vmatprep.subr.bf16.mxu1 %v8514_v44  ;;  %v8573_v44 = vld [vmem:[#allocation4 + $0xb78] ss:$20 sps:$4 sm:$0xff]  }
 0x284   :  { %7455 = vmatpush3.bf16.msra.mxu0 %v8527_v9  ;;  %v8558_v9 = vld [vmem:[#allocation4 + $0xe98] ss:$20 sps:$4 sm:$0xff]  }
 0x285   :  { %7456 = vmatprep.subr.bf16.mxu0 %v8529_v27 }
 0x286   :  { %7443 = vmatpush3.bf16.msra.mxu1 %v8516_v43 }
 0x287   :  { %7472 = vmatprep.subr.bf16.mxu1 %v8518_v18  ;;  %v8562_v18 = vld [vmem:[#allocation4 + $0xe70] ss:$20 sps:$4 sm:$0xff]  }
 0x288   :  { %7457 = vmatpush3.bf16.msra.mxu0 %v8531_v45  ;;  %v8560_v45 = vld [vmem:[#allocation4 + $0xd58] ss:$20 sps:$4 sm:$0xff]  }
 0x289   :  { %7458 = vmatprep.subr.bf16.mxu0 %v8533_v7  ;;  %5947 = vmatmul.mubr.bf16.vlgmr.msra.gmra.mxu1 %v9085_v63  ;;  %v8532_v63 = vld [vmem:[#allocation4 + $0x830] ss:$20 sps:$4 sm:$0xff]  }
 0x28a   :  { %7473 = vmatpush3.bf16.msra.mxu1 %v8520_v42  ;;  %6026 = vmatprep.mubr.bf16.mxu1 %v9266_v48  ;;  %v8551_v48 = vld [vmem:[#allocation4 + $0xb28] ss:$20 sps:$4 sm:$0xff]   ;;  %v8577_v7 = vld [vmem:[#allocation4 + $0xb50] ss:$20 sps:$4 sm:$0xff]  }
 0x28b   :  { %7474 = vmatprep.subr.bf16.mxu1 %v8522_v37  ;;  %v8579_v37 = vld [vmem:[#allocation4 + $0xa10] ss:$20 sps:$4 sm:$0xff]  }
 0x28c   :  { %7459 = vmatpush3.bf16.msra.mxu0 %v8535_v56  ;;  %v8564_v56 = vld [vmem:[#allocation4 + $0xd30] ss:$20 sps:$4 sm:$0xff]  }
 0x28d   :  { %7460 = vmatprep.subr.bf16.mxu0 %v8537_v59  ;;  %v8566_v59 = vld [vmem:[#allocation4 + $0xe48] ss:$20 sps:$4 sm:$0xff]  }
 0x28e   :  { %7475 = vmatpush3.bf16.msra.mxu1 %v8524_v38  ;;  %v8581_v38 = vld [vmem:[#allocation4 + $0x1168] ss:$20 sps:$4 sm:$0xff]  }
 0x28f   :  { %7476 = vmatprep.subr.bf16.mxu1 %v8526_v20  ;;  %v8570_v20 = vld [vmem:[#allocation4 + $0xe20] ss:$20 sps:$4 sm:$0xff]  }
 0x290   :  { %7461 = vmatpush3.bf16.msra.mxu0 %v8539_v6  ;;  %v8583_v6 = vld [vmem:[#allocation4 + $0x1028] ss:$20 sps:$4 sm:$0xff]  }
 0x291   :  { %7462 = vmatprep.subr.bf16.mxu0 %v8541_v61  ;;  %v8585_v61 = vld [vmem:[#allocation4 + $0x1140] ss:$20 sps:$4 sm:$0xff]  }
 0x292   :  { %7477 = vmatpush3.bf16.msra.mxu1 %v8528_v19  ;;  %v8572_v19 = vld [vmem:[#allocation4 + $0xce0] ss:$20 sps:$4 sm:$0xff]  }
 0x293   :  { %7478 = vmatprep.subr.bf16.mxu1 %v8530_v41  ;;  %v8574_v41 = vld [vmem:[#allocation4 + $0xdf8] ss:$20 sps:$4 sm:$0xff]  }
 0x294   :  { %7463 = vmatpush3.bf16.msra.mxu0 %v8543_v35  ;;  %v8587_v35 = vld [vmem:[#allocation4 + $0x1000] ss:$20 sps:$4 sm:$0xff]  }
 0x295   :  { %7464 = vmatprep.subr.bf16.mxu0 %v8545_v23  ;;  %v8589_v23 = vld [vmem:[#allocation4 + $0x1118] ss:$20 sps:$4 sm:$0xff]  }
 0x296   :  { %7479 = vmatpush3.bf16.msra.mxu1 %v8532_v63  ;;  %v8576_v63 = vld [vmem:[#allocation4 + $0xcb8] ss:$20 sps:$4 sm:$0xff]  }
 0x297   :  { %7480 = vmatprep.subr.bf16.mxu1 %v8534_v13  ;;  %v8578_v13 = vld [vmem:[#allocation4 + $0xdd0] ss:$20 sps:$4 sm:$0xff]  }
 0x298   :  { %7465 = vmatpush3.bf16.msra.mxu0 %v8547_v10  ;;  %v8591_v10 = vld [vmem:[#allocation4 + $0xfd8] ss:$20 sps:$4 sm:$0xff]  }
 0x299   :  { %7494 = vmatprep.subr.bf16.mxu0 %v8549_v30  ;;  %v8593_v30 = vld [vmem:[#allocation4 + $0x10f0] ss:$20 sps:$4 sm:$0xff]  }
 0x29a   :  { %7481 = vmatpush3.bf16.msra.mxu1 %v8536_v31  ;;  %v8595_v31 = vld [vmem:[#allocation4 + $0xfb0] ss:$20 sps:$4 sm:$0xff]  }
 0x29b   :  { %v5662_v62 = vpop.f32.mrf.mxu0  ;;  %5987 = vmatmul.mubr.bf16.vlgmr.msra.gmra.mxu0 %v9258_v26  ;;  %7482 = vmatprep.subr.bf16.mxu1 %v8538_v3  ;;  %v8559_v26 = vld [vmem:[#allocation4 + $0xad8] ss:$20 sps:$4 sm:$0xff]   ;;  %v8597_v3 = vld [vmem:[#allocation4 + $0x10c8] ss:$20 sps:$4 sm:$0xff]  }
 0x29c   :  { %v5663_v14 = vadd.f32 %v5662_v62, %v9710_v1  ;;  %7495 = vmatpush3.bf16.msra.mxu0 %v8551_v48  ;;  %6066 = vmatprep.mubr.bf16.mxu0 %v9450_v29  ;;  %v8561_v1 = vld [vmem:[#allocation4 + $0xbf0] ss:$20 sps:$4 sm:$0xff]   ;;  %v8552_v29 = vld [vmem:[#allocation4 + $0xda8] ss:$20 sps:$4 sm:$0xff]   ;;  %v8586_v62 = vld [vmem:[#allocation4 + $0x13c0] ss:$20 sps:$4 sm:$0xff]  }
 0x29d   :  { %v5664_v15 = vpop.f32.mrf.mxu0  ;;  %7496 = vmatprep.subr.bf16.mxu0 %v8553_v55  ;;  %v8582_v48 = vld [vmem:[#allocation4 + $0x13e8] ss:$20 sps:$4 sm:$0xff]  }
 0x29e   :  { %v5665_v40 = vadd.f32 %v5664_v15, %v9712_v0  ;;  %7483 = vmatpush3.bf16.msra.mxu1 %v8540_v57  ;;  %v8565_v0 = vld [vmem:[#allocation4 + $0xbc8] ss:$20 sps:$4 sm:$0xff]   ;;  %v8601_v57 = vld [vmem:[#allocation4 + $0x10a0] ss:$20 sps:$4 sm:$0xff]   ;;  %v8605_v15 = vld [vmem:[#allocation4 + $0x1078] ss:$20 sps:$4 sm:$0xff]  }
 0x29f   :  { %v5666_v32 = vpop.f32.mrf.mxu0  ;;  %7484 = vmatprep.subr.bf16.mxu1 %v8542_v39  ;;  %v8584_v55 = vld [vmem:[#allocation4 + $0x12a8] ss:$20 sps:$4 sm:$0xff]   ;;  %v8590_v39 = vld [vmem:[#allocation4 + $0x1398] ss:$20 sps:$4 sm:$0xff]  }
 0x2a0   :  { %7497 = vmatpush3.bf16.msra.mxu0 %v8555_v21  ;;  %v8603_v21 = vld [vmem:[#allocation4 + $0xf60] ss:$20 sps:$4 sm:$0xff]   ;;  %v8594_v32 = vld [vmem:[#allocation4 + $0x1370] ss:$20 sps:$4 sm:$0xff]  }
 0x2a1   :  { %v5667_v36 = vpop.f32.mrf.mxu0  ;;  %7498 = vmatprep.subr.bf16.mxu0 %v8557_v50  ;;  %v8592_v50 = vld [vmem:[#allocation4 + $0x1258] ss:$20 sps:$4 sm:$0xff]  }
 0x2a2   :  { %7485 = vmatpush3.bf16.msra.mxu1 %v8544_v25  ;;  %v8609_v25 = vld [vmem:[#allocation4 + $0x1050] ss:$20 sps:$4 sm:$0xff]  }
 0x2a3   :  { %7486 = vmatprep.subr.bf16.mxu1 %v8546_v49  ;;  %v8598_v49 = vld [vmem:[#allocation4 + $0x1348] ss:$20 sps:$4 sm:$0xff]   ;;  %v953_v36 = vld [vmem:[#allocation2 + $0x260] sm:$0xff] }
 0x2a4   :  { %7499 = vmatpush3.bf16.msra.mxu0 %v8559_v26  ;;  %v8611_v26 = vld [vmem:[#allocation4 + $0xf10] ss:$20 sps:$4 sm:$0xff]  }
 0x2a5   :  { %7500 = vmatprep.subr.bf16.mxu0 %v8561_v1  ;;  %v8600_v1 = vld [vmem:[#allocation4 + $0x1208] ss:$20 sps:$4 sm:$0xff]  }
 0x2a6   :  { %7487 = vmatpush3.bf16.msra.mxu1 %v8548_v4  ;;  %v8602_v4 = vld [vmem:[#allocation4 + $0x1320] ss:$20 sps:$4 sm:$0xff]  }
 0x2a7   :  { %7516 = vmatprep.subr.bf16.mxu1 %v8550_v53  ;;  %v948_v53 = vld [vmem:[#allocation2 + $0x238] sm:$0xff] }
 0x2a8   :  { %7501 = vmatpush3.bf16.msra.mxu0 %v8563_v2  ;;  %v952_v2 = vld [vmem:[#allocation2 + $0x258] sm:$0xff] }
 0x2a9   :  { %7502 = vmatprep.subr.bf16.mxu0 %v8565_v0  ;;  %6027 = vmatmul.mubr.bf16.vlgmr.msra.gmra.mxu1 %v9326_v5  ;;  %v5703_v16 = vpop.f32.mrf.mxu1  ;;  %v8575_v5 = vld [vmem:[#allocation4 + $0xa38] ss:$20 sps:$4 sm:$0xff]  }
 0x2aa   :  { %7517 = vmatpush3.bf16.msra.mxu1 %v8552_v29  ;;  %v9724_v28 = vadd.f32 %v5703_v16, %v5663_v14  ;;  %6106 = vmatprep.mubr.bf16.mxu1 %v9461_v12  ;;  %v8568_v12 = vld [vmem:[#allocation4 + $0xd08] ss:$20 sps:$4 sm:$0xff]   ;;  %v8588_v14 = vld [vmem:[#allocation4 + $0x1280] ss:$20 sps:$4 sm:$0xff]  }
 0x2ab   :  { %v5705_v22 = vpop.f32.mrf.mxu1  ;;  %7518 = vmatprep.subr.bf16.mxu1 %v8554_v52  ;;  %v8604_v52 = vld [vmem:[#allocation4 + $0x11e0] ss:$20 sps:$4 sm:$0xff]  }
 0x2ac   :  { %7503 = vmatpush3.bf16.msra.mxu0 %v8567_v47  ;;  %v9726_v27 = vadd.f32 %v5705_v22, %v5665_v40  ;;  %v8607_v40 = vld [vmem:[#allocation4 + $0xf38] ss:$20 sps:$4 sm:$0xff]   ;;  %v947_v47 = vld [vmem:[#allocation2 + $0x230] sm:$0xff] }
 0x2ad   :  { %7504 = vmatprep.subr.bf16.mxu0 %v8569_v33  ;;  %v5707_v43 = vpop.f32.mrf.mxu1  ;;  %v943_v16 = vld [vmem:[#allocation2 + $0x210] sm:$0xff]  ;;  %v942_v22 = vld [vmem:[#allocation2 + $0x208] sm:$0xff] }
 0x2ae   :  { %7519 = vmatpush3.bf16.msra.mxu1 %v8556_v60  ;;  %v8606_v60 = vld [vmem:[#allocation4 + $0x12f8] ss:$20 sps:$4 sm:$0xff]   ;;  %v937_v43 = vld [vmem:[#allocation2 + $0x1e0] sm:$0xff] }
 0x2af   :  { %7520 = vmatprep.subr.bf16.mxu1 %v8558_v9  ;;  %v5708_v42 = vpop.f32.mrf.mxu1 }
 0x2b0   :  { %7505 = vmatpush3.bf16.msra.mxu0 %v8571_v11  ;;  %v928_v42 = vld [vmem:[#allocation2 + $0x198] sm:$0xff] }
 0x2b1   :  { %7506 = vmatprep.subr.bf16.mxu0 %v8573_v44  ;;  %v938_v44 = vld [vmem:[#allocation2 + $0x1e8] sm:$0xff] }
 0x2b2   :  { %7521 = vmatpush3.bf16.msra.mxu1 %v8560_v45  ;;  %v8608_v45 = vld [vmem:[#allocation4 + $0x11b8] ss:$20 sps:$4 sm:$0xff]  }
 0x2b3   :  { %7522 = vmatprep.subr.bf16.mxu1 %v8562_v18 }
 0x2b4   :  { %7507 = vmatpush3.bf16.msra.mxu0 %v8575_v5  ;;  %v8610_v5 = vld [vmem:[#allocation4 + $0x12d0] ss:$20 sps:$4 sm:$0xff]  }
 0x2b5   :  { %7508 = vmatprep.subr.bf16.mxu0 %v8577_v7  ;;  %v932_v7 = vld [vmem:[#allocation2 + $0x1b8] sm:$0xff] }
 0x2b6   :  { %7523 = vmatpush3.bf16.msra.mxu1 %v8564_v56  ;;  %v8612_v56 = vld [vmem:[#allocation4 + $0x1190] ss:$20 sps:$4 sm:$0xff]  }
 0x2b7   :  { %7524 = vmatprep.subr.bf16.mxu1 %v8566_v59  ;;  %v922_v59 = vld [vmem:[#allocation2 + $0x168] sm:$0xff] }
 0x2b8   :  { %7509 = vmatpush3.bf16.msra.mxu0 %v8579_v37  ;;  %v923_v37 = vld [vmem:[#allocation2 + $0x170] sm:$0xff] }
 0x2b9   :  { %7538 = vmatprep.subr.bf16.mxu0 %v8581_v38  ;;  %v955_v38 = vld [vmem:[#allocation2 + $0x270] sm:$0xff] }
 0x2ba   :  { %7525 = vmatpush3.bf16.msra.mxu1 %v8568_v12  ;;  %v918_v12 = vld [vmem:[#allocation2 + $0x148] sm:$0xff] }
 0x2bb   :  { %6067 = vmatmul.mubr.bf16.vlgmr.msra.gmra.mxu0 %v9472_v54  ;;  %7526 = vmatprep.subr.bf16.mxu1 %v8570_v20  ;;  %v8580_v54 = vld [vmem:[#allocation4 + $0xc90] ss:$20 sps:$4 sm:$0xff]  }
 0x2bc   :  { %7539 = vmatpush3.bf16.msra.mxu0 %v8583_v6  ;;  %6146 = vmatprep.mubr.bf16.mxu0 %v9652_v34  ;;  %v8599_v34 = vld [vmem:[#allocation4 + $0xf88] ss:$20 sps:$4 sm:$0xff]   ;;  %v917_v6 = vld [vmem:[#allocation2 + $0x140] sm:$0xff] }
 0x2bd   :  { %7540 = vmatprep.subr.bf16.mxu0 %v8585_v61  ;;  %v913_v20 = vld [vmem:[#allocation2 + $0x120] sm:$0xff]  ;;  %v954_v61 = vld [vmem:[#allocation2 + $0x268] sm:$0xff] }
 0x2be   :  { %7527 = vmatpush3.bf16.msra.mxu1 %v8572_v19  ;;  %v912_v19 = vld [vmem:[#allocation2 + $0x118] sm:$0xff] }
 0x2bf   :  { %7528 = vmatprep.subr.bf16.mxu1 %v8574_v41  ;;  %v908_v41 = vld [vmem:[#allocation2 + $0xf8] sm:$0xff] }
 0x2c0   :  { %7541 = vmatpush3.bf16.msra.mxu0 %v8587_v35  ;;  %v950_v35 = vld [vmem:[#allocation2 + $0x248] sm:$0xff] }
 0x2c1   :  { %7542 = vmatprep.subr.bf16.mxu0 %v8589_v23 }
 0x2c2   :  { %7529 = vmatpush3.bf16.msra.mxu1 %v8576_v63  ;;  %v949_v63 = vld [vmem:[#allocation2 + $0x240] sm:$0xff] }
 0x2c3   :  { %7530 = vmatprep.subr.bf16.mxu1 %v8578_v13 }
 0x2c4   :  { %7543 = vmatpush3.bf16.msra.mxu0 %v8591_v10  ;;  %v907_v10 = vld [vmem:[#allocation2 + $0xf0] sm:$0xff] }
 0x2c5   :  { %7544 = vmatprep.subr.bf16.mxu0 %v8593_v30  ;;  %v945_v30 = vld [vmem:[#allocation2 + $0x220] sm:$0xff] }
 0x2c6   :  { %7531 = vmatpush3.bf16.msra.mxu1 %v8580_v54  ;;  %v903_v54 = vld [vmem:[#allocation2 + $0xd0] sm:$0xff] }
 0x2c7   :  { %7560 = vmatprep.subr.bf16.mxu1 %v8582_v48  ;;  %v944_v48 = vld [vmem:[#allocation2 + $0x218] sm:$0xff] }
 0x2c8   :  { %7545 = vmatpush3.bf16.msra.mxu0 %v8595_v31 }
 0x2c9   :  { %7546 = vmatprep.subr.bf16.mxu0 %v8597_v3  ;;  %6107 = vmatmul.mubr.bf16.vlgmr.msra.gmra.mxu1 %v9553_v46  ;;  %v8596_v46 = vld [vmem:[#allocation4 + $0x1230] ss:$20 sps:$4 sm:$0xff]   ;;  %v902_v3 = vld [vmem:[#allocation2 + $0xc8] sm:$0xff] }
 0x2ca   :  { %7561 = vmatpush3.bf16.msra.mxu1 %v8584_v55  ;;  %6186 = vmatprep.mubr.bf16.mxu1 %v9660_v24  ;;  %v9736_v24 = vld.sshfl [vmem:[%s9832_s0] sm:$0x33 pattern:$0x76325410] }
 0x2cb   :  { %7562 = vmatprep.subr.bf16.mxu1 %v8586_v62  ;;  %v9740_v0 = vcombine.high %v9736_v24, %v9736_v24  ;;  %v939_v62 = vld [vmem:[#allocation2 + $0x1f0] sm:$0xff] }
 0x2cc   :  { %7547 = vmatpush3.bf16.msra.mxu0 %v8599_v34  ;;  %v940_v34 = vld [vmem:[#allocation2 + $0x1f8] sm:$0xff] }
 0x2cd   :  { %7548 = vmatprep.subr.bf16.mxu0 %v8601_v57  ;;  %v897_v57 = vld [vmem:[#allocation2 + $0xa0] sm:$0xff] }
 0x2ce   :  { %7563 = vmatpush3.bf16.msra.mxu1 %v8588_v14 }
 0x2cf   :  { %7564 = vmatprep.subr.bf16.mxu1 %v8590_v39  ;;  %v893_v39 = vld [vmem:[#allocation2 + $0x80] sm:$0xff] }
 0x2d0   :  { %7549 = vmatpush3.bf16.msra.mxu0 %v8603_v21  ;;  %v935_v21 = vld [vmem:[#allocation2 + $0x1d0] sm:$0xff] }
 0x2d1   :  { %7550 = vmatprep.subr.bf16.mxu0 %v8605_v15  ;;  %v934_v15 = vld [vmem:[#allocation2 + $0x1c8] sm:$0xff] }
 0x2d2   :  { %7565 = vmatpush3.bf16.msra.mxu1 %v8592_v50  ;;  %v892_v50 = vld [vmem:[#allocation2 + $0x78] sm:$0xff] }
 0x2d3   :  { %7566 = vmatprep.subr.bf16.mxu1 %v8594_v32  ;;  %v930_v32 = vld [vmem:[#allocation2 + $0x1a8] sm:$0xff] }
 0x2d4   :  { %7551 = vmatpush3.bf16.msra.mxu0 %v8607_v40 }
 0x2d5   :  { %7552 = vmatprep.subr.bf16.mxu0 %v8609_v25  ;;  %v888_v25 = vld [vmem:[#allocation2 + $0x58] sm:$0xff] }
 0x2d6   :  { %7567 = vmatpush3.bf16.msra.mxu1 %v8596_v46  ;;  %v929_v46 = vld [vmem:[#allocation2 + $0x1a0] sm:$0xff] }
 0x2d7   :  { %7568 = vmatprep.subr.bf16.mxu1 %v8598_v49  ;;  %v925_v49 = vld [vmem:[#allocation2 + $0x180] sm:$0xff] }
 0x2d8   :  { %7553 = vmatpush3.bf16.msra.mxu0 %v8611_v26  ;;  %v887_v26 = vld [vmem:[#allocation2 + $0x50] sm:$0xff] }
 0x2d9   :  { %6207 = vmatprep.subr.mxu0 %v953_v36  ;;  %v883_v36 = vld [vmem:[#allocation2 + $0x30] sm:$0xff] }
 0x2da   :  { %7569 = vmatpush3.bf16.msra.mxu1 %v8600_v1  ;;  %v924_v1 = vld [vmem:[#allocation2 + $0x178] sm:$0xff] }
 0x2db   :  { %v5744_v29 = vpop.f32.mrf.mxu0  ;;  %6147 = vmatmul.mubr.bf16.vlgmr.msra.gmra.mxu0 %v9664_v8  ;;  %7570 = vmatprep.subr.bf16.mxu1 %v8602_v4  ;;  %v882_v4 = vld [vmem:[#allocation2 + $0x28] sm:$0xff] }
 0x2dc   :  { %v5745_v33 = vadd.f32 %v5744_v29, %v9724_v28  ;;  %6208 = vmatpush1.msra.mxu0 %v952_v2  ;;  %7402 = vmatprep.mubr.msk.f32.mxu0 %vm6204_vm2, %v9740_v0  ;;  %v933_v28 = vld [vmem:[#allocation2 + $0x1c0] sm:$0xff]  ;;  %v920_v2 = vld [vmem:[#allocation2 + $0x158] sm:$0xff]  ;;  %v919_v29 = vld [vmem:[#allocation2 + $0x150] sm:$0xff] }
 0x2dd   :  { %v5746_v11 = vpop.f32.mrf.mxu0  ;;  %6209 = vmatprep.subr.mxu0 %v948_v53  ;;  %v878_v53 = vld [vmem:[#allocation2 + $0x8] sm:$0xff] }
 0x2de   :  { %v5747_v9 = vadd.f32 %v5746_v11, %v9726_v27  ;;  %6210 = vmatpush1.msra.mxu0 %v947_v47  ;;  %7571 = vmatpush3.bf16.msra.mxu1 %v8604_v52  ;;  %v927_v27 = vld [vmem:[#allocation2 + $0x190] sm:$0xff]  ;;  %v877_v47 = vld [vmem:[#allocation2] sm:$0xff]  ;;  %v910_v11 = vld [vmem:[#allocation2 + $0x108] sm:$0xff] }
 0x2df   :  { %v5748_v8 = vpop.f32.mrf.mxu0  ;;  %6211 = vmatprep.subr.mxu0 %v943_v16  ;;  %7572 = vmatprep.subr.bf16.mxu1 %v8606_v60  ;;  %v915_v52 = vld [vmem:[#allocation2 + $0x130] sm:$0xff]  ;;  %v914_v16 = vld [vmem:[#allocation2 + $0x128] sm:$0xff]  ;;  %v972_v60 = vld [vmem:[#allocation2 + $0x2f8] sm:$0xff] }
 0x2e0   :  { %6212 = vmatpush1.msra.mxu0 %v942_v22  ;;  %v968_v22 = vld [vmem:[#allocation2 + $0x2d8] sm:$0xff]  ;;  %v905_v8 = vld [vmem:[#allocation2 + $0xe0] sm:$0xff] }
 0x2e1   :  { %v5749_v18 = vpop.f32.mrf.mxu0  ;;  %6213 = vmatprep.subr.mxu0 %v938_v44  ;;  %v967_v44 = vld [vmem:[#allocation2 + $0x2d0] sm:$0xff] }
 0x2e2   :  { %6214 = vmatpush1.msra.mxu0 %v937_v43  ;;  %7573 = vmatpush3.bf16.msra.mxu1 %v8608_v45  ;;  %v963_v43 = vld [vmem:[#allocation2 + $0x2b0] sm:$0xff]  ;;  %v904_v45 = vld [vmem:[#allocation2 + $0xd8] sm:$0xff]  ;;  %v958_v18 = vld [vmem:[#allocation2 + $0x288] sm:$0xff] }
 0x2e3   :  { %6215 = vmatprep.subr.mxu0 %v933_v28  ;;  %7574 = vmatprep.subr.bf16.mxu1 %v8610_v5  ;;  %v962_v28 = vld [vmem:[#allocation2 + $0x2a8] sm:$0xff]  ;;  %v900_v5 = vld [vmem:[#allocation2 + $0xb8] sm:$0xff] }
 0x2e4   :  { %6216 = vmatpush1.msra.mxu0 %v932_v7  ;;  %v899_v7 = vld [vmem:[#allocation2 + $0xb0] sm:$0xff] }
 0x2e5   :  { %6217 = vmatprep.subr.mxu0 %v928_v42  ;;  %v957_v42 = vld [vmem:[#allocation2 + $0x280] sm:$0xff] }
 0x2e6   :  { %6218 = vmatpush1.msra.mxu0 %v927_v27  ;;  %7575 = vmatpush3.bf16.msra.mxu1 %v8612_v56  ;;  %v895_v27 = vld [vmem:[#allocation2 + $0x90] sm:$0xff]  ;;  %v894_v56 = vld [vmem:[#allocation2 + $0x88] sm:$0xff] }
 0x2e7   :  { %6219 = vmatprep.subr.mxu0 %v923_v37  ;;  %6278 = vmatprep.subr.mxu1 %v955_v38  ;;  %v890_v37 = vld [vmem:[#allocation2 + $0x68] sm:$0xff]  ;;  %v956_v38 = vld [vmem:[#allocation2 + $0x278] sm:$0xff] }
 0x2e8   :  { %6220 = vmatpush1.msra.mxu0 %v922_v59  ;;  %v889_v59 = vld [vmem:[#allocation2 + $0x60] sm:$0xff] }
 0x2e9   :  { %6221 = vmatprep.subr.mxu0 %v918_v12  ;;  %6187 = vmatmul.mubr.bf16.vlgmr.msra.gmra.mxu1 %v9669_v58  ;;  %v5785_v23 = vpop.f32.mrf.mxu1  ;;  %v898_v58 = vld [vmem:[#allocation2 + $0xa8] sm:$0xff]  ;;  %v885_v12 = vld [vmem:[#allocation2 + $0x40] sm:$0xff] }
 0x2ea   :  { %6222 = vmatpush1.msra.mxu0 %v917_v6  ;;  %6279 = vmatpush1.msra.mxu1 %v954_v61  ;;  %v9748_v13 = vadd.f32 %v5785_v23, %v5745_v33  ;;  %v973_v33 = vld [vmem:[#allocation2 + $0x300] sm:$0xff]  ;;  %v884_v6 = vld [vmem:[#allocation2 + $0x38] sm:$0xff]  ;;  %v951_v61 = vld [vmem:[#allocation2 + $0x250] sm:$0xff] }
 0x2eb   :  { %6223 = vmatprep.subr.mxu0 %v913_v20  ;;  %6280 = vmatprep.subr.mxu1 %v950_v35  ;;  %v5787_v31 = vpop.f32.mrf.mxu1  ;;  %v8730_v20 = vmov 0.0   ;;  %v879_v35 = vld [vmem:[#allocation2 + $0x10] sm:$0xff] }
 0x2ec   :  { %6224 = vmatpush1.msra.mxu0 %v912_v19  ;;  %6281 = vmatpush1.msra.mxu1 %v949_v63  ;;  %v9750_v55 = vadd.f32 %v5787_v31, %v5747_v9  ;;  %v909_v9 = vld [vmem:[#allocation2 + $0x100] sm:$0xff]  ;;  %v880_v19 = vld [vmem:[#allocation2 + $0x18] sm:$0xff]  ;;  %v975_v23 = vld [vmem:[#allocation2 + $0x310] sm:$0xff] }
 0x2ed   :  { %6225 = vmatprep.subr.mxu0 %v908_v41  ;;  %6282 = vmatprep.subr.mxu1 %v945_v30  ;;  %v5789_v14 = vpop.f32.mrf.mxu1  ;;  %v946_v41 = vld [vmem:[#allocation2 + $0x228] sm:$0xff]  ;;  %v936_v31 = vld [vmem:[#allocation2 + $0x1d8] sm:$0xff] }
 0x2ee   :  { %6226 = vmatpush1.msra.mxu0 %v907_v10  ;;  %6283 = vmatpush1.msra.mxu1 %v944_v48  ;;  %v974_v63 = vld [vmem:[#allocation2 + $0x308] sm:$0xff]  ;;  %v941_v10 = vld [vmem:[#allocation2 + $0x200] sm:$0xff] }
 0x2ef   :  { %6227 = vmatprep.subr.mxu0 %v903_v54  ;;  %6284 = vmatprep.subr.mxu1 %v940_v34  ;;  %v5790_v40 = vpop.f32.mrf.mxu1  ;;  %v970_v30 = vld [vmem:[#allocation2 + $0x2e8] sm:$0xff]  ;;  %v969_v54 = vld [vmem:[#allocation2 + $0x2e0] sm:$0xff]  ;;  %v931_v34 = vld [vmem:[#allocation2 + $0x1b0] sm:$0xff] }
 0x2f0   :  { %6228 = vmatpush1.msra.mxu0 %v902_v3  ;;  %6285 = vmatpush1.msra.mxu1 %v939_v62  ;;  %v965_v48 = vld [vmem:[#allocation2 + $0x2c0] sm:$0xff]  ;;  %v964_v3 = vld [vmem:[#allocation2 + $0x2b8] sm:$0xff]  ;;  %v959_v62 = vld [vmem:[#allocation2 + $0x290] sm:$0xff] }
 0x2f1   :  { %6229 = vmatprep.subr.mxu0 %v898_v58  ;;  %6286 = vmatprep.subr.mxu1 %v935_v21  ;;  %v960_v58 = vld [vmem:[#allocation2 + $0x298] sm:$0xff]  ;;  %v921_v14 = vld [vmem:[#allocation2 + $0x160] sm:$0xff] }
 0x2f2   :  { %6230 = vmatpush1.msra.mxu0 %v897_v57  ;;  %6287 = vmatpush1.msra.mxu1 %v934_v15  ;;  %v926_v57 = vld [vmem:[#allocation2 + $0x188] sm:$0xff]  ;;  %v916_v21 = vld [vmem:[#allocation2 + $0x138] sm:$0xff] }
 0x2f3   :  { %6231 = vmatprep.subr.mxu0 %v893_v39  ;;  %6288 = vmatprep.subr.mxu1 %v930_v32  ;;  %v911_v39 = vld [vmem:[#allocation2 + $0x110] sm:$0xff]  ;;  %v906_v15 = vld [vmem:[#allocation2 + $0xe8] sm:$0xff]  ;;  %v896_v32 = vld [vmem:[#allocation2 + $0x98] sm:$0xff] }
 0x2f4   :  { %6232 = vmatpush1.msra.mxu0 %v892_v50  ;;  %6289 = vmatpush1.msra.mxu1 %v929_v46  ;;  %v901_v50 = vld [vmem:[#allocation2 + $0xc0] sm:$0xff]  ;;  %v891_v46 = vld [vmem:[#allocation2 + $0x70] sm:$0xff] }
 0x2f5   :  { %6233 = vmatprep.subr.mxu0 %v888_v25  ;;  %6290 = vmatprep.subr.mxu1 %v925_v49 }
 0x2f6   :  { %6234 = vmatpush1.msra.mxu0 %v887_v26  ;;  %6291 = vmatpush1.msra.mxu1 %v924_v1 }
 0x2f7   :  { %6235 = vmatprep.subr.mxu0 %v883_v36  ;;  %6292 = vmatprep.subr.mxu1 %v920_v2  ;;  %v886_v36 = vld [vmem:[#allocation2 + $0x48] sm:$0xff]  ;;  %v971_v2 = vld [vmem:[#allocation2 + $0x2f0] sm:$0xff] }
 0x2f8   :  { %6236 = vmatpush1.msra.mxu0 %v882_v4  ;;  %6293 = vmatpush1.msra.mxu1 %v919_v29  ;;  %v881_v4 = vld [vmem:[#allocation2 + $0x20] sm:$0xff] }
 0x2f9   :  { %6237 = vmatprep.subr.mxu0 %v878_v53  ;;  %6294 = vmatprep.subr.mxu1 %v915_v52  ;;  %v961_v53 = vld [vmem:[#allocation2 + $0x2a0] sm:$0xff] }
 0x2fa   :  { %6238 = vmatpush1.msra.mxu0 %v877_v47  ;;  %6295 = vmatpush1.msra.mxu1 %v914_v16  ;;  %v6487_v16 = vld [vmem:[#allocation7 + $0xf8] sm:$0xff] }
 0x2fb   :  { %6263 = vmatprep.subr.mxu0 %v973_v33  ;;  %6296 = vmatprep.subr.mxu1 %v910_v11  ;;  %v6486_v11 = vld [vmem:[#allocation7 + $0xf0] sm:$0xff] }
 0x2fc   :  { %6264 = vmatpush2.msra.mxu0 %v972_v60  ;;  %6297 = vmatpush1.msra.mxu1 %v909_v9  ;;  %v6471_v60 = vld [vmem:[#allocation7 + $0x78] sm:$0xff]  ;;  %v6470_v9 = vld [vmem:[#allocation7 + $0x70] sm:$0xff] }
 0x2fd   :  { %6265 = vmatprep.subr.mxu0 %v968_v22  ;;  %6298 = vmatprep.subr.mxu1 %v905_v8 }
 0x2fe   :  { %6266 = vmatpush2.msra.mxu0 %v967_v44  ;;  %6299 = vmatpush1.msra.mxu1 %v904_v45  ;;  %v6485_v44 = vld [vmem:[#allocation7 + $0xe8] sm:$0xff]  ;;  %v6484_v45 = vld [vmem:[#allocation7 + $0xe0] sm:$0xff] }
 0x2ff   :  { %6267 = vmatprep.subr.mxu0 %v963_v43  ;;  %6300 = vmatprep.subr.mxu1 %v900_v5  ;;  %v6469_v43 = vld [vmem:[#allocation7 + $0x68] sm:$0xff]  ;;  %v6467_v5 = vld [vmem:[#allocation7 + $0x58] sm:$0xff] }
 0x300   :  { %6268 = vmatpush2.msra.mxu0 %v962_v28  ;;  %6301 = vmatpush1.msra.mxu1 %v899_v7  ;;  %v6468_v28 = vld [vmem:[#allocation7 + $0x60] sm:$0xff]  ;;  %v6466_v7 = vld [vmem:[#allocation7 + $0x50] sm:$0xff] }
 0x301   :  { %6269 = vmatprep.subr.mxu0 %v958_v18  ;;  %6302 = vmatprep.subr.mxu1 %v895_v27  ;;  %v6482_v18 = vld [vmem:[#allocation7 + $0xd0] sm:$0xff]  ;;  %v6465_v27 = vld [vmem:[#allocation7 + $0x48] sm:$0xff] }
 0x302   :  { %6270 = vmatpush2.msra.mxu0 %v957_v42  ;;  %7403 = vmatprep.mubr.msk.f32.mxu1 %vm6204_vm2, %v9740_v0  ;;  %v6481_v42 = vld [vmem:[#allocation7 + $0xc8] sm:$0xff] }
 0x303   :  { %6303 = vmatpush1.msra.mxu1 %v894_v56  ;;  %6272 = vmatmul.mubr.f32.vlgmr.msra.gmra.mxu0 %v9736_v24  ;;  %v6480_v56 = vld [vmem:[#allocation7 + $0xc0] sm:$0xff] }
 0x304   :  { %6304 = vmatprep.subr.mxu1 %v890_v37  ;;  %6349 = vmatprep.subr.mxu0 %v8730_v20 }
 0x305   :  { %6305 = vmatpush1.msra.mxu1 %v889_v59  ;;  %6350 = vmatpush1.msra.mxu0 %v956_v38  ;;  %v6464_v59 = vld [vmem:[#allocation7 + $0x40] sm:$0xff]  ;;  %v6479_v38 = vld [vmem:[#allocation7 + $0xb8] sm:$0xff] }
 0x306   :  { %6306 = vmatprep.subr.mxu1 %v885_v12  ;;  %6351 = vmatprep.subr.mxu0 %v8730_v20 }
 0x307   :  { %6307 = vmatpush1.msra.mxu1 %v884_v6  ;;  %6352 = vmatpush1.msra.mxu0 %v951_v61  ;;  %v6463_v6 = vld [vmem:[#allocation7 + $0x38] sm:$0xff] }
 0x308   :  { %6308 = vmatprep.subr.mxu1 %v880_v19  ;;  %6353 = vmatprep.subr.mxu0 %v8730_v20  ;;  %v6478_v19 = vld [vmem:[#allocation7 + $0xb0] sm:$0xff] }
 0x309   :  { %6309 = vmatpush1.msra.mxu1 %v879_v35  ;;  %6354 = vmatpush1.msra.mxu0 %v946_v41  ;;  %v6462_v41 = vld [vmem:[#allocation7 + $0x30] sm:$0xff] }
 0x30a   :  { %6334 = vmatprep.subr.mxu1 %v975_v23  ;;  %6355 = vmatprep.subr.mxu0 %v8730_v20  ;;  %v6477_v23 = vld [vmem:[#allocation7 + $0xa8] sm:$0xff] }
 0x30b   :  { %6335 = vmatpush2.msra.mxu1 %v974_v63  ;;  %6356 = vmatpush1.msra.mxu0 %v941_v10  ;;  %v6461_v10 = vld [vmem:[#allocation7 + $0x28] sm:$0xff] }
 0x30c   :  { %6336 = vmatprep.subr.mxu1 %v970_v30  ;;  %6357 = vmatprep.subr.mxu0 %v8730_v20  ;;  %v6476_v30 = vld [vmem:[#allocation7 + $0xa0] sm:$0xff] }
 0x30d   :  { %6337 = vmatpush2.msra.mxu1 %v969_v54  ;;  %6358 = vmatpush1.msra.mxu0 %v936_v31 }
 0x30e   :  { %6338 = vmatprep.subr.mxu1 %v965_v48  ;;  %6359 = vmatprep.subr.mxu0 %v8730_v20 }
 0x30f   :  { %6339 = vmatpush2.msra.mxu1 %v964_v3  ;;  %6360 = vmatpush1.msra.mxu0 %v931_v34 }
 0x310   :  { %6340 = vmatprep.subr.mxu1 %v960_v58  ;;  %6361 = vmatprep.subr.mxu0 %v8730_v20 }
 0x311   :  { %6341 = vmatpush2.msra.mxu1 %v959_v62  ;;  %6362 = vmatpush1.msra.mxu0 %v926_v57  ;;  %v6460_v62 = vld [vmem:[#allocation7 + $0x20] sm:$0xff]  ;;  %v6475_v57 = vld [vmem:[#allocation7 + $0x98] sm:$0xff] }
 0x312   :  { %6343 = vmatmul.mubr.f32.vlgmr.msra.gmra.mxu1 %v9736_v24  ;;  %6363 = vmatprep.subr.mxu0 %v8730_v20 }
 0x313   :  { %6364 = vmatpush1.msra.mxu0 %v921_v14  ;;  %7404 = vmatprep.mubr.msk.f32.mxu0 %vm6204_vm2, %v9740_v0  ;;  %v6459_v14 = vld [vmem:[#allocation7 + $0x18] sm:$0xff] }
 0x314   :  { %6365 = vmatprep.subr.mxu0 %v8730_v20  ;;  %7582 = vmatprep.subr.mxu1 %v6487_v16  ;;  %v6528_v16 = vld [vmem:[#allocation7 + $0x240] sm:$0xff] }
 0x315   :  { %6366 = vmatpush1.msra.mxu0 %v916_v21  ;;  %7583 = vmatpush3.msra.mxu1 %v6471_v60  ;;  %v6474_v21 = vld [vmem:[#allocation7 + $0x90] sm:$0xff] }
 0x316   :  { %6367 = vmatprep.subr.mxu0 %v8730_v20  ;;  %7584 = vmatprep.subr.mxu1 %v6486_v11  ;;  %v6527_v11 = vld [vmem:[#allocation7 + $0x238] sm:$0xff] }
 0x317   :  { %6368 = vmatpush1.msra.mxu0 %v911_v39  ;;  %7585 = vmatpush3.msra.mxu1 %v6470_v9  ;;  %v6458_v39 = vld [vmem:[#allocation7 + $0x10] sm:$0xff] }
 0x318   :  { %6369 = vmatprep.subr.mxu0 %v8730_v20  ;;  %7586 = vmatprep.subr.mxu1 %v6485_v44  ;;  %v6526_v9 = vld [vmem:[#allocation7 + $0x230] sm:$0xff] }
 0x319   :  { %6370 = vmatpush1.msra.mxu0 %v906_v15  ;;  %7587 = vmatpush3.msra.mxu1 %v6469_v43  ;;  %v6473_v15 = vld [vmem:[#allocation7 + $0x88] sm:$0xff] }
 0x31a   :  { %6371 = vmatprep.subr.mxu0 %v8730_v20  ;;  %7588 = vmatprep.subr.mxu1 %v6484_v45  ;;  %v6525_v43 = vld [vmem:[#allocation7 + $0x228] sm:$0xff] }
 0x31b   :  { %v5826_v40 = vpop.f32.mrf.mxu0  ;;  %6372 = vmatpush1.msra.mxu0 %v901_v50  ;;  %7589 = vmatpush3.msra.mxu1 %v6468_v28  ;;  %v6457_v50 = vld [vmem:[#allocation7 + $0x8] sm:$0xff] }
 0x31c   :  { %v5827_v25 = vadd.f32 %v5826_v40, %v9748_v13  ;;  %6373 = vmatprep.subr.mxu0 %v8730_v20  ;;  %v976_v13 = vld [vmem:[#allocation2 + $0x318] sm:$0xff]  ;;  %v6472_v40 = vld [vmem:[#allocation7 + $0x80] sm:$0xff] }
 0x31d   :  { %v5828_v0 = vpop.f32.mrf.mxu0  ;;  %6374 = vmatpush1.msra.mxu0 %v896_v32  ;;  %v6456_v32 = vld [vmem:[#allocation7] sm:$0xff] }
 0x31e   :  { %v5829_v26 = vadd.f32 %v5828_v0, %v9750_v55  ;;  %6375 = vmatprep.subr.mxu0 %v8730_v20  ;;  %v966_v55 = vld [vmem:[#allocation2 + $0x2c8] sm:$0xff] }
 0x31f   :  { %v5830_v49 = vpop.f32.mrf.mxu0  ;;  %6376 = vmatpush1.msra.mxu0 %v891_v46 }
 0x320   :  { %6377 = vmatprep.subr.mxu0 %v8730_v20 }
 0x321   :  { %v5831_v1 = vpop.f32.mrf.mxu0  ;;  %6378 = vmatpush1.msra.mxu0 %v886_v36  ;;  %v6534_v36 = vld [vmem:[#allocation7 + $0x270] sm:$0xff] }
 0x322   :  { %6379 = vmatprep.subr.mxu0 %v8730_v20 }
 0x323   :  { %6380 = vmatpush1.msra.mxu0 %v881_v4  ;;  %v6533_v4 = vld [vmem:[#allocation7 + $0x268] sm:$0xff] }
 0x324   :  { %6405 = vmatprep.subr.mxu0 %v8730_v20 }
 0x325   :  { %6406 = vmatpush2.msra.mxu0 %v976_v13 }
 0x326   :  { %6407 = vmatprep.subr.mxu0 %v8730_v20 }
 0x327   :  { %6408 = vmatpush2.msra.mxu0 %v971_v2 }
 0x328   :  { %6409 = vmatprep.subr.mxu0 %v8730_v20 }
 0x329   :  { %6410 = vmatpush2.msra.mxu0 %v966_v55  ;;  %v5867_v29 = vpop.f32.mrf.mxu1  ;;  %v6532_v55 = vld [vmem:[#allocation7 + $0x260] sm:$0xff] }
 0x32a   :  { %6411 = vmatprep.subr.mxu0 %v8730_v20  ;;  %v9780_v47 = vadd.f32 %v5867_v29, %v5827_v25  ;;  %v6519_v25 = vld [vmem:[#allocation7 + $0x1f8] sm:$0xff]  ;;  %v6530_v29 = vld [vmem:[#allocation7 + $0x250] sm:$0xff] }
 0x32b   :  { %6412 = vmatpush2.msra.mxu0 %v961_v53  ;;  %v5869_v52 = vpop.f32.mrf.mxu1  ;;  %v6531_v53 = vld [vmem:[#allocation7 + $0x258] sm:$0xff] }
 0x32c   :  { %6414 = vmatmul.mubr.f32.vlgmr.msra.gmra.mxu0 %v9736_v24  ;;  %7669 = vmatprep.subr.mxu0 %v8730_v20  ;;  %v9784_v33 = vadd.f32 %v5869_v52, %v5829_v26  ;;  %v6483_v24 = vld [vmem:[#allocation7 + $0xd8] sm:$0xff]  ;;  %v6529_v52 = vld [vmem:[#allocation7 + $0x248] sm:$0xff] }
 0x32d   :  { %v5871_v22 = vpop.f32.mrf.mxu1  ;;  %7590 = vmatprep.subr.mxu1 %v6483_v24  ;;  %v6535_v26 = vld [vmem:[#allocation7 + $0x278] sm:$0xff]  ;;  %v6524_v24 = vld [vmem:[#allocation7 + $0x220] sm:$0xff]  ;;  %7701 = vmatprep.mubr.msk.f32.mxu0 %vm8731_vm3, %v8730_v20 }
 0x32e   :  { %7591 = vmatpush3.msra.mxu1 %v6467_v5  ;;  %7670 = vmatpush3.msra.mxu0 %v6535_v26  ;;  %v6523_v5 = vld [vmem:[#allocation7 + $0x218] sm:$0xff] }
 0x32f   :  { %v5872_v8 = vpop.f32.mrf.mxu1  ;;  %7592 = vmatprep.subr.mxu1 %v6482_v18  ;;  %7671 = vmatprep.subr.mxu0 %v8730_v20  ;;  %v6522_v18 = vld [vmem:[#allocation7 + $0x210] sm:$0xff] }
 0x330   :  { %7593 = vmatpush3.msra.mxu1 %v6466_v7  ;;  %7672 = vmatpush3.msra.mxu0 %v6534_v36  ;;  %v6521_v7 = vld [vmem:[#allocation7 + $0x208] sm:$0xff] }
 0x331   :  { %7594 = vmatprep.subr.mxu1 %v6481_v42  ;;  %7673 = vmatprep.subr.mxu0 %v8730_v20  ;;  %v6520_v42 = vld [vmem:[#allocation7 + $0x200] sm:$0xff] }
 0x332   :  { %7595 = vmatpush3.msra.mxu1 %v6465_v27  ;;  %7674 = vmatpush3.msra.mxu0 %v6533_v4  ;;  %v6518_v4 = vld [vmem:[#allocation7 + $0x1f0] sm:$0xff] }
 0x333   :  { %7596 = vmatprep.subr.mxu1 %v6480_v56  ;;  %7675 = vmatprep.subr.mxu0 %v8730_v20 }
 0x334   :  { %7597 = vmatpush3.msra.mxu1 %v6464_v59  ;;  %7676 = vmatpush3.msra.mxu0 %v6532_v55 }
 0x335   :  { %7598 = vmatprep.subr.mxu1 %v6479_v38  ;;  %7677 = vmatprep.subr.mxu0 %v8730_v20 }
 0x336   :  { %7599 = vmatpush3.msra.mxu1 %v6463_v6  ;;  %7678 = vmatpush3.msra.mxu0 %v6531_v53  ;;  %v6516_v53 = vld [vmem:[#allocation7 + $0x1e0] sm:$0xff] }
 0x337   :  { %7600 = vmatprep.subr.mxu1 %v6478_v19  ;;  %7679 = vmatprep.subr.mxu0 %v8730_v20 }
 0x338   :  { %7601 = vmatpush3.msra.mxu1 %v6462_v41  ;;  %7680 = vmatpush3.msra.mxu0 %v6530_v29  ;;  %v6500_v29 = vld [vmem:[#allocation7 + $0x160] sm:$0xff] }
 0x339   :  { %7602 = vmatprep.subr.mxu1 %v6477_v23  ;;  %7681 = vmatprep.subr.mxu0 %v8730_v20 }
 0x33a   :  { %7603 = vmatpush3.msra.mxu1 %v6461_v10  ;;  %7682 = vmatpush3.msra.mxu0 %v6529_v52  ;;  %v6515_v52 = vld [vmem:[#allocation7 + $0x1d8] sm:$0xff] }
 0x33b   :  { %v7422_v37 = vpop.f32.mrf.mxu0  ;;  %7604 = vmatprep.subr.mxu1 %v6476_v30  ;;  %7683 = vmatprep.subr.mxu0 %v8730_v20 }
 0x33c   :  { %7605 = vmatpush3.msra.mxu1 %v6460_v62  ;;  %7684 = vmatpush3.msra.mxu0 %v6528_v16  ;;  %v6421_v62 = vlaneseq }
 0x33d   :  { %v7423_v12 = vpop.f32.mrf.mxu0  ;;  %7606 = vmatprep.subr.mxu1 %v6475_v57  ;;  %7685 = vmatprep.subr.mxu0 %v8730_v20 }
 0x33e   :  { %v7424_v61 = vadd.f32 %v7423_v12, %v7422_v37  ;;  %7607 = vmatpush3.msra.mxu1 %v6459_v14  ;;  %7686 = vmatpush3.msra.mxu0 %v6527_v11  ;;  %v9808_v57 = vshrl.u32 %v6421_v62, 7 }
 0x33f   :  { %v7425_v35 = vpop.f32.mrf.mxu0  ;;  %7608 = vmatprep.subr.mxu1 %v6474_v21  ;;  %7687 = vmatprep.subr.mxu0 %v8730_v20  ;;  %v9811_v21 = vld [vmem:[#allocation6] sm:$0x1f] }
 0x340   :  { %7609 = vmatpush3.msra.mxu1 %v6458_v39  ;;  %7688 = vmatpush3.msra.mxu0 %v6526_v9  ;;  %v6423_v14 = vsub.s32 0, %v9808_v57  ;;  %v6427_v39 = vsub.s32 1, %v9808_v57  ;;  %v6435_v55 = vsub.s32 3, %v9808_v57 }
 0x341   :  { %v7426_v63 = vpop.f32.mrf.mxu0  ;;  %7610 = vmatprep.subr.mxu1 %v6473_v15  ;;  %7689 = vmatprep.subr.mxu0 %v8730_v20 }
 0x342   :  { %7611 = vmatpush3.msra.mxu1 %v6457_v50  ;;  %7690 = vmatpush3.msra.mxu0 %v6525_v43  ;;  %v6424_v50 = vrot.slane %v9811_v21, %v6423_v14  ;;  %v6436_v16 = vrot.slane %v9811_v21, %v6435_v55 }
 0x343   :  { %7612 = vmatprep.subr.mxu1 %v6472_v40  ;;  %7691 = vmatprep.subr.mxu0 %v8730_v20 }
 0x344   :  { %7613 = vmatpush3.msra.mxu1 %v6456_v32  ;;  %7692 = vmatpush3.msra.mxu0 %v6524_v24  ;;  %v6428_v32 = vrot.slane %v9811_v21, %v6427_v39 }
 0x345   :  { %7617 = vmatprep.subr.mxu1 %v6519_v25  ;;  %7693 = vmatprep.subr.mxu0 %v8730_v20 }
 0x346   :  { %7694 = vmatpush3.msra.mxu0 %v6523_v5  ;;  %v6496_v5 = vld [vmem:[#allocation7 + $0x140] sm:$0xff] }
 0x347   :  { %7695 = vmatprep.subr.mxu0 %v8730_v20 }
 0x348   :  { %7696 = vmatpush3.msra.mxu0 %v6522_v18  ;;  %v6511_v18 = vld [vmem:[#allocation7 + $0x1b8] sm:$0xff] }
 0x349   :  { %v7444_v54 = vpop.f32.mrf.mxu1  ;;  %7697 = vmatprep.subr.mxu0 %v8730_v20 }
 0x34a   :  { %7698 = vmatpush3.msra.mxu0 %v6521_v7  ;;  %v6495_v7 = vld [vmem:[#allocation7 + $0x138] sm:$0xff] }
 0x34b   :  { %v7445_v31 = vpop.f32.mrf.mxu1  ;;  %7699 = vmatprep.subr.mxu0 %v8730_v20 }
 0x34c   :  { %v7446_v48 = vadd.f32 %v7445_v31, %v7444_v54  ;;  %7700 = vmatpush3.msra.mxu0 %v6520_v42  ;;  %v6510_v42 = vld [vmem:[#allocation7 + $0x1b0] sm:$0xff] }
 0x34d   :  { %v7447_v3 = vpop.f32.mrf.mxu1 }
 0x34e   :  { %v5949_v34 = vadd.f32 %v7446_v48, %v7424_v61 }
 0x34f   :  { %v7448_v58 = vpop.f32.mrf.mxu1 }
 0x35b   :  { %v7466_v0 = vpop.f32.mrf.mxu0 }
 0x35d   :  { %v7467_v46 = vpop.f32.mrf.mxu0 }
 0x35e   :  { %v7468_v49 = vadd.f32 %v7467_v46, %v7466_v0 }
 0x35f   :  { %v7469_v1 = vpop.f32.mrf.mxu0 }
 0x360   :  { %v5989_v13 = vadd.f32 %v7468_v49, %v5949_v34  ;;  %v6503_v1 = vld [vmem:[#allocation7 + $0x178] sm:$0xff] }
 0x361   :  { %v7470_v2 = vpop.f32.mrf.mxu0 }
 0x362   :  { %v6517_v2 = vld [vmem:[#allocation7 + $0x1e8] sm:$0xff] }
 0x369   :  { %v7488_v60 = vpop.f32.mrf.mxu1 }
 0x36b   :  { %v7489_v22 = vpop.f32.mrf.mxu1 }
 0x36c   :  { %v7490_v44 = vadd.f32 %v7489_v22, %v7488_v60  ;;  %v6499_v60 = vld [vmem:[#allocation7 + $0x158] sm:$0xff]  ;;  %v6514_v22 = vld [vmem:[#allocation7 + $0x1d0] sm:$0xff] }
 0x36d   :  { %v7491_v8 = vpop.f32.mrf.mxu1 }
 0x36e   :  { %v6029_v45 = vadd.f32 %v7490_v44, %v5989_v13  ;;  %v6502_v13 = vld [vmem:[#allocation7 + $0x170] sm:$0xff]  ;;  %v6513_v8 = vld [vmem:[#allocation7 + $0x1c8] sm:$0xff] }
 0x36f   :  { %v7492_v28 = vpop.f32.mrf.mxu1  ;;  %v6498_v44 = vld [vmem:[#allocation7 + $0x150] sm:$0xff] }
 0x370   :  { %v6512_v28 = vld [vmem:[#allocation7 + $0x1c0] sm:$0xff] }
 0x37b   :  { %v7510_v27 = vpop.f32.mrf.mxu0 }
 0x37d   :  { %v7511_v56 = vpop.f32.mrf.mxu0 }
 0x37e   :  { %v7512_v37 = vadd.f32 %v7511_v56, %v7510_v27  ;;  %v6509_v27 = vld [vmem:[#allocation7 + $0x1a8] sm:$0xff]  ;;  %v6431_v56 = vsub.s32 2, %v9808_v57 }
 0x37f   :  { %v7513_v59 = vpop.f32.mrf.mxu0 }
 0x380   :  { %v6069_v38 = vadd.f32 %v7512_v37, %v6029_v45  ;;  %v6497_v45 = vld [vmem:[#allocation7 + $0x148] sm:$0xff]  ;;  %v6508_v59 = vld [vmem:[#allocation7 + $0x1a0] sm:$0xff] }
 0x381   :  { %v7514_v12 = vpop.f32.mrf.mxu0  ;;  %v6493_v37 = vld [vmem:[#allocation7 + $0x128] sm:$0xff] }
 0x382   :  { %v6507_v12 = vld [vmem:[#allocation7 + $0x198] sm:$0xff] }
 0x389   :  { %v7532_v6 = vpop.f32.mrf.mxu1 }
 0x38b   :  { %v7533_v61 = vpop.f32.mrf.mxu1 }
 0x38c   :  { %v7534_v19 = vadd.f32 %v7533_v61, %v7532_v6  ;;  %v6432_v61 = vrot.slane %v9811_v21, %v6431_v56 }
 0x38d   :  { %v7535_v35 = vpop.f32.mrf.mxu1 }
 0x38e   :  { %v6109_v41 = vadd.f32 %v7534_v19, %v6069_v38  ;;  %v6492_v38 = vld [vmem:[#allocation7 + $0x120] sm:$0xff]  ;;  %v6491_v19 = vld [vmem:[#allocation7 + $0x118] sm:$0xff]  ;;  %v6506_v35 = vld [vmem:[#allocation7 + $0x190] sm:$0xff] }
 0x38f   :  { %v7536_v23 = vpop.f32.mrf.mxu1 }
 0x390   :  { %v6505_v23 = vld [vmem:[#allocation7 + $0x188] sm:$0xff] }
 0x39b   :  { %v7554_v63 = vpop.f32.mrf.mxu0 }
 0x39d   :  { %v7555_v10 = vpop.f32.mrf.mxu0 }
 0x39e   :  { %v7556_v30 = vadd.f32 %v7555_v10, %v7554_v63 }
 0x39f   :  { %v7557_v54 = vpop.f32.mrf.mxu0 }
 0x3a0   :  { %v9802_v31 = vadd.f32 %v7556_v30, %v6109_v41  ;;  %v6490_v41 = vld [vmem:[#allocation7 + $0x110] sm:$0xff]  ;;  %v6489_v30 = vld [vmem:[#allocation7 + $0x108] sm:$0xff]  ;;  %v6439_v54 = vsub.s32 4, %v9808_v57 }
 0x3a1   :  { %v7558_v48 = vpop.f32.mrf.mxu0 }
 0x3a2   :  { %v6488_v48 = vld [vmem:[#allocation7 + $0x100] sm:$0xff]  ;;  %v6440_v62 = vrot.slane %v9811_v21, %v6439_v54 }
 0x3a9   :  { %v9804_v20 = vpop.f32.mrf.mxu1 }
 0x3ab   :  { %v9806_v3 = vpop.f32.mrf.mxu1 }
 0x3ac   :  { %v7578_v63 = vadd.f32 %v9806_v3, %v9804_v20 }
 0x3ad   :  { %v7579_v34 = vpop.f32.mrf.mxu1 }
 0x3af   :  { %v7580_v58 = vpop.f32.mrf.mxu1 }
 0x3b0   :  { %v6189_v58 = vadd.f32 %v7578_v63, %v9802_v31 }
 0x3c3   :  { %v6273_v15 = vpop.f32.mrf.mxu0 }
 0x3c4   :  { %v6274_v40 = vadd.f32 %v6273_v15, %v9702_v51  ;;  %v6501_v51 = vld [vmem:[#allocation7 + $0x168] sm:$0xff] }
 0x3c5   :  { %v6275_v25 = vpop.f32.mrf.mxu0 }
 0x3c6   :  { %v6276_v0 = vadd.f32 %v6275_v25, %v9704_v17  ;;  %v6446_v46 = vadd.f32 %v6424_v50, %v6274_v40 }
 0x3c8   :  { %v6447_v26 = vadd.f32 %v6428_v32, %v6276_v0  ;;  %v6451_v36 = vmax.f32 %v6446_v46, 0.0  ;;  %v7405_v32 = vld [vmem:[#allocation9] ss:$0 sm:$0xff] }
 0x3ca   :  { %v6452_v49 = vmax.f32 %v6447_v26, 0.0 }
 0x3cc   :  { %6607 = vmatprep.mubr.f32.mxu1 %v6452_v49 }
 0x3cd   :  { %6608 = vmatmul.mubr.f32.vlgmr.msra.gmra.mxu1 %v6451_v36 }
 0x3ce   :  { %7618 = vmatpush3.msra.mxu1 %v6503_v1 }
 0x3cf   :  { %7619 = vmatprep.subr.mxu1 %v6518_v4 }
 0x3d0   :  { %7620 = vmatpush3.msra.mxu1 %v6502_v13 }
 0x3d1   :  { %7621 = vmatprep.subr.mxu1 %v6517_v2 }
 0x3d2   :  { %v6344_v17 = vpop.f32.mrf.mxu1  ;;  %7622 = vmatpush3.msra.mxu1 %v6501_v51 }
 0x3d3   :  { %7623 = vmatprep.subr.mxu1 %v6516_v53  ;;  %v6345_v6 = vadd.f32 %v6344_v17, %v9780_v47  ;;  %v6504_v47 = vld [vmem:[#allocation7 + $0x180] sm:$0xff] }
 0x3d4   :  { %v6346_v11 = vpop.f32.mrf.mxu1  ;;  %7624 = vmatpush3.msra.mxu1 %v6500_v29 }
 0x3d5   :  { %v6347_v9 = vadd.f32 %v6346_v11, %v9784_v33  ;;  %7625 = vmatprep.subr.mxu1 %v6515_v52  ;;  %v6494_v33 = vld [vmem:[#allocation7 + $0x130] sm:$0xff]  ;;  %v6448_v10 = vadd.f32 %v6432_v61, %v6345_v6 }
 0x3d6   :  { %7626 = vmatpush3.msra.mxu1 %v6499_v60 }
 0x3d7   :  { %v6449_v43 = vadd.f32 %v6436_v16, %v6347_v9  ;;  %7627 = vmatprep.subr.mxu1 %v6514_v22  ;;  %v6453_v34 = vmax.f32 %v6448_v10, 0.0 }
 0x3d8   :  { %7628 = vmatpush3.msra.mxu1 %v6498_v44 }
 0x3d9   :  { %v6454_v24 = vmax.f32 %v6449_v43, 0.0  ;;  %7629 = vmatprep.subr.mxu1 %v6513_v8 }
 0x3da   :  { %7630 = vmatpush3.msra.mxu1 %v6497_v45 }
 0x3db   :  { %6677 = vmatprep.mubr.f32.mxu1 %v6454_v24  ;;  %7631 = vmatprep.subr.mxu1 %v6512_v28 }
 0x3dc   :  { %7632 = vmatpush3.msra.mxu1 %v6496_v5 }
 0x3dd   :  { %7633 = vmatprep.subr.mxu1 %v6511_v18 }
 0x3de   :  { %7634 = vmatpush3.msra.mxu1 %v6495_v7 }
 0x3df   :  { %7635 = vmatprep.subr.mxu1 %v6510_v42 }
 0x3e0   :  { %7636 = vmatpush3.msra.mxu1 %v6494_v33 }
 0x3e1   :  { %7637 = vmatprep.subr.mxu1 %v6509_v27 }
 0x3e2   :  { %7638 = vmatpush3.msra.mxu1 %v6493_v37 }
 0x3e3   :  { %7639 = vmatprep.subr.mxu1 %v6508_v59 }
 0x3e4   :  { %7640 = vmatpush3.msra.mxu1 %v6492_v38 }
 0x3e5   :  { %7641 = vmatprep.subr.mxu1 %v6507_v12 }
 0x3e6   :  { %7642 = vmatpush3.msra.mxu1 %v6491_v19 }
 0x3e7   :  { %7643 = vmatprep.subr.mxu1 %v6506_v35 }
 0x3e8   :  { %7644 = vmatpush3.msra.mxu1 %v6490_v41 }
 0x3e9   :  { %7645 = vmatprep.subr.mxu1 %v6505_v23 }
 0x3ea   :  { %7646 = vmatpush3.msra.mxu1 %v6489_v30 }
 0x3eb   :  { %7647 = vmatprep.subr.mxu1 %v6504_v47 }
 0x3ec   :  { %v6415_v14 = vpop.f32.mrf.mxu0  ;;  %7648 = vmatpush3.msra.mxu1 %v6488_v48 }
 0x3ed   :  { %v6416_v39 = vadd.f32 %v6415_v14, %v6189_v58  ;;  %6678 = vmatmul.mubr.f32.vlgmr.msra.gmra.mxu1 %v6453_v34 }
 0x3ee   :  { %v6417_v20 = vpop.f32.mrf.mxu0 }
 0x3ef   :  { %v6450_v3 = vadd.f32 %v6440_v62, %v6416_v39 }
 0x3f1   :  { %v6455_v15 = vmax.f32 %v6450_v3, 0.0 }
 0x3f3   :  { %7702 = vmatmul.mubr.f32.vlgmr.msra.gmra.mxu0 %v6455_v15 }
 0x48d   :  { %v7614_v57 = vpop.f32.mrf.mxu1 }
 0x48f   :  { %v7615_v50 = vpop.f32.mrf.mxu1 }
 0x490   :  { %v7616_v40 = vadd.f32 %v7615_v50, %v7614_v57 }
 0x492   :  { %v6610_v46 = vadd.f32 %v7616_v40, %v7405_v32 }
 0x4ad   :  { %v7649_v25 = vpop.f32.mrf.mxu1 }
 0x4af   :  { %v7650_v0 = vpop.f32.mrf.mxu1 }
 0x4b0   :  { %v7651_v26 = vadd.f32 %v7650_v0, %v7649_v25 }
 0x4b2   :  { %v6680_v49 = vadd.f32 %v7651_v26, %v6610_v46 }
 0x4b3   :  { %v6749_v31 = vpop.f32.mrf.mxu0 }
 0x4b4   :  { %v6750_v36 = vadd.f32 %v6749_v31, %v6680_v49 }
 0x4b5   :  { %v7703_v21 = vpop.f32.mrf.mxu0 }
 0x4b6   :  { %6753 = vst [vmem:[%s9839_s7] sm:$0x3] %v6750_v36 }
 0x4b7   :  { %6758 = vsyncpa [#allocation3], 1 }
 0x4b8   :  { %6759 = vsyncpa [#allocation5], 1 }
 0x4b9   :  { %6760 = vsyncpa [#allocation8], 1 }

</bundles_post_ra>
